<compile_context>
chip_gen: v7x
topology: tpu7x:2x2x1
jax: 0.10.0
libtpu: 0.0.40
codegen_flags: <defaults>
</compile_context>

<pallas_src>
import jax
import jax.numpy as jnp
from jax.experimental import pallas as pl
from jax.experimental.pallas import tpu as pltpu


def _rb_kernel(x_ref, w_ref, alpha_ref, out_ref, xp_ref, p_ref):
    # x_ref:     (1, C, H, W)            one batch element, NCHW
    # w_ref:     (3*C, 9*C + 1)          rows [0:C]=conv3X3, [C:2C]=rb[0], [2C:3C]=rb[2]
    #                                    cols: (kh*3+kw)*C + cin, last col = bias
    # alpha_ref: (1,) in SMEM            shared PReLU slope
    # out_ref:   (1, C, H, W)
    # xp_ref:    (C, H+2, W+2) VMEM      zero-padded image scratch (reused for t)
    # p_ref:     (9*C + 1, H*W) VMEM     im2col patch matrix (+ ones row for bias)
    C = x_ref.shape[1]
    H = x_ref.shape[2]
    W = x_ref.shape[3]
    HW = H * W

    alpha = alpha_ref[0]

    # Zero-pad x into scratch. Borders are re-zeroed every step because the
    # scratch persists across grid iterations / megacore shards.
    xp_ref[...] = jnp.zeros_like(xp_ref)
    xp_ref[:, 1:1 + H, 1:1 + W] = x_ref[0].astype(jnp.float32)

    # Constant ones row -> bias column of the packed weights.
    p_ref[9 * C:9 * C + 1, :] = jnp.ones((1, HW), jnp.float32)

    def fill_patches():
        # Write the 9 shifted (C, H*W) slabs of the padded image into rows
        # [k*C:(k+1)*C] of the im2col scratch (lane-dense: H*W in lanes).
        for kh in range(3):
            for kw in range(3):
                k = kh * 3 + kw
                slab = xp_ref[:, kh:kh + H, kw:kw + W].reshape(C, HW)
                p_ref[k * C:(k + 1) * C, :] = slab

    # --- convs that read x: conv3X3 and rb[0], fused into one matmul --------
    fill_patches()
    p_x = p_ref[...]                                        # (9C+1, HW)
    y = jnp.dot(w_ref[0:2 * C, :], p_x,
                preferred_element_type=jnp.float32)         # (2C, HW)
    y_a = y[0:C]                                            # conv3X3(x) + b
    t = y[C:2 * C]                                          # rb[0](x) + b
    t = jnp.where(t > 0, t, alpha * t)                      # shared-alpha PReLU

    # Residual term: center tap (kh=kw=1) of the x im2col is exactly x, flat.
    x_flat = p_x[4 * C:5 * C, :]                            # (C, HW)

    # --- second conv of the rb branch: pad t (borders of xp are still zero) --
    xp_ref[:, 1:1 + H, 1:1 + W] = t.reshape(C, H, W)
    fill_patches()
    y_b = jnp.dot(w_ref[2 * C:3 * C, :], p_ref[...],
                  preferred_element_type=jnp.float32)       # (C, HW)

    out = x_flat + y_a + y_b                                # lane-dense epilogue
    out_ref[0] = out.reshape(C, H, W).astype(out_ref.dtype)


@jax.jit
def rb_forward(x, w3, b3, w1, b1, w2, b2, alpha):
    """RB forward. x: (N, C, H, W); w*: (C, C, 3, 3); b*: (C,); alpha: scalar."""
    N, C, H, W = x.shape

    def pack(w, b):
        # (Cout, Cin, 3, 3) -> (Cout, 9*Cin) with column order (kh*3+kw)*Cin+cin,
        # then append the bias as a last column (consumed by the ones-row in P).
        wm = jnp.transpose(w, (0, 2, 3, 1)).reshape(C, 9 * C)
        return jnp.concatenate([wm, b[:, None]], axis=1)

    w_all = jnp.concatenate(
        [pack(w3, b3), pack(w1, b1), pack(w2, b2)], axis=0).astype(jnp.float32)
    alpha_arr = jnp.reshape(alpha, (1,)).astype(jnp.float32)

    return pl.pallas_call(
        _rb_kernel,
        out_shape=jax.ShapeDtypeStruct((N, C, H, W), x.dtype),
        grid_spec=pltpu.PrefetchScalarGridSpec(
            num_scalar_prefetch=0,
            grid=(N,),
            in_specs=[
                pl.BlockSpec((1, C, H, W), lambda n: (n, 0, 0, 0)),
                pl.BlockSpec((3 * C, 9 * C + 1), lambda n: (0, 0)),
                pl.BlockSpec(memory_space=pltpu.MemorySpace.SMEM),
            ],
            out_specs=pl.BlockSpec((1, C, H, W), lambda n: (n, 0, 0, 0)),
            scratch_shapes=[
                pltpu.VMEM((C, H + 2, W + 2), jnp.float32),
                pltpu.VMEM((9 * C + 1, H * W), jnp.float32),
            ],
        ),
        compiler_params=pltpu.CompilerParams(dimension_semantics=("parallel",)),
    )(x, w_all, alpha_arr)


def _reference(x, w3, b3, w1, b1, w2, b2, alpha):
    """Pure-JAX reference (NCHW / OIHW convs)."""
    dn = ("NCHW", "OIHW", "NCHW")

    def conv(inp, w, b):
        y = jax.lax.conv_general_dilated(
            inp.astype(jnp.float32), w.astype(jnp.float32),
            window_strides=(1, 1), padding=[(1, 1), (1, 1)],
            dimension_numbers=dn, precision=jax.lax.Precision.HIGHEST)
        return y + b[None, :, None, None]

    y_a = conv(x, w3, b3)                      # conv3X3(x)
    t = conv(x, w1, b1)                        # rb[0](x)
    t = jnp.where(t > 0, t, alpha * t)         # rb[1] = PReLU (shared alpha)
    y_b = conv(t, w2, b2)                      # rb[2](t)
    return x + y_a + y_b


if __name__ == "__main__":
    n_feats = 4
    N, H, W = 2, 16, 16

    key = jax.random.PRNGKey(0)
    k_x, k_w3, k_w1, k_w2, k_b = jax.random.split(key, 5)

    x = jax.random.normal(k_x, (N, n_feats, H, W), dtype=jnp.float32)
    w3 = 0.1 * jax.random.normal(k_w3, (n_feats, n_feats, 3, 3), dtype=jnp.float32)
    w1 = 0.1 * jax.random.normal(k_w1, (n_feats, n_feats, 3, 3), dtype=jnp.float32)
    w2 = 0.1 * jax.random.normal(k_w2, (n_feats, n_feats, 3, 3), dtype=jnp.float32)
    b_all = 0.05 * jax.random.normal(k_b, (3, n_feats), dtype=jnp.float32)
    b3, b1, b2 = b_all[0], b_all[1], b_all[2]
    alpha = jnp.array(0.25, dtype=jnp.float32)   # PyTorch nn.PReLU() default init

    out = rb_forward(x, w3, b3, w1, b1, w2, b2, alpha)
    out = jax.block_until_ready(out)

    ref = _reference(x, w3, b3, w1, b1, w2, b2, alpha)
    assert out.shape == (N, n_feats, H, W), out.shape
    assert jnp.allclose(out, ref, rtol=1e-3, atol=1e-3), float(jnp.max(jnp.abs(out - ref)))

    print("KERNEL_OK")
</pallas_src>

<mosaic_0001>
module attributes {stable_mosaic.version = 11 : i64} {
  func.func @_rb_kernel(%arg0: i32, %arg1: memref<1x4x16x16xf32, #tpu.memory_space<vmem>>, %arg2: memref<12x37xf32, #tpu.memory_space<vmem>>, %arg3: memref<1xf32, #tpu.memory_space<smem>>, %arg4: memref<1x4x16x16xf32, #tpu.memory_space<vmem>>, %arg5: memref<4x18x18xf32, #tpu.memory_space<vmem>>, %arg6: memref<37x256xf32, #tpu.memory_space<vmem>>) attributes {dimension_semantics = [#tpu.dimension_semantics<parallel>], iteration_bounds = array<i64: 2>, scalar_prefetch = 0 : i64, scratch_operands = 2 : i64, tpu.core_type = #tpu.core_type<tc>, window_params = [{transform_indices = @transform_0, window_bounds = array<i64: 1, 4, 16, 16>}, {pipeline_mode = #tpu.pipeline_mode<synchronous>, transform_indices = @transform_1, window_bounds = array<i64: 12, 37>}, {transform_indices = @transform_2, window_bounds = array<i64: 1>}, {transform_indices = @transform_3, window_bounds = array<i64: 1, 4, 16, 16>}]} {
    %c0 = arith.constant 0 : index
    %0 = memref.load %arg3[%c0] : memref<1xf32, #tpu.memory_space<smem>>
    %cst = arith.constant 0.000000e+00 : f32
    %1 = vector.broadcast %cst : f32 to vector<4x18x18xf32>
    %c0_0 = arith.constant 0 : index
    %c0_1 = arith.constant 0 : index
    %c0_2 = arith.constant 0 : index
    %2 = vector.load %arg5[%c0_0, %c0_1, %c0_2] : memref<4x18x18xf32, #tpu.memory_space<vmem>>, vector<4x18x18xf32>
    tpu.vector_store %arg5[%c0_0, %c0_1, %c0_2], %1 {strides = array<i32>} : memref<4x18x18xf32, #tpu.memory_space<vmem>>, vector<4x18x18xf32>,
    %c0_3 = arith.constant 0 : index
    %c0_4 = arith.constant 0 : index
    %c0_5 = arith.constant 0 : index
    %c0_6 = arith.constant 0 : index
    %3 = vector.load %arg1[%c0_3, %c0_4, %c0_5, %c0_6] : memref<1x4x16x16xf32, #tpu.memory_space<vmem>>, vector<1x4x16x16xf32>
    %4 = vector.shape_cast %3 : vector<1x4x16x16xf32> to vector<4x16x16xf32>
    %c0_7 = arith.constant 0 : index
    %c1 = arith.constant 1 : index
    %c1_8 = arith.constant 1 : index
    %5 = vector.load %arg5[%c0_7, %c1, %c1_8] : memref<4x18x18xf32, #tpu.memory_space<vmem>>, vector<4x16x16xf32>
    tpu.vector_store %arg5[%c0_7, %c1, %c1_8], %4 {strides = array<i32>} : memref<4x18x18xf32, #tpu.memory_space<vmem>>, vector<4x16x16xf32>,
    %cst_9 = arith.constant 1.000000e+00 : f32
    %6 = vector.broadcast %cst_9 : f32 to vector<1x256xf32>
    %c36 = arith.constant 36 : index
    %c0_10 = arith.constant 0 : index
    %7 = vector.load %arg6[%c36, %c0_10] : memref<37x256xf32, #tpu.memory_space<vmem>>, vector<1x256xf32>
    tpu.vector_store %arg6[%c36, %c0_10], %6 {strides = array<i32>} : memref<37x256xf32, #tpu.memory_space<vmem>>, vector<1x256xf32>,
    %c0_11 = arith.constant 0 : index
    %c0_12 = arith.constant 0 : index
    %c0_13 = arith.constant 0 : index
    %8 = vector.load %arg5[%c0_11, %c0_12, %c0_13] : memref<4x18x18xf32, #tpu.memory_space<vmem>>, vector<4x16x16xf32>
    %9 = vector.shape_cast %8 : vector<4x16x16xf32> to vector<4x256xf32>
    %c0_14 = arith.constant 0 : index
    %c0_15 = arith.constant 0 : index
    %10 = vector.load %arg6[%c0_14, %c0_15] : memref<37x256xf32, #tpu.memory_space<vmem>>, vector<4x256xf32>
    tpu.vector_store %arg6[%c0_14, %c0_15], %9 {strides = array<i32>} : memref<37x256xf32, #tpu.memory_space<vmem>>, vector<4x256xf32>,
    %c0_16 = arith.constant 0 : index
    %c0_17 = arith.constant 0 : index
    %c1_18 = arith.constant 1 : index
    %11 = vector.load %arg5[%c0_16, %c0_17, %c1_18] : memref<4x18x18xf32, #tpu.memory_space<vmem>>, vector<4x16x16xf32>
    %12 = vector.shape_cast %11 : vector<4x16x16xf32> to vector<4x256xf32>
    %c4 = arith.constant 4 : index
    %c0_19 = arith.constant 0 : index
    %13 = vector.load %arg6[%c4, %c0_19] : memref<37x256xf32, #tpu.memory_space<vmem>>, vector<4x256xf32>
    tpu.vector_store %arg6[%c4, %c0_19], %12 {strides = array<i32>} : memref<37x256xf32, #tpu.memory_space<vmem>>, vector<4x256xf32>,
    %c0_20 = arith.constant 0 : index
    %c0_21 = arith.constant 0 : index
    %c2 = arith.constant 2 : index
    %14 = vector.load %arg5[%c0_20, %c0_21, %c2] : memref<4x18x18xf32, #tpu.memory_space<vmem>>, vector<4x16x16xf32>
    %15 = vector.shape_cast %14 : vector<4x16x16xf32> to vector<4x256xf32>
    %c8 = arith.constant 8 : index
    %c0_22 = arith.constant 0 : index
    %16 = vector.load %arg6[%c8, %c0_22] : memref<37x256xf32, #tpu.memory_space<vmem>>, vector<4x256xf32>
    tpu.vector_store %arg6[%c8, %c0_22], %15 {strides = array<i32>} : memref<37x256xf32, #tpu.memory_space<vmem>>, vector<4x256xf32>,
    %c0_23 = arith.constant 0 : index
    %c1_24 = arith.constant 1 : index
    %c0_25 = arith.constant 0 : index
    %17 = vector.load %arg5[%c0_23, %c1_24, %c0_25] : memref<4x18x18xf32, #tpu.memory_space<vmem>>, vector<4x16x16xf32>
    %18 = vector.shape_cast %17 : vector<4x16x16xf32> to vector<4x256xf32>
    %c12 = arith.constant 12 : index
    %c0_26 = arith.constant 0 : index
    %19 = vector.load %arg6[%c12, %c0_26] : memref<37x256xf32, #tpu.memory_space<vmem>>, vector<4x256xf32>
    tpu.vector_store %arg6[%c12, %c0_26], %18 {strides = array<i32>} : memref<37x256xf32, #tpu.memory_space<vmem>>, vector<4x256xf32>,
    %c0_27 = arith.constant 0 : index
    %c1_28 = arith.constant 1 : index
    %c1_29 = arith.constant 1 : index
    %20 = vector.load %arg5[%c0_27, %c1_28, %c1_29] : memref<4x18x18xf32, #tpu.memory_space<vmem>>, vector<4x16x16xf32>
    %21 = vector.shape_cast %20 : vector<4x16x16xf32> to vector<4x256xf32>
    %c16 = arith.constant 16 : index
    %c0_30 = arith.constant 0 : index
    %22 = vector.load %arg6[%c16, %c0_30] : memref<37x256xf32, #tpu.memory_space<vmem>>, vector<4x256xf32>
    tpu.vector_store %arg6[%c16, %c0_30], %21 {strides = array<i32>} : memref<37x256xf32, #tpu.memory_space<vmem>>, vector<4x256xf32>,
    %c0_31 = arith.constant 0 : index
    %c1_32 = arith.constant 1 : index
    %c2_33 = arith.constant 2 : index
    %23 = vector.load %arg5[%c0_31, %c1_32, %c2_33] : memref<4x18x18xf32, #tpu.memory_space<vmem>>, vector<4x16x16xf32>
    %24 = vector.shape_cast %23 : vector<4x16x16xf32> to vector<4x256xf32>
    %c20 = arith.constant 20 : index
    %c0_34 = arith.constant 0 : index
    %25 = vector.load %arg6[%c20, %c0_34] : memref<37x256xf32, #tpu.memory_space<vmem>>, vector<4x256xf32>
    tpu.vector_store %arg6[%c20, %c0_34], %24 {strides = array<i32>} : memref<37x256xf32, #tpu.memory_space<vmem>>, vector<4x256xf32>,
    %c0_35 = arith.constant 0 : index
    %c2_36 = arith.constant 2 : index
    %c0_37 = arith.constant 0 : index
    %26 = vector.load %arg5[%c0_35, %c2_36, %c0_37] : memref<4x18x18xf32, #tpu.memory_space<vmem>>, vector<4x16x16xf32>
    %27 = vector.shape_cast %26 : vector<4x16x16xf32> to vector<4x256xf32>
    %c24 = arith.constant 24 : index
    %c0_38 = arith.constant 0 : index
    %28 = vector.load %arg6[%c24, %c0_38] : memref<37x256xf32, #tpu.memory_space<vmem>>, vector<4x256xf32>
    tpu.vector_store %arg6[%c24, %c0_38], %27 {strides = array<i32>} : memref<37x256xf32, #tpu.memory_space<vmem>>, vector<4x256xf32>,
    %c0_39 = arith.constant 0 : index
    %c2_40 = arith.constant 2 : index
    %c1_41 = arith.constant 1 : index
    %29 = vector.load %arg5[%c0_39, %c2_40, %c1_41] : memref<4x18x18xf32, #tpu.memory_space<vmem>>, vector<4x16x16xf32>
    %30 = vector.shape_cast %29 : vector<4x16x16xf32> to vector<4x256xf32>
    %c28 = arith.constant 28 : index
    %c0_42 = arith.constant 0 : index
    %31 = vector.load %arg6[%c28, %c0_42] : memref<37x256xf32, #tpu.memory_space<vmem>>, vector<4x256xf32>
    tpu.vector_store %arg6[%c28, %c0_42], %30 {strides = array<i32>} : memref<37x256xf32, #tpu.memory_space<vmem>>, vector<4x256xf32>,
    %c0_43 = arith.constant 0 : index
    %c2_44 = arith.constant 2 : index
    %c2_45 = arith.constant 2 : index
    %32 = vector.load %arg5[%c0_43, %c2_44, %c2_45] : memref<4x18x18xf32, #tpu.memory_space<vmem>>, vector<4x16x16xf32>
    %33 = vector.shape_cast %32 : vector<4x16x16xf32> to vector<4x256xf32>
    %c32 = arith.constant 32 : index
    %c0_46 = arith.constant 0 : index
    %34 = vector.load %arg6[%c32, %c0_46] : memref<37x256xf32, #tpu.memory_space<vmem>>, vector<4x256xf32>
    tpu.vector_store %arg6[%c32, %c0_46], %33 {strides = array<i32>} : memref<37x256xf32, #tpu.memory_space<vmem>>, vector<4x256xf32>,
    %c0_47 = arith.constant 0 : index
    %c0_48 = arith.constant 0 : index
    %35 = vector.load %arg6[%c0_47, %c0_48] : memref<37x256xf32, #tpu.memory_space<vmem>>, vector<37x256xf32>
    %c0_49 = arith.constant 0 : index
    %c0_50 = arith.constant 0 : index
    %36 = vector.load %arg2[%c0_49, %c0_50] : memref<12x37xf32, #tpu.memory_space<vmem>>, vector<8x37xf32>
    %cst_51 = arith.constant dense<0.000000e+00> : vector<8x256xf32>
    %37 = tpu.matmul %36, %35, %cst_51 {dimension_numbers = #tpu.dot_dimension_numbers<[1], [0], [0], [1], [0, 0, 1, 1], [], []>} : vector<8x37xf32>, vector<37x256xf32>, vector<8x256xf32> -> vector<8x256xf32>
    %38 = vector.extract_strided_slice %37 {offsets = [0, 0], sizes = [4, 256], strides = [1, 1]} : vector<8x256xf32> to vector<4x256xf32>
    %39 = vector.extract_strided_slice %37 {offsets = [4, 0], sizes = [4, 256], strides = [1, 1]} : vector<8x256xf32> to vector<4x256xf32>
    %cst_52 = arith.constant 0.000000e+00 : f32
    %40 = vector.broadcast %cst_52 : f32 to vector<4x256xf32>
    %41 = arith.cmpf ogt, %39, %40 : vector<4x256xf32>
    %42 = vector.broadcast %0 : f32 to vector<4x256xf32>
    %43 = arith.mulf %42, %39 : vector<4x256xf32>
    %44 = arith.select %41, %39, %43 : vector<4x256xi1>, vector<4x256xf32>
    %45 = vector.extract_strided_slice %35 {offsets = [16, 0], sizes = [4, 256], strides = [1, 1]} : vector<37x256xf32> to vector<4x256xf32>
    %46 = vector.shape_cast %44 : vector<4x256xf32> to vector<4x16x16xf32>
    %c0_53 = arith.constant 0 : index
    %c1_54 = arith.constant 1 : index
    %c1_55 = arith.constant 1 : index
    %47 = vector.load %arg5[%c0_53, %c1_54, %c1_55] : memref<4x18x18xf32, #tpu.memory_space<vmem>>, vector<4x16x16xf32>
    tpu.vector_store %arg5[%c0_53, %c1_54, %c1_55], %46 {strides = array<i32>} : memref<4x18x18xf32, #tpu.memory_space<vmem>>, vector<4x16x16xf32>,
    %c0_56 = arith.constant 0 : index
    %c0_57 = arith.constant 0 : index
    %c0_58 = arith.constant 0 : index
    %48 = vector.load %arg5[%c0_56, %c0_57, %c0_58] : memref<4x18x18xf32, #tpu.memory_space<vmem>>, vector<4x16x16xf32>
    %49 = vector.shape_cast %48 : vector<4x16x16xf32> to vector<4x256xf32>
    %c0_59 = arith.constant 0 : index
    %c0_60 = arith.constant 0 : index
    %50 = vector.load %arg6[%c0_59, %c0_60] : memref<37x256xf32, #tpu.memory_space<vmem>>, vector<4x256xf32>
    tpu.vector_store %arg6[%c0_59, %c0_60], %49 {strides = array<i32>} : memref<37x256xf32, #tpu.memory_space<vmem>>, vector<4x256xf32>,
    %c0_61 = arith.constant 0 : index
    %c0_62 = arith.constant 0 : index
    %c1_63 = arith.constant 1 : index
    %51 = vector.load %arg5[%c0_61, %c0_62, %c1_63] : memref<4x18x18xf32, #tpu.memory_space<vmem>>, vector<4x16x16xf32>
    %52 = vector.shape_cast %51 : vector<4x16x16xf32> to vector<4x256xf32>
    %c4_64 = arith.constant 4 : index
    %c0_65 = arith.constant 0 : index
    %53 = vector.load %arg6[%c4_64, %c0_65] : memref<37x256xf32, #tpu.memory_space<vmem>>, vector<4x256xf32>
    tpu.vector_store %arg6[%c4_64, %c0_65], %52 {strides = array<i32>} : memref<37x256xf32, #tpu.memory_space<vmem>>, vector<4x256xf32>,
    %c0_66 = arith.constant 0 : index
    %c0_67 = arith.constant 0 : index
    %c2_68 = arith.constant 2 : index
    %54 = vector.load %arg5[%c0_66, %c0_67, %c2_68] : memref<4x18x18xf32, #tpu.memory_space<vmem>>, vector<4x16x16xf32>
    %55 = vector.shape_cast %54 : vector<4x16x16xf32> to vector<4x256xf32>
    %c8_69 = arith.constant 8 : index
    %c0_70 = arith.constant 0 : index
    %56 = vector.load %arg6[%c8_69, %c0_70] : memref<37x256xf32, #tpu.memory_space<vmem>>, vector<4x256xf32>
    tpu.vector_store %arg6[%c8_69, %c0_70], %55 {strides = array<i32>} : memref<37x256xf32, #tpu.memory_space<vmem>>, vector<4x256xf32>,
    %c0_71 = arith.constant 0 : index
    %c1_72 = arith.constant 1 : index
    %c0_73 = arith.constant 0 : index
    %57 = vector.load %arg5[%c0_71, %c1_72, %c0_73] : memref<4x18x18xf32, #tpu.memory_space<vmem>>, vector<4x16x16xf32>
    %58 = vector.shape_cast %57 : vector<4x16x16xf32> to vector<4x256xf32>
    %c12_74 = arith.constant 12 : index
    %c0_75 = arith.constant 0 : index
    %59 = vector.load %arg6[%c12_74, %c0_75] : memref<37x256xf32, #tpu.memory_space<vmem>>, vector<4x256xf32>
    tpu.vector_store %arg6[%c12_74, %c0_75], %58 {strides = array<i32>} : memref<37x256xf32, #tpu.memory_space<vmem>>, vector<4x256xf32>,
    %c0_76 = arith.constant 0 : index
    %c1_77 = arith.constant 1 : index
    %c1_78 = arith.constant 1 : index
    %60 = vector.load %arg5[%c0_76, %c1_77, %c1_78] : memref<4x18x18xf32, #tpu.memory_space<vmem>>, vector<4x16x16xf32>
    %61 = vector.shape_cast %60 : vector<4x16x16xf32> to vector<4x256xf32>
    %c16_79 = arith.constant 16 : index
    %c0_80 = arith.constant 0 : index
    %62 = vector.load %arg6[%c16_79, %c0_80] : memref<37x256xf32, #tpu.memory_space<vmem>>, vector<4x256xf32>
    tpu.vector_store %arg6[%c16_79, %c0_80], %61 {strides = array<i32>} : memref<37x256xf32, #tpu.memory_space<vmem>>, vector<4x256xf32>,
    %c0_81 = arith.constant 0 : index
    %c1_82 = arith.constant 1 : index
    %c2_83 = arith.constant 2 : index
    %63 = vector.load %arg5[%c0_81, %c1_82, %c2_83] : memref<4x18x18xf32, #tpu.memory_space<vmem>>, vector<4x16x16xf32>
    %64 = vector.shape_cast %63 : vector<4x16x16xf32> to vector<4x256xf32>
    %c20_84 = arith.constant 20 : index
    %c0_85 = arith.constant 0 : index
    %65 = vector.load %arg6[%c20_84, %c0_85] : memref<37x256xf32, #tpu.memory_space<vmem>>, vector<4x256xf32>
    tpu.vector_store %arg6[%c20_84, %c0_85], %64 {strides = array<i32>} : memref<37x256xf32, #tpu.memory_space<vmem>>, vector<4x256xf32>,
    %c0_86 = arith.constant 0 : index
    %c2_87 = arith.constant 2 : index
    %c0_88 = arith.constant 0 : index
    %66 = vector.load %arg5[%c0_86, %c2_87, %c0_88] : memref<4x18x18xf32, #tpu.memory_space<vmem>>, vector<4x16x16xf32>
    %67 = vector.shape_cast %66 : vector<4x16x16xf32> to vector<4x256xf32>
    %c24_89 = arith.constant 24 : index
    %c0_90 = arith.constant 0 : index
    %68 = vector.load %arg6[%c24_89, %c0_90] : memref<37x256xf32, #tpu.memory_space<vmem>>, vector<4x256xf32>
    tpu.vector_store %arg6[%c24_89, %c0_90], %67 {strides = array<i32>} : memref<37x256xf32, #tpu.memory_space<vmem>>, vector<4x256xf32>,
    %c0_91 = arith.constant 0 : index
    %c2_92 = arith.constant 2 : index
    %c1_93 = arith.constant 1 : index
    %69 = vector.load %arg5[%c0_91, %c2_92, %c1_93] : memref<4x18x18xf32, #tpu.memory_space<vmem>>, vector<4x16x16xf32>
    %70 = vector.shape_cast %69 : vector<4x16x16xf32> to vector<4x256xf32>
    %c28_94 = arith.constant 28 : index
    %c0_95 = arith.constant 0 : index
    %71 = vector.load %arg6[%c28_94, %c0_95] : memref<37x256xf32, #tpu.memory_space<vmem>>, vector<4x256xf32>
    tpu.vector_store %arg6[%c28_94, %c0_95], %70 {strides = array<i32>} : memref<37x256xf32, #tpu.memory_space<vmem>>, vector<4x256xf32>,
    %c0_96 = arith.constant 0 : index
    %c2_97 = arith.constant 2 : index
    %c2_98 = arith.constant 2 : index
    %72 = vector.load %arg5[%c0_96, %c2_97, %c2_98] : memref<4x18x18xf32, #tpu.memory_space<vmem>>, vector<4x16x16xf32>
    %73 = vector.shape_cast %72 : vector<4x16x16xf32> to vector<4x256xf32>
    %c32_99 = arith.constant 32 : index
    %c0_100 = arith.constant 0 : index
    %74 = vector.load %arg6[%c32_99, %c0_100] : memref<37x256xf32, #tpu.memory_space<vmem>>, vector<4x256xf32>
    tpu.vector_store %arg6[%c32_99, %c0_100], %73 {strides = array<i32>} : memref<37x256xf32, #tpu.memory_space<vmem>>, vector<4x256xf32>,
    %c8_101 = arith.constant 8 : index
    %c0_102 = arith.constant 0 : index
    %75 = vector.load %arg2[%c8_101, %c0_102] : memref<12x37xf32, #tpu.memory_space<vmem>>, vector<4x37xf32>
    %c0_103 = arith.constant 0 : index
    %c0_104 = arith.constant 0 : index
    %76 = vector.load %arg6[%c0_103, %c0_104] : memref<37x256xf32, #tpu.memory_space<vmem>>, vector<37x256xf32>
    %cst_105 = arith.constant dense<0.000000e+00> : vector<4x256xf32>
    %77 = tpu.matmul %75, %76, %cst_105 {dimension_numbers = #tpu.dot_dimension_numbers<[1], [0], [0], [1], [0, 0, 1, 1], [], []>} : vector<4x37xf32>, vector<37x256xf32>, vector<4x256xf32> -> vector<4x256xf32>
    %78 = arith.addf %45, %38 : vector<4x256xf32>
    %79 = arith.addf %78, %77 : vector<4x256xf32>
    %80 = vector.shape_cast %79 : vector<4x256xf32> to vector<4x16x16xf32>
    %c0_106 = arith.constant 0 : index
    %c0_107 = arith.constant 0 : index
    %c0_108 = arith.constant 0 : index
    %c0_109 = arith.constant 0 : index
    %81 = vector.load %arg4[%c0_106, %c0_107, %c0_108, %c0_109] : memref<1x4x16x16xf32, #tpu.memory_space<vmem>>, vector<1x4x16x16xf32>
    %82 = vector.shape_cast %81 : vector<1x4x16x16xf32> to vector<4x16x16xf32>
    %83 = vector.shape_cast %80 : vector<4x16x16xf32> to vector<1x4x16x16xf32>
    tpu.vector_store %arg4[%c0_106, %c0_107, %c0_108, %c0_109], %83 {strides = array<i32>} : memref<1x4x16x16xf32, #tpu.memory_space<vmem>>, vector<1x4x16x16xf32>,
    return
  }
  func.func @transform_0(%arg0: i32) -> (i32, i32, i32, i32) {
    %c0_i32 = arith.constant 0 : i32
    %c0_i32_0 = arith.constant 0 : i32
    %c0_i32_1 = arith.constant 0 : i32
    %c0_i32_2 = arith.constant 0 : i32
    return %arg0, %c0_i32, %c0_i32_0, %c0_i32_1 : i32, i32, i32, i32
  }
  func.func @transform_1(%arg0: i32) -> (i32, i32) {
    %c0_i32 = arith.constant 0 : i32
    %c0_i32_0 = arith.constant 0 : i32
    %c0_i32_1 = arith.constant 0 : i32
    return %c0_i32, %c0_i32_0 : i32, i32
  }
  func.func @transform_2(%arg0: i32) -> i32 {
    %c0_i32 = arith.constant 0 : i32
    %c0_i32_0 = arith.constant 0 : i32
    return %c0_i32 : i32
  }
  func.func @transform_3(%arg0: i32) -> (i32, i32, i32, i32) {
    %c0_i32 = arith.constant 0 : i32
    %c0_i32_0 = arith.constant 0 : i32
    %c0_i32_1 = arith.constant 0 : i32
    %c0_i32_2 = arith.constant 0 : i32
    return %arg0, %c0_i32, %c0_i32_0, %c0_i32_1 : i32, i32, i32, i32
  }
}

</mosaic_0001>

<bundles_post_ra>
// kernel: rb_forward.1
= control target key start
LH: loop header
LB: loop body
LE: loop exit
PB: predicated region body
PF: predicated region fallthrough
CT: control target
= control target key end

     0   :  { %s8572_s0 = inlined_call_operand.vmem [shape: f32[2,4,16,16], index: 0, kind: input, shape index: {}]   ;;  %s8573_s1 = inlined_call_operand.vmem [shape: f32[12,37], index: 1, kind: input, shape index: {}]   ;;  %s8574_s2 = inlined_call_operand.<no memory space> [shape: f32[1], index: 2, kind: input, shape index: {}]   ;;  %s8575_s3 = inlined_call_operand.hbm [shape: f32[2,4,16,16], index: 3, kind: output, shape index: {}]  }
   0x1   :  { %8 = sst [smem:[#allocation4]] %s8574_s2 }
   0x2   :  { %9 = vsyncpa [#allocation6], 0 }
   0x3   :  { %11 = vsyncpa [#allocation6 + $0x1], 0  ;;  %s5508_s14 = smov 0   ;;  %s5510_s15 = smov 0  }
   0x4   :  { %s5512_s16 = smov 0   ;;  %s5514_s17 = smov 0  }
   0x5 LB: > { %s5529_s2 = sadd.s32 4294967295, %s5466_s17   ;;  %s5265_s18 = sadd.s32 4294967294, %s5466_s17   ;;  %s5466_s17 = sphi %s5514_s17, %s8788_s17   ;;  %s5462_s16 = sphi %s5512_s16, %s8787_s16   ;;  %s5458_s15 = sphi %s5510_s15, %s8786_s15   ;;  %s5454_s14 = sphi %s5508_s14, %s8785_s14  }
   0x6   : > { %s5533_s19 = sadd.s32 1, %s5466_s17   ;;  %s92_s20 = sadd.s32 1, %s5462_s16 }
   0x7   : > { %s89_s21 = ssub.s32 %s5466_s17, %s5533_s19  ;;  %p102_p0 = scmp.ne.s32.totalorder %s5462_s16, %s5458_s15 }
   0x8   : > { %p90_p1 = scmp.eq.s32.totalorder %s89_s21, 0  ;;  %p103_p2 = scmp.eq.s32.totalorder %s5529_s2, 1 }
   0x9   : > { %p108_p3 = scmp.ne.s32.totalorder %s5458_s15, %s5454_s14  ;;  %p109_p4 = scmp.eq.s32.totalorder %s5265_s18, 1 }
   0xa   : > { %s5544_s22 = scalar_select %p90_p1, %s5462_s16, %s92_s20  }
   0xb   : > { %p5546_p5 = por %p103_p2, %p102_p0  ;;  %p5550_p6 = por %p109_p4, %p108_p3 }
   0xc   : > { %p5268_p7 = scmp.ge.s32.totalorder %s5466_s17, 1  ;;  %p141_p8 = scmp.lt.s32.totalorder %s5466_s17, 3 }
   0xe   : > { %p142_p9 = pnand %p5268_p7, %p141_p8 }
  0x10   : > { %145 = sbr.rel (%p142_p9) target bundleno = 1979 (0x7bb), region = 32 }
  0x17   : > { %p165_p10 = scmp.lt.s32.totalorder %s5529_s2, 1  ;;  %vm171_vm0 = vcmask 146432   ;;  %vm174_vm1 = vcmask 140288   ;;  %v8577_v0 = vmov 0.0   ;;  %s5469_s30 = smov 1   ;;  %vm225_vm2 = vcmask 138248  }
  0x18   : > { %176 = vst.msk [vmem:[#allocation2 + $0x18] sm:$0xff] %vm171_vm0, %v8577_v0  ;;  %177 = vst.msk [vmem:[#allocation2 + $0x20] sm:$0xff] %vm171_vm0, %v8577_v0  ;;  %2494 = vmatprep.mubr.f32.mxu0 %v8577_v0  ;;  %4990 = vmatprep.mubr.f32.mxu1 %v8577_v0  ;;  %s5470_s4 = smov 127   ;;  %v8576_v24 = vlaneseq  ;;  %v5471_v25 = vmov 1983009808   ;;  %s5472_s5 = smov 126  }
  0x19   : > { %172 = vst.msk [vmem:[#allocation2] sm:$0xff] %vm171_vm0, %v8577_v0  ;;  %173 = vst.msk [vmem:[#allocation2 + $0x8] sm:$0xff] %vm171_vm0, %v8577_v0  ;;  %s166_s25 = scalar_select %p165_p10, %s5529_s2, 1  ;;  %v252_v26 = vunpack.c.l.s4 %v5471_v25  ;;  %v5473_v52 = vmov 1934713408   ;;  %vm441_vm3 = vcmask 130048  }
  0x1a   : > { %179 = vst.msk [vmem:[#allocation2 + $0x30] sm:$0xff] %vm171_vm0, %v8577_v0  ;;  %180 = vst.msk [vmem:[#allocation2 + $0x38] sm:$0xff] %vm171_vm0, %v8577_v0  ;;  %v5628_v29 = vshrl.u32 %v8576_v24, 7  ;;  %v284_v53 = vunpack.c.l.s4 %v5473_v52  ;;  %s5474_s6 = smov 32   ;;  %s5475_s7 = smov 64   ;;  %vm445_vm4 = vcmask 392192  }
  0x1b   : > { %182 = vst.msk [vmem:[#allocation2 + $0x48] sm:$0xff] %vm171_vm0, %v8577_v0  ;;  %183 = vst.msk [vmem:[#allocation2 + $0x50] sm:$0xff] %vm171_vm0, %v8577_v0  ;;  %s5283_s26 = sshll.u32 %s166_s25, 6  ;;  %v253_v28 = vunpack.c.0.s8 %v252_v26  ;;  %s5476_s8 = smov 16   ;;  %vm443_vm5 = vcmask 261120   ;;  %vm447_vm6 = vcmask 523264  }
  0x1c   : > { %178 = vst.msk [vmem:[#allocation2 + $0x28] sm:$0x3] %vm174_vm1, %v8577_v0  ;;  %175 = vst.msk [vmem:[#allocation2 + $0x10] sm:$0x3] %vm174_vm1, %v8577_v0  ;;  %s169_s29 = scalar_lea.vmem %s8572_s0, %s5283_s26  ;;  %v285_v56 = vunpack.c.0.s8 %v284_v53  ;;  %s5477_s9 = smov 48   ;;  %vm449_vm7 = vcmask 654336  }
  0x1d   : > { %181 = vst.msk [vmem:[#allocation2 + $0x40] sm:$0x3] %vm174_vm1, %v8577_v0  ;;  %184 = vst.msk [vmem:[#allocation2 + $0x58] sm:$0x3] %vm174_vm1, %v8577_v0  ;;  %v187_v1 = vld [vmem:[%s169_s29 + $0x10] sm:$0xff]  ;;  %v185_v2 = vld [vmem:[%s169_s29] sm:$0xff]  ;;  %v5639_v33 = vsub.s32 %v253_v28, %v5628_v29 }
  0x1e   : > { %205 = vrot.lane.b32.xlu1 %v187_v1, %s5469_s30  ;;  %201 = vrot.lane.b32.xlu0 %v185_v2, %s5469_s30  ;;  %v188_v3 = vld [vmem:[%s169_s29 + $0x18] sm:$0xff]  ;;  %v186_v4 = vld [vmem:[%s169_s29 + $0x8] sm:$0xff]  ;;  %v5739_v63 = vsub.s32 %v285_v56, %v5628_v29  ;;  %s5478_s10 = smov 80   ;;  %s5479_s11 = smov 96   ;;  %vm451_vm8 = vcmask 785408   ;;  %vm453_vm9 = vcmask 916480  }
  0x1f   : > { %v190_v5 = vld [vmem:[%s169_s29 + $0x28] sm:$0xff]  ;;  %v189_v6 = vld [vmem:[%s169_s29 + $0x20] sm:$0xff]  ;;  %v192_v7 = vld [vmem:[%s169_s29 + $0x38] sm:$0xff]  ;;  %8644 = vst [vmem:[#allocation8_spill] sm:$0xff] %v5639_v33  ;;  %s5480_s12 = smov 112   ;;  %vm2423_vm11 = vcmask 1044480  }
  0x20   : > { %v191_v8 = vld [vmem:[%s169_s29 + $0x30] sm:$0xff]  ;;  %vm2419_vm12 = vcmask 302080   ;;  %s170_s20 = sld [smem:[#allocation4]]  ;;  %s162_s26 = sand.u32 1, %s5458_s15  }
  0x21   : > { %s5269_s27 = sshll.u32 %s162_s26, 6  ;;  %s5284_s29 = sshll.u32 %s5529_s2, 10 }
  0x22   : > { %207 = vrot.lane.b32.xlu1 %v188_v3, %s5469_s30  ;;  %203 = vrot.lane.b32.xlu0 %v186_v4, %s5469_s30  ;;  %s8494_s28 = scalar_lea.vmem [#allocation5], %s5269_s27  ;;  %s8531_s2 = scalar_lea.sflag [#allocation6], %s162_s26 }
  0x26   : > { %211 = vrot.lane.b32.xlu1 %v190_v5, %s5469_s30  ;;  %209 = vrot.lane.b32.xlu0 %v189_v6, %s5469_s30 }
  0x2a   : > { %215 = vrot.lane.b32.xlu1 %v192_v7, %s5469_s30  ;;  %213 = vrot.lane.b32.xlu0 %v191_v8, %s5469_s30 }
  0x90   : > { %v206_v9 = vpop.permute.xlu1 %205  ;;  %v202_v10 = vpop.permute.xlu0 %201 }
  0x91   : > { %228 = vst.msk [vmem:[#allocation2 + $0x19] sm:$0xff] %vm225_vm2, %v206_v9  ;;  %226 = vst.msk [vmem:[#allocation2 + $0x1] sm:$0xff] %vm225_vm2, %v202_v10 }
  0x94   : > { %v208_v11 = vpop.permute.xlu1 %207  ;;  %v204_v12 = vpop.permute.xlu0 %203 }
  0x95   : > { %229 = vst.msk [vmem:[#allocation2 + $0x21] sm:$0xff] %vm225_vm2, %v208_v11  ;;  %227 = vst.msk [vmem:[#allocation2 + $0x9] sm:$0xff] %vm225_vm2, %v204_v12 }
  0x98   : > { %v212_v13 = vpop.permute.xlu1 %211  ;;  %v210_v14 = vpop.permute.xlu0 %209  ;;  %v5605_v20 = vld [vmem:[#allocation2] sm:$0xff]  ;;  %v5615_v23 = vld [vmem:[#allocation2 + $0x18] sm:$0xff] }
  0x99   : > { %231 = vst.msk [vmem:[#allocation2 + $0x39] sm:$0xff] %vm225_vm2, %v212_v13  ;;  %230 = vst.msk [vmem:[#allocation2 + $0x31] sm:$0xff] %vm225_vm2, %v210_v14  ;;  %v1436_v47 = vld [vmem:[#allocation2 + $0x1] sm:$0xff]  ;;  %v1438_v50 = vld [vmem:[#allocation2 + $0x19] sm:$0xff] }
  0x9c   : > { %v216_v15 = vpop.permute.xlu1 %215  ;;  %v214_v16 = vpop.permute.xlu0 %213  ;;  %v5591_v17 = vld [vmem:[#allocation2 + $0x20] sm:$0xff]  ;;  %v5593_v18 = vld [vmem:[#allocation2 + $0x8] sm:$0xff] }
  0x9d   : > { %233 = vst.msk [vmem:[#allocation2 + $0x51] sm:$0xff] %vm225_vm2, %v216_v15  ;;  %232 = vst.msk [vmem:[#allocation2 + $0x49] sm:$0xff] %vm225_vm2, %v214_v16  ;;  %486 = vrot.lane.b32.xlu1 %v5591_v17, %s5470_s4  ;;  %482 = vrot.lane.b32.xlu0 %v5593_v18, %s5470_s4  ;;  %v1906_v32 = vld [vmem:[#allocation2 + $0x2] sm:$0xff]  ;;  %v5641_v34 = vld [vmem:[#allocation2 + $0x1a] sm:$0xff] }
  0x9e   : > { %v5662_v40 = vld [vmem:[#allocation2 + $0x9] sm:$0xff]  ;;  %v5670_v42 = vld [vmem:[#allocation2 + $0x21] sm:$0xff] }
  0x9f   : > { %v5676_v43 = vld [vmem:[#allocation2 + $0xa] sm:$0xff]  ;;  %v5686_v46 = vld [vmem:[#allocation2 + $0x22] sm:$0xff] }
  0xa0   : > { %v5601_v19 = vld [vmem:[#allocation2 + $0x38] sm:$0xff]  ;;  %v5613_v22 = vld [vmem:[#allocation2 + $0x30] sm:$0xff]  ;;  %8647 = vst [vmem:[#allocation11_spill] sm:$0xff] %v5676_v43 }
  0xa1   : > { %490 = vrot.lane.b32.xlu0 %v5601_v19, %s5470_s4  ;;  %v5630_v30 = vld [vmem:[#allocation2 + $0x32] sm:$0xff]  ;;  %v5684_v45 = vld [vmem:[#allocation2 + $0x3a] sm:$0xff]  ;;  %v249_v62 = vcombine.low %v5605_v20, %v5613_v22  ;;  %v317_v6 = vcombine.low %v5593_v18, %v5601_v19 }
  0xa2   : > { %v1698_v35 = vcombine.low %v1906_v32, %v5630_v30  ;;  %v5668_v41 = vld [vmem:[#allocation2 + $0x39] sm:$0xff]  ;;  %8648 = vst [vmem:[#allocation12_spill] sm:$0xff] %v5684_v45  ;;  %v1440_v49 = vld [vmem:[#allocation2 + $0x31] sm:$0xff] }
  0xa3   : > { %v974_v55 = vcombine.low %v1436_v47, %v1440_v49  ;;  %v1042_v61 = vcombine.low %v5662_v40, %v5668_v41  ;;  %v257_v8 = vrot.slane %v249_v62, %v5639_v33  ;;  %v975_v9 = vcombine.high %v1436_v47, %v1440_v49 }
  0xa4   : > { %v5607_v21 = vld [vmem:[#allocation2 + $0x50] sm:$0xff]  ;;  %v5621_v27 = vld [vmem:[#allocation2 + $0x48] sm:$0xff]  ;;  %v5651_v37 = vrot.slane %v1698_v35, %v5639_v33  ;;  %v325_v16 = vrot.slane %v317_v6, %v5639_v33  ;;  %v1043_v25 = vcombine.high %v5662_v40, %v5668_v41 }
  0xa5   : > { %480 = vrot.lane.b32.xlu0 %v5605_v20, %s5470_s4  ;;  %494 = vrot.lane.b32.xlu1 %v5607_v21, %s5470_s4  ;;  %v5636_v31 = vld [vmem:[#allocation2 + $0x4a] sm:$0xff]  ;;  %v5692_v48 = vld [vmem:[#allocation2 + $0x52] sm:$0xff]  ;;  %v265_v59 = vcombine.low %v5615_v23, %v5621_v27  ;;  %v982_v60 = vrot.slane %v974_v55, %v5639_v33  ;;  %v333_v1 = vcombine.low %v5591_v17, %v5607_v21 }
  0xa6   : > { %v1714_v36 = vcombine.low %v5641_v34, %v5636_v31  ;;  %8645 = vst [vmem:[#allocation9_spill] sm:$0xff] %v5651_v37  ;;  %v5678_v44 = vld [vmem:[#allocation2 + $0x51] sm:$0xff]  ;;  %v1442_v51 = vld [vmem:[#allocation2 + $0x49] sm:$0xff]  ;;  %v1050_v7 = vrot.slane %v1042_v61, %v5639_v33  ;;  %v5767_v26 = vrot.slane %v975_v9, %v5639_v33 }
  0xa7   : > { %v990_v54 = vcombine.low %v1438_v50, %v1442_v51  ;;  %v1058_v58 = vcombine.low %v5670_v42, %v5678_v44  ;;  %v273_v4 = vrot.slane %v265_v59, %v5639_v33  ;;  %v991_v5 = vcombine.high %v1438_v50, %v1442_v51 }
  0xa8   : > { %v5654_v38 = vrot.slane %v1714_v36, %v5639_v33  ;;  %v341_v10 = vrot.slane %v333_v1, %v5639_v33  ;;  %v1059_v11 = vcombine.high %v5670_v42, %v5678_v44 }
  0xa9   : > { %488 = vrot.lane.b32.xlu0 %v5613_v22, %s5470_s4  ;;  %484 = vrot.lane.b32.xlu1 %v5615_v23, %s5470_s4  ;;  %v998_v57 = vrot.slane %v990_v54, %v5639_v33  ;;  %v1066_v3 = vrot.slane %v1058_v58, %v5639_v33  ;;  %v282_v14 = vcombine.high %v257_v8, %v273_v4 }
  0xaa   : > { %8646 = vst [vmem:[#allocation10_spill] sm:$0xff] %v5654_v38  ;;  %v5758_v15 = vrot.slane %v991_v5, %v5639_v33  ;;  %v350_v28 = vcombine.high %v325_v16, %v341_v10  ;;  %v5770_v29 = vrot.slane %v1059_v11, %v5639_v33  ;;  %v281_v53 = vcombine.low %v257_v8, %v273_v4 }
  0xab   : > { %v1007_v2 = vcombine.high %v982_v60, %v998_v57  ;;  %v1075_v13 = vcombine.high %v1050_v7, %v1066_v3  ;;  %v1006_v36 = vcombine.low %v982_v60, %v998_v57  ;;  %v1074_v52 = vcombine.low %v1050_v7, %v1066_v3 }
  0xac   : > { %v1022_v35 = vcombine.low %v5767_v26, %v5758_v15  ;;  %v5817_v57 = vrot.slane %v281_v53, %v5739_v63  ;;  %v266_v3 = vcombine.high %v5615_v23, %v5621_v27  ;;  %v250_v4 = vcombine.high %v5605_v20, %v5613_v22 }
  0xad   : > { %736 = vrot.lane.b32.xlu0 %v5593_v18, %s5472_s5  ;;  %492 = vrot.lane.b32.xlu1 %v5621_v27, %s5470_s4  ;;  %v1021_v12 = vrot.slane %v1007_v2, %v5739_v63  ;;  %v5814_v56 = vrot.slane %v1074_v52, %v5739_v63 }
  0xae   : > { %8650 = vst [vmem:[#allocation14_spill] sm:$0xff] %v5817_v57  ;;  %v313_v60 = vcombine.high %v5817_v57, %v8577_v0  ;;  %v280_v9 = vrot.slane %v266_v3, %v5639_v33 }
  0xaf   : > { %v1106_v59 = vcombine.high %v5814_v56, %v8577_v0  ;;  %v1039_v2 = vcombine.high %v1021_v12, %v8577_v0 }
  0xb1   : > { %744 = vrot.lane.b32.xlu0 %v5601_v19, %s5472_s5  ;;  %740 = vrot.lane.b32.xlu1 %v5591_v17, %s5472_s5 }
  0xb5   : > { %734 = vrot.lane.b32.xlu0 %v5605_v20, %s5472_s5  ;;  %748 = vrot.lane.b32.xlu1 %v5607_v21, %s5472_s5 }
  0xb9   : > { %742 = vrot.lane.b32.xlu0 %v5613_v22, %s5472_s5  ;;  %738 = vrot.lane.b32.xlu1 %v5615_v23, %s5472_s5  ;;  %v264_v23 = vrot.slane %v250_v4, %v5639_v33 }
  0xbd   : > { %1454 = vrot.lane.b32.xlu0 %v5662_v40, %s5472_s5  ;;  %746 = vrot.lane.b32.xlu1 %v5621_v27, %s5472_s5 }
  0xc1   : > { %1462 = vrot.lane.b32.xlu0 %v5668_v41, %s5472_s5  ;;  %1458 = vrot.lane.b32.xlu1 %v5670_v42, %s5472_s5 }
  0xc5   : > { %1924 = vrot.lane.b32.xlu0 %v5676_v43, %s5470_s4  ;;  %1466 = vrot.lane.b32.xlu1 %v5678_v44, %s5472_s5 }
  0xc9   : > { %1932 = vrot.lane.b32.xlu0 %v5684_v45, %s5470_s4  ;;  %1928 = vrot.lane.b32.xlu1 %v5686_v46, %s5470_s4 }
  0xcd   : > { %1452 = vrot.lane.b32.xlu0 %v1436_v47, %s5472_s5  ;;  %1936 = vrot.lane.b32.xlu1 %v5692_v48, %s5470_s4 }
  0xd1   : > { %1460 = vrot.lane.b32.xlu0 %v1440_v49, %s5472_s5  ;;  %1456 = vrot.lane.b32.xlu1 %v1438_v50, %s5472_s5 }
  0xd5   : > { %1922 = vrot.lane.b32.xlu0 %v1906_v32, %s5470_s4  ;;  %1464 = vrot.lane.b32.xlu1 %v1442_v51, %s5472_s5 }
  0xd9   : > { %1930 = vrot.lane.b32.xlu0 %v5630_v30, %s5470_s4  ;;  %1926 = vrot.lane.b32.xlu1 %v5641_v34, %s5470_s4 }
  0xdd   : > { %1206 = vrot.lane.b32.xlu0 %v5662_v40, %s5470_s4  ;;  %1934 = vrot.lane.b32.xlu1 %v5636_v31, %s5470_s4  ;;  %v318_v40 = vcombine.high %v5593_v18, %v5601_v19 }
  0xdf   : > { %v5796_v18 = vrot.slane %v318_v40, %v5639_v33 }
  0xe1   : > { %1214 = vrot.lane.b32.xlu0 %v5668_v41, %s5470_s4  ;;  %1210 = vrot.lane.b32.xlu1 %v5670_v42, %s5470_s4  ;;  %v364_v41 = vrot.slane %v350_v28, %v5739_v63  ;;  %v1030_v42 = vrot.slane %v1022_v35, %v5739_v63 }
  0xe3   : > { %v382_v7 = vcombine.high %v364_v41, %v8577_v0  ;;  %v1040_v22 = vcombine.high %v1030_v42, %v8577_v0 }
  0xe5   : > { %1204 = vrot.lane.b32.xlu0 %v1436_v47, %s5470_s4  ;;  %1218 = vrot.lane.b32.xlu1 %v5678_v44, %s5470_s4  ;;  %v5793_v44 = vrot.slane %v1006_v36, %v5739_v63  ;;  %v349_v47 = vcombine.low %v325_v16, %v341_v10 }
  0xe9   : > { %1212 = vrot.lane.b32.xlu0 %v1440_v49, %s5470_s4  ;;  %1208 = vrot.lane.b32.xlu1 %v1438_v50, %s5470_s4  ;;  %v1038_v50 = vcombine.high %v5793_v44, %v8577_v0 }
  0xed   : > { %2178 = vrot.lane.b32.xlu0 %v5676_v43, %s5472_s5  ;;  %1216 = vrot.lane.b32.xlu1 %v1442_v51, %s5470_s4  ;;  %v5806_v51 = vrot.slane %v349_v47, %v5739_v63 }
  0xef   : > { %8649 = vst [vmem:[#allocation13_spill] sm:$0xff] %v5806_v51  ;;  %v381_v55 = vcombine.high %v5806_v51, %v8577_v0 }
  0xf1   : > { %2186 = vrot.lane.b32.xlu0 %v5684_v45, %s5472_s5  ;;  %2182 = vrot.lane.b32.xlu1 %v5686_v46, %s5472_s5 }
  0xf5   : > { %2176 = vrot.lane.b32.xlu0 %v1906_v32, %s5472_s5  ;;  %2190 = vrot.lane.b32.xlu1 %v5692_v48, %s5472_s5  ;;  %v1089_v32 = vrot.slane %v1075_v13, %v5739_v63  ;;  %v1782_v13 = vcombine.low %v5686_v46, %v5692_v48 }
  0xf7   : > { %v1107_v1 = vcombine.high %v1089_v32, %v8577_v0 }
  0xf9   : > { %2184 = vrot.lane.b32.xlu0 %v5630_v30, %s5472_s5  ;;  %2180 = vrot.lane.b32.xlu1 %v5641_v34, %s5472_s5  ;;  %v334_v30 = vcombine.high %v5591_v17, %v5607_v21  ;;  %v296_v34 = vrot.slane %v282_v14, %v5739_v63  ;;  %v1766_v14 = vcombine.low %v5676_v43, %v5684_v45 }
  0xfb   : > { %v5788_v21 = vrot.slane %v334_v30, %v5639_v33  ;;  %v314_v8 = vcombine.high %v296_v34, %v8577_v0  ;;  %v1023_v30 = vcombine.high %v5767_v26, %v5758_v15  ;;  %v1730_v15 = vcombine.low %v5651_v37, %v5654_v38 }
  0xfd   : > { %1115 = vrot.lane.b32.xlu0 %v1021_v12, %s5474_s6  ;;  %2188 = vrot.lane.b32.xlu1 %v5636_v31, %s5472_s5  ;;  %v5779_v31 = vrot.slane %v1043_v25, %v5639_v33  ;;  %v365_v49 = vcombine.low %v5796_v18, %v5788_v21  ;;  %v297_v12 = vcombine.low %v264_v23, %v280_v9 }
  0xfe   : > { %v1037_v40 = vrot.slane %v1023_v30, %v5739_v63  ;;  %v366_v53 = vcombine.high %v5796_v18, %v5788_v21 }
  0xff   : > { %v1090_v17 = vcombine.low %v5779_v31, %v5770_v29  ;;  %v373_v54 = vrot.slane %v365_v49, %v5739_v63  ;;  %v1091_v11 = vcombine.high %v5779_v31, %v5770_v29  ;;  %v305_v29 = vrot.slane %v297_v12, %v5739_v63 }
 0x101   : > { %1143 = vrot.lane.b32.xlu1 %v1089_v32, %s5474_s6  ;;  %390 = vrot.lane.b32.xlu0 %v296_v34, %s5474_s6  ;;  %v1098_v19 = vrot.slane %v1090_v17, %v5739_v63  ;;  %v1105_v28 = vrot.slane %v1091_v11, %v5739_v63  ;;  %v1790_v32 = vrot.slane %v1782_v13, %v5639_v33 }
 0x102   : > { %v1774_v34 = vrot.slane %v1766_v14, %v5639_v33  ;;  %v383_v31 = vcombine.high %v373_v54, %v8577_v0 }
 0x103   : > { %v1108_v27 = vcombine.high %v1098_v19, %v8577_v0  ;;  %v1109_v26 = vcombine.high %v1105_v28, %v8577_v0 }
 0x104   : > { %v1798_v17 = vcombine.low %v1774_v34, %v1790_v32  ;;  %v1799_v14 = vcombine.high %v1774_v34, %v1790_v32 }
 0x105   : > { %418 = vrot.lane.b32.xlu1 %v364_v41, %s5474_s6  ;;  %1123 = vrot.lane.b32.xlu0 %v1030_v42, %s5475_s7 }
 0x106   : > { %v5894_v49 = vrot.slane %v1798_v17, %v5739_v63  ;;  %v1041_v17 = vcombine.high %v1037_v40, %v8577_v0 }
 0x108   : > { %8651 = vst [vmem:[#allocation15_spill] sm:$0xff] %v5894_v49 }
 0x109   : > { %1151 = vrot.lane.b32.xlu1 %v1098_v19, %s5475_s7  ;;  %1111 = vrot.lane.b32.xlu0 %v1038_v50, %s5476_s8  ;;  %v315_v19 = vcombine.high %v305_v29, %v8577_v0  ;;  %v5897_v50 = vrot.slane %v1730_v15, %v5739_v63 }
 0x10b   : > { %8652 = vst [vmem:[#allocation16_spill] sm:$0xff] %v5897_v50 }
 0x10d   : > { %426 = vrot.lane.b32.xlu1 %v373_v54, %s5475_s7  ;;  %414 = vrot.lane.b32.xlu0 %v381_v55, %s5476_s8 }
 0x10f   : > { %v5821_v58 = vpop.permute.xlu0 %482  ;;  %v5829_v61 = vpop.permute.xlu1 %486 }
 0x111   : > { %1139 = vrot.lane.b32.xlu1 %v1106_v59, %s5476_s8  ;;  %386 = vrot.lane.b32.xlu0 %v313_v60, %s5476_s8  ;;  %v1830_v60 = vcombine.high %v5894_v49, %v8577_v0 }
 0x113   : > { %v5831_v62 = vpop.permute.xlu0 %490 }
 0x114   : > { %v572_v32 = vcombine.low %v5821_v58, %v5831_v62 }
 0x115   : > { %1147 = vrot.lane.b32.xlu1 %v1107_v1, %s5477_s9  ;;  %1119 = vrot.lane.b32.xlu0 %v1039_v2, %s5477_s9  ;;  %v1762_v1 = vcombine.high %v5897_v50, %v8577_v0  ;;  %v298_v2 = vcombine.high %v264_v23, %v280_v9 }
 0x117   : > { %v5841_v5 = vpop.permute.xlu1 %494  ;;  %v5843_v6 = vpop.permute.xlu0 %480 }
 0x119   : > { %422 = vrot.lane.b32.xlu1 %v382_v7, %s5477_s9  ;;  %394 = vrot.lane.b32.xlu0 %v314_v8, %s5477_s9  ;;  %v380_v8 = vrot.slane %v366_v53, %v5739_v63 }
 0x11b   : > { %v5852_v10 = vpop.permute.xlu1 %484  ;;  %v5854_v20 = vpop.permute.xlu0 %488 }
 0x11c   : > { %v505_v52 = vcombine.high %v5843_v6, %v5854_v20 }
 0x11d   : > { %1155 = vrot.lane.b32.xlu1 %v1108_v27, %s5478_s10  ;;  %1127 = vrot.lane.b32.xlu0 %v1040_v22, %s5478_s10  ;;  %v5917_v27 = vrot.slane %v298_v2, %v5739_v63  ;;  %v504_v2 = vcombine.low %v5843_v6, %v5854_v20 }
 0x11e   : > { %v519_v3 = vrot.slane %v505_v52, %v5639_v33 }
 0x11f   : > { %v5865_v16 = vpop.permute.xlu1 %492  ;;  %v5867_v25 = vpop.permute.xlu0 %736  ;;  %8653 = vst [vmem:[#allocation17_spill] sm:$0xff] %v5917_v27 }
 0x120   : > { %v521_v41 = vcombine.high %v5852_v10, %v5865_v16 }
 0x121   : > { %1159 = vrot.lane.b32.xlu1 %v1105_v28, %s5479_s11  ;;  %398 = vrot.lane.b32.xlu0 %v305_v29, %s5475_s7  ;;  %v588_v28 = vcombine.low %v5829_v61, %v5841_v5 }
 0x122   : > { %v535_v54 = vrot.slane %v521_v41, %v5639_v33  ;;  %v5956_v41 = vrot.slane %v1799_v14, %v5739_v63 }
 0x123   : > { %v5877_v35 = vpop.permute.xlu1 %740  ;;  %v5879_v36 = vpop.permute.xlu0 %744 }
 0x124   : > { %v552_v22 = vcombine.low %v519_v3, %v535_v54 }
 0x125   : > { %430 = vrot.lane.b32.xlu1 %v383_v31, %s5478_s10  ;;  %1131 = vrot.lane.b32.xlu0 %v1037_v40, %s5479_s11 }
 0x126   : > { %v5942_v15 = vrot.slane %v552_v22, %v5739_v63  ;;  %v6009_v22 = vrot.slane %v504_v2, %v5639_v33 }
 0x127   : > { %v5890_v42 = vpop.permute.xlu1 %748  ;;  %v735_v47 = vpop.permute.xlu0 %734 }
 0x128   : > { %v842_v14 = vcombine.low %v5877_v35, %v5890_v42 }
 0x129   : > { %1163 = vrot.lane.b32.xlu1 %v1109_v26, %s5480_s12  ;;  %402 = vrot.lane.b32.xlu0 %v315_v19, %s5478_s10  ;;  %v520_v19 = vcombine.low %v5852_v10, %v5865_v16  ;;  %v589_v10 = vcombine.high %v5829_v61, %v5841_v5 }
 0x12a   : > { %v6044_v2 = vrot.slane %v842_v14, %v5639_v33  ;;  %v843_v14 = vcombine.high %v5877_v35, %v5890_v42 }
 0x12b   : > { %v739_v55 = vpop.permute.xlu1 %738  ;;  %v743_v59 = vpop.permute.xlu0 %742 }
 0x12c   : > { %v759_v4 = vcombine.high %v735_v47, %v743_v59  ;;  %v758_v7 = vcombine.low %v735_v47, %v743_v59  ;;  %v5959_v47 = vrot.slane %v588_v28, %v5639_v33  ;;  %v553_v59 = vcombine.high %v519_v3, %v535_v54 }
 0x12d   : > { %1863 = vrot.lane.b32.xlu1 %v1830_v60, %s5476_s8  ;;  %1835 = vrot.lane.b32.xlu0 %v1762_v1, %s5476_s8  ;;  %v5973_v1 = vrot.slane %v572_v32, %v5639_v33  ;;  %v384_v3 = vcombine.high %v380_v8, %v8577_v0 }
 0x12e   : > { %v5923_v9 = vrot.slane %v759_v4, %v5639_v33  ;;  %v5934_v29 = vrot.slane %v758_v7, %v5639_v33  ;;  %v5991_v4 = vrot.slane %v520_v19, %v5639_v33  ;;  %v5998_v7 = vrot.slane %v553_v59, %v5739_v63 }
 0x12f   : > { %v747_v21 = vpop.permute.xlu1 %746  ;;  %v5913_v18 = vpop.permute.xlu0 %1454  ;;  %v605_v61 = vcombine.high %v5973_v1, %v5959_v47  ;;  %v826_v19 = vcombine.low %v5867_v25, %v5879_v36 }
 0x130   : > { %v774_v11 = vcombine.low %v739_v55, %v747_v21  ;;  %v775_v12 = vcombine.high %v739_v55, %v747_v21  ;;  %v537_v32 = vcombine.high %v6009_v22, %v5991_v4 }
 0x131   : > { %434 = vrot.lane.b32.xlu1 %v380_v8, %s5479_s11  ;;  %406 = vrot.lane.b32.xlu0 %v5917_v27, %s5479_s11  ;;  %v573_v8 = vcombine.high %v5821_v58, %v5831_v62  ;;  %v6022_v58 = vrot.slane %v605_v61, %v5739_v63 }
 0x132   : > { %v5926_v23 = vrot.slane %v774_v11, %v5639_v33  ;;  %v5929_v13 = vrot.slane %v775_v12, %v5639_v33  ;;  %v603_v11 = vrot.slane %v589_v10, %v5639_v33  ;;  %v6051_v61 = vrot.slane %v537_v32, %v5739_v63 }
 0x133   : > { %v5936_v30 = vpop.permute.xlu1 %1458  ;;  %v5938_v31 = vpop.permute.xlu0 %1462 }
 0x134   : > { %v791_v34 = vcombine.high %v5934_v29, %v5926_v23  ;;  %v1545_v40 = vcombine.high %v5913_v18, %v5938_v31  ;;  %v806_v5 = vcombine.low %v5923_v9, %v5929_v13 }
 0x135   : > { %1135 = vrot.lane.b32.xlu1 %v1041_v17, %s5480_s12  ;;  %653 = vrot.lane.b32.xlu0 %v5942_v15, %s5475_s7 }
 0x136   : > { %v5968_v55 = vrot.slane %v791_v34, %v5739_v63  ;;  %v5984_v16 = vrot.slane %v1545_v40, %v5639_v33  ;;  %v6025_v62 = vrot.slane %v806_v5, %v5739_v63  ;;  %v587_v40 = vrot.slane %v573_v8, %v5639_v33 }
 0x137   : > { %v5963_v52 = vpop.permute.xlu1 %1466  ;;  %v5965_v53 = vpop.permute.xlu0 %1924  ;;  %v857_v8 = vrot.slane %v843_v14, %v5639_v33 }
 0x138   : > { %v1561_v60 = vcombine.high %v5936_v30, %v5963_v52  ;;  %v620_v5 = vcombine.low %v587_v40, %v603_v11  ;;  %v1560_v35 = vcombine.low %v5936_v30, %v5963_v52  ;;  %v621_v26 = vcombine.high %v587_v40, %v603_v11 }
 0x139   : > { %1867 = vrot.lane.b32.xlu1 %v5956_v41, %s5474_s6  ;;  %899 = vrot.lane.b32.xlu0 %v5968_v55, %s5474_s6 }
 0x13a   : > { %v5987_v54 = vrot.slane %v1561_v60, %v5639_v33  ;;  %v6067_v32 = vrot.slane %v620_v5, %v5739_v63  ;;  %v6091_v14 = vrot.slane %v1560_v35, %v5639_v33  ;;  %v6101_v40 = vrot.slane %v621_v26, %v5739_v63 }
 0x13b   : > { %v5993_v6 = vpop.permute.xlu1 %1928  ;;  %v5995_v20 = vpop.permute.xlu0 %1932 }
 0x13c   : > { %v2015_v12 = vcombine.high %v5965_v53, %v5995_v20 }
 0x13d   : > { %438 = vrot.lane.b32.xlu1 %v384_v3, %s5480_s12  ;;  %661 = vrot.lane.b32.xlu0 %v5998_v7, %s5479_s11 }
 0x13e   : > { %v6038_v59 = vrot.slane %v2015_v12, %v5639_v33  ;;  %v6056_v12 = vrot.slane %v826_v19, %v5639_v33  ;;  %v827_v19 = vcombine.high %v5867_v25, %v5879_v36  ;;  %v1544_v25 = vcombine.low %v5913_v18, %v5938_v31 }
 0x13f   : > { %v1937_v28 = vpop.permute.xlu1 %1936  ;;  %v6019_v17 = vpop.permute.xlu0 %1452 }
 0x140   : > { %v2031_v34 = vcombine.high %v5993_v6, %v1937_v28  ;;  %v859_v21 = vcombine.high %v6056_v12, %v6044_v2  ;;  %v841_v0 = vrot.slane %v827_v19, %v5639_v33  ;;  %v2030_v30 = vcombine.low %v5993_v6, %v1937_v28 }
 0x141   : > { %673 = vrot.lane.b32.xlu1 %v6022_v58, %s5474_s6  ;;  %907 = vrot.lane.b32.xlu0 %v6025_v62, %s5475_s7  ;;  %v6106_v31 = vrot.slane %v1544_v25, %v5639_v33  ;;  %v2014_v19 = vcombine.low %v5965_v53, %v5995_v20 }
 0x142   : > { %v6041_v60 = vrot.slane %v2031_v34, %v5639_v33  ;;  %v6083_v5 = vrot.slane %v859_v21, %v5739_v63  ;;  %v874_v36 = vcombine.low %v841_v0, %v857_v8  ;;  %v6121_v35 = vrot.slane %v2030_v30, %v5639_v33 }
 0x143   : > { %v6046_v10 = vpop.permute.xlu1 %1456  ;;  %v6048_v3 = vpop.permute.xlu0 %1460  ;;  %v1577_v26 = vcombine.high %v6106_v31, %v6091_v14  ;;  %v875_v49 = vcombine.high %v841_v0, %v857_v8  ;;  %v536_v8 = vcombine.low %v6009_v22, %v5991_v4 }
 0x144   : > { %v6116_v28 = vrot.slane %v874_v36, %v5739_v63  ;;  %v1476_v36 = vcombine.low %v6019_v17, %v6048_v3 }
 0x145   : > { %645 = vrot.lane.b32.xlu1 %v6051_v61, %s5474_s6  ;;  %v6156_v51 = vrot.slane %v1577_v26, %v5739_v63  ;;  %v6184_v45 = vrot.slane %v875_v49, %v5739_v63  ;;  %v8660_v49 = vmov 0.0  }
 0x146   : > { %v6161_v0 = vrot.slane %v1476_v36, %v5639_v33 }
 0x147   : > { %v6062_v34 = vpop.permute.xlu1 %1464  ;;  %v6064_v24 = vpop.permute.xlu0 %1922 }
 0x148   : > { %8654 = vst [vmem:[#allocation18_spill] sm:$0xff] %v6064_v24  ;;  %v1492_v25 = vcombine.low %v6046_v10, %v6062_v34 }
 0x149   : > { %681 = vrot.lane.b32.xlu1 %v6067_v32, %s5475_s7 }
 0x14a   : > { %v6146_v27 = vrot.slane %v1492_v25, %v5639_v33 }
 0x14b   : > { %v6078_v42 = vpop.permute.xlu1 %1926  ;;  %v6080_v39 = vpop.permute.xlu0 %1930 }
 0x14c   : > { %8655 = vst [vmem:[#allocation19_spill] sm:$0xff] %v6078_v42  ;;  %8656 = vst [vmem:[#allocation20_spill] sm:$0xff] %v6080_v39  ;;  %v1946_v52 = vcombine.low %v6064_v24, %v6080_v39  ;;  %v1509_v25 = vcombine.high %v6161_v0, %v6146_v27 }
 0x14d   : > { %927 = vrot.lane.b32.xlu1 %v6083_v5, %s5474_s6 }
 0x14e   : > { %v6126_v53 = vrot.slane %v1946_v52, %v5639_v33  ;;  %v604_v52 = vcombine.low %v5973_v1, %v5959_v47  ;;  %v6205_v39 = vrot.slane %v1509_v25, %v5739_v63 }
 0x14f   : > { %v6096_v21 = vpop.permute.xlu1 %1934  ;;  %v6098_v11 = vpop.permute.xlu0 %1206 }
 0x150   : > { %8657 = vst [vmem:[#allocation21_spill] sm:$0xff] %v6096_v21  ;;  %v1962_v18 = vcombine.low %v6078_v42, %v6096_v21  ;;  %v6172_v26 = vrot.slane %v604_v52, %v5739_v63  ;;  %v1592_v42 = vcombine.low %v5984_v16, %v5987_v54 }
 0x151   : > { %689 = vrot.lane.b32.xlu1 %v6101_v40, %s5479_s11 }
 0x152   : > { %v6113_v6 = vrot.slane %v1962_v18, %v5639_v33  ;;  %v6133_v18 = vrot.slane %v2014_v19, %v5639_v33  ;;  %8658 = vst [vmem:[#allocation22_spill] sm:$0xff] %v6172_v26 }
 0x153   : > { %v6128_v20 = vpop.permute.xlu1 %1210  ;;  %v6130_v50 = vpop.permute.xlu0 %1214 }
 0x154   : > { %v1979_v30 = vcombine.high %v6126_v53, %v6113_v6  ;;  %v2047_v57 = vcombine.high %v6133_v18, %v6121_v35  ;;  %v1296_v1 = vcombine.low %v6098_v11, %v6130_v50 }
 0x155   : > { %935 = vrot.lane.b32.xlu1 %v6116_v28, %s5475_s7 }
 0x156   : > { %v6153_v37 = vrot.slane %v1979_v30, %v5739_v63  ;;  %v6187_v24 = vrot.slane %v2047_v57, %v5739_v63  ;;  %v6190_v4 = vrot.slane %v1296_v1, %v5639_v33  ;;  %v636_v57 = vcombine.high %v6172_v26, %v8660_v49 }
 0x157   : > { %v6148_v19 = vpop.permute.xlu1 %1218  ;;  %v6150_v38 = vpop.permute.xlu0 %1204  ;;  %v6208_v1 = vrot.slane %v536_v8, %v5739_v63  ;;  %v637_v8 = vcombine.high %v6022_v58, %v8660_v49  ;;  %v569_v58 = vcombine.high %v6051_v61, %v8660_v49 }
 0x158   : > { %v1312_v47 = vcombine.low %v6128_v20, %v6148_v19  ;;  %2087 = vrot.lane.b32.xlu0 %v6153_v37, %s5474_s6 }
 0x159   : > { %1645 = vrot.lane.b32.xlu1 %v6156_v51, %s5474_s6  ;;  %8661 = vst [vmem:[#allocation24_spill] sm:$0xff] %v6208_v1  ;;  %v568_v26 = vcombine.high %v6208_v1, %v8660_v49  ;;  %v2062_v1 = vcombine.low %v6038_v59, %v6041_v60 }
 0x15a   : > { %v6177_v36 = vrot.slane %v1312_v47, %v5639_v33 }
 0x15b   : > { %v6179_v30 = vpop.permute.xlu1 %1208  ;;  %v6181_v43 = vpop.permute.xlu0 %1212 }
 0x15c   : > { %943 = vrot.lane.b32.xlu0 %v6184_v45, %s5479_s11  ;;  %v1329_v22 = vcombine.high %v6190_v4, %v6177_v36 }
 0x15d   : > { %2115 = vrot.lane.b32.xlu1 %v6187_v24, %s5474_s6 }
 0x15e   : > { %v6222_v25 = vrot.slane %v1329_v22, %v5739_v63 }
 0x15f   : > { %v6198_v52 = vpop.permute.xlu1 %1216  ;;  %v6200_v47 = vpop.permute.xlu0 %2178 }
 0x160   : > { %8659 = vst [vmem:[#allocation23_spill] sm:$0xff] %v6200_v47  ;;  %669 = vrot.lane.b32.xlu0 %v636_v57, %s5476_s8  ;;  %v858_v57 = vcombine.low %v6056_v12, %v6044_v2  ;;  %v6254_v12 = vrot.slane %v2062_v1, %v5739_v63 }
 0x161   : > { %1617 = vrot.lane.b32.xlu1 %v6205_v39, %s5474_s6 }
 0x163   : > { %v6215_v21 = vpop.permute.xlu1 %2182  ;;  %v6217_v47 = vpop.permute.xlu0 %2186 }
 0x164   : > { %8662 = vst [vmem:[#allocation25_spill] sm:$0xff] %v6215_v21  ;;  %8663 = vst [vmem:[#allocation26_spill] sm:$0xff] %v6217_v47  ;;  %641 = vrot.lane.b32.xlu0 %v568_v26, %s5476_s8  ;;  %v790_v47 = vcombine.low %v5934_v29, %v5926_v23  ;;  %v6240_v26 = vrot.slane %v1592_v42, %v5739_v63  ;;  %v1576_v23 = vcombine.low %v6106_v31, %v6091_v14 }
 0x165   : > { %1397 = vrot.lane.b32.xlu1 %v6222_v25, %s5474_s6 }
 0x166   : > { %v6257_v42 = vrot.slane %v790_v47, %v5739_v63  ;;  %v6274_v47 = vrot.slane %v1576_v23, %v5739_v63  ;;  %v570_v23 = vcombine.high %v5942_v15, %v8660_v49  ;;  %v823_v15 = vcombine.high %v5968_v55, %v8660_v49 }
 0x167   : > { %v6235_v21 = vpop.permute.xlu1 %2190  ;;  %v6237_v22 = vpop.permute.xlu0 %2176  ;;  %v639_v55 = vcombine.high %v6101_v40, %v8660_v49  ;;  %v1244_v40 = vcombine.low %v6179_v30, %v6198_v52 }
 0x168   : > { %8664 = vst [vmem:[#allocation27_spill] sm:$0xff] %v6235_v21  ;;  %8665 = vst [vmem:[#allocation28_spill] sm:$0xff] %v6237_v22  ;;  %677 = vrot.lane.b32.xlu0 %v637_v8, %s5477_s9  ;;  %v6260_v8 = vrot.slane %v858_v57, %v5739_v63  ;;  %v822_v31 = vcombine.high %v6257_v42, %v8660_v49  ;;  %v2046_v57 = vcombine.low %v6133_v18, %v6121_v35 }
 0x169   : > { %1653 = vrot.lane.b32.xlu1 %v6240_v26, %s5475_s7  ;;  %8666 = vst [vmem:[#allocation29_spill] sm:$0xff] %v6257_v42  ;;  %v1608_v42 = vcombine.high %v6274_v47, %v8660_v49  ;;  %v1508_v35 = vcombine.low %v6161_v0, %v6146_v27  ;;  %v1978_v27 = vcombine.low %v6126_v53, %v6113_v6 }
 0x16a   : > { %v890_v1 = vcombine.high %v6260_v8, %v8660_v49  ;;  %v1328_v6 = vcombine.low %v6190_v4, %v6177_v36  ;;  %v892_v4 = vcombine.high %v6116_v28, %v8660_v49  ;;  %v2079_v28 = vcombine.high %v6187_v24, %v8660_v49 }
 0x16b   : > { %v6249_v29 = vpop.permute.xlu1 %2180  ;;  %v6251_v2 = vpop.permute.xlu0 %2184  ;;  %v1609_v24 = vcombine.high %v6156_v51, %v8660_v49 }
 0x16c   : > { %649 = vrot.lane.b32.xlu0 %v569_v58, %s5477_s9  ;;  %v638_v58 = vcombine.high %v6067_v32, %v8660_v49  ;;  %v891_v32 = vcombine.high %v6083_v5, %v8660_v49 }
 0x16d   : > { %2123 = vrot.lane.b32.xlu1 %v6254_v12, %s5475_s7 }
 0x16f   : > { %v6265_v61 = vpop.permute.xlu1 %2188  ;;  %v6267_v14 = vpop.permute.xlu0 %1115 }
 0x170   : > { %895 = vrot.lane.b32.xlu0 %v822_v31, %s5476_s8 }
 0x171   : > { %923 = vrot.lane.b32.xlu1 %v890_v1, %s5476_s8  ;;  %v6301_v1 = vrot.slane %v2046_v57, %v5739_v63  ;;  %v6316_v57 = vrot.slane %v1508_v35, %v5739_v63  ;;  %v6331_v35 = vrot.slane %v1978_v27, %v5739_v63  ;;  %v1228_v27 = vcombine.low %v6150_v38, %v6181_v43 }
 0x173   : > { %v6282_v21 = vpop.permute.xlu1 %1143  ;;  %v6284_v22 = vpop.permute.xlu0 %390  ;;  %8667 = vst [vmem:[#allocation30_spill] sm:$0xff] %v6301_v1  ;;  %8668 = vst [vmem:[#allocation31_spill] sm:$0xff] %v6316_v57  ;;  %v2010_v36 = vcombine.high %v6331_v35, %v8660_v49 }
 0x174   : > { %1641 = vrot.lane.b32.xlu0 %v1608_v42, %s5476_s8  ;;  %v2078_v42 = vcombine.high %v6301_v1, %v8660_v49  ;;  %8669 = vst [vmem:[#allocation32_spill] sm:$0xff] %v6331_v35 }
 0x175   : > { %685 = vrot.lane.b32.xlu1 %v638_v58, %s5478_s10 }
 0x177   : > { %v6296_v18 = vpop.permute.xlu1 %418  ;;  %v6298_v31 = vpop.permute.xlu0 %1123 }
 0x178   : > { %657 = vrot.lane.b32.xlu0 %v570_v23, %s5478_s10  ;;  %v1540_v23 = vcombine.high %v6316_v57, %v8660_v49 }
 0x179   : > { %931 = vrot.lane.b32.xlu1 %v891_v32, %s5477_s9 }
 0x17b   : > { %v6309_v0 = vpop.permute.xlu1 %1151  ;;  %v6311_v5 = vpop.permute.xlu0 %1111 }
 0x17c   : > { %903 = vrot.lane.b32.xlu0 %v823_v15, %s5477_s9 }
 0x17d   : > { %2111 = vrot.lane.b32.xlu1 %v2078_v42, %s5476_s8  ;;  %v6344_v42 = vrot.slane %v1328_v6, %v5739_v63  ;;  %v6360_v6 = vrot.slane %v1228_v27, %v5639_v33 }
 0x17f   : > { %v6324_v53 = vpop.permute.xlu1 %426  ;;  %v6326_v58 = vpop.permute.xlu0 %414  ;;  %8670 = vst [vmem:[#allocation33_spill] sm:$0xff] %v6344_v42  ;;  %v1360_v35 = vcombine.high %v6344_v42, %v8660_v49 }
 0x180   : > { %1613 = vrot.lane.b32.xlu0 %v1540_v23, %s5476_s8 }
 0x181   : > { %693 = vrot.lane.b32.xlu1 %v639_v55, %s5480_s12  ;;  %v6351_v55 = vrot.slane %v1244_v40, %v5639_v33  ;;  %v824_v40 = vcombine.high %v6025_v62, %v8660_v49  ;;  %v893_v62 = vcombine.high %v6184_v45, %v8660_v49  ;;  %v1361_v45 = vcombine.high %v6222_v25, %v8660_v49 }
 0x182   : > { %v1610_v25 = vcombine.high %v6240_v26, %v8660_v49  ;;  %v1313_v26 = vcombine.high %v6128_v20, %v6148_v19 }
 0x183   : > { %v1140_v32 = vpop.permute.xlu1 %1139  ;;  %v6337_v15 = vpop.permute.xlu0 %386 }
 0x184   : > { %2083 = vrot.lane.b32.xlu0 %v2010_v36, %s5476_s8  ;;  %v1260_v36 = vcombine.low %v6360_v6, %v6351_v55  ;;  %v1173_v51 = vsel %vm441_vm3, %v5814_v56, %v1140_v32 }
 0x185   : > { %939 = vrot.lane.b32.xlu1 %v892_v4, %s5478_s10 }
 0x187   : > { %v1148_v23 = vpop.permute.xlu1 %1147  ;;  %v6353_v57 = vpop.permute.xlu0 %1119 }
 0x188   : > { %1393 = vrot.lane.b32.xlu0 %v1360_v35, %s5476_s8  ;;  %v571_v35 = vcombine.high %v5998_v7, %v8660_v49 }
 0x189   : > { %2119 = vrot.lane.b32.xlu1 %v2079_v28, %s5477_s9  ;;  %v6381_v28 = vrot.slane %v1260_v36, %v5739_v63  ;;  %v1174_v36 = vsel %vm443_vm5, %v1173_v51, %v6282_v21  ;;  %v2011_v51 = vcombine.high %v6153_v37, %v8660_v49  ;;  %v1166_v37 = vsel %vm441_vm3, %v5793_v44, %v6311_v5 }
 0x18a   : > { %v2080_v44 = vcombine.high %v6254_v12, %v8660_v49  ;;  %v1783_v12 = vcombine.high %v5686_v46, %v5692_v48  ;;  %v8676_v48 = vld [vmem:[#allocation12_spill] sm:$0xff] }
 0x18b   : > { %v6368_v4 = vpop.permute.xlu1 %422  ;;  %v6370_v1 = vpop.permute.xlu0 %394  ;;  %v1292_v7 = vcombine.high %v6381_v28, %v8660_v49 }
 0x18c   : > { %1649 = vrot.lane.b32.xlu0 %v1609_v24, %s5477_s9  ;;  %v1175_v24 = vsel %vm445_vm4, %v1174_v36, %v1148_v23  ;;  %v1831_v23 = vcombine.high %v5956_v41, %v8660_v49  ;;  %v1477_v36 = vcombine.high %v6019_v17, %v6048_v3  ;;  %v1297_v41 = vcombine.high %v6098_v11, %v6130_v50 }
 0x18d   : > { %911 = vrot.lane.b32.xlu1 %v824_v40, %s5478_s10  ;;  %v1176_v21 = vsel %vm447_vm6, %v1175_v24, %v6309_v0  ;;  %v6438_v50 = vrot.slane %v1313_v26, %v5639_v33  ;;  %v1261_v3 = vcombine.high %v6360_v6, %v6351_v55  ;;  %v8672_v6 = vld [vmem:[#allocation21_spill] sm:$0xff]  ;;  %v8677_v26 = vld [vmem:[#allocation11_spill] sm:$0xff] }
 0x18e   : > { %v6447_v20 = vrot.slane %v1477_v36, %v5639_v33  ;;  %v6484_v36 = vrot.slane %v1783_v12, %v5639_v33  ;;  %v8680_v12 = vld [vmem:[#allocation10_spill] sm:$0xff] }
 0x18f   : > { %v1156_v27 = vpop.permute.xlu1 %1155  ;;  %v6383_v42 = vpop.permute.xlu0 %1127 }
 0x190   : > { %665 = vrot.lane.b32.xlu0 %v571_v35, %s5480_s12  ;;  %v1541_v35 = vcombine.high %v6205_v39, %v8660_v49  ;;  %v1493_v39 = vcombine.high %v6046_v10, %v6062_v34  ;;  %v8671_v10 = vcombine.high %v5923_v9, %v5929_v13  ;;  %v6450_v9 = vrot.slane %v1297_v41, %v5639_v33 }
 0x191   : > { %947 = vrot.lane.b32.xlu1 %v893_v62, %s5480_s12  ;;  %v1177_v62 = vsel %vm449_vm7, %v1176_v21, %v1156_v27  ;;  %v1167_v13 = vsel %vm443_vm5, %v1166_v37, %v6267_v14 }
 0x192   : > { %v821_v34 = vrot.slane %v8671_v10, %v5739_v63  ;;  %v6435_v17 = vrot.slane %v1493_v39, %v5639_v33  ;;  %v1168_v19 = vsel %vm445_vm4, %v1167_v13, %v6353_v57  ;;  %v1344_v14 = vcombine.low %v6450_v9, %v6438_v50  ;;  %v8674_v57 = vld [vmem:[#allocation20_spill] sm:$0xff] }
 0x193   : > { %v1160_v40 = vpop.permute.xlu1 %1159  ;;  %v6398_v56 = vpop.permute.xlu0 %398  ;;  %v1169_v46 = vsel %vm447_vm6, %v1168_v19, %v6298_v31 }
 0x194   : > { %1365 = vrot.lane.b32.xlu0 %v1292_v7, %s5476_s8  ;;  %v1178_v0 = vsel %vm451_vm8, %v1177_v62, %v1160_v40  ;;  %v825_v5 = vcombine.high %v821_v34, %v8660_v49  ;;  %v1524_v55 = vcombine.low %v6447_v20, %v6435_v17  ;;  %v8673_v40 = vld [vmem:[#allocation19_spill] sm:$0xff]  ;;  %v8675_v62 = vld [vmem:[#allocation18_spill] sm:$0xff]  ;;  %v1352_v10 = vrot.slane %v1344_v14, %v5739_v63 }
 0x195   : > { %1401 = vrot.lane.b32.xlu1 %v1361_v45, %s5477_s9  ;;  %v1947_v39 = vcombine.high %v8675_v62, %v8674_v57 }
 0x196   : > { %v1532_v37 = vrot.slane %v1524_v55, %v5739_v63 }
 0x197   : > { %v6400_v32 = vpop.permute.xlu1 %430  ;;  %v1132_v27 = vpop.permute.xlu0 %1131 }
 0x198   : > { %1621 = vrot.lane.b32.xlu0 %v1541_v35, %s5477_s9  ;;  %v1963_v35 = vcombine.high %v8673_v40, %v8672_v6  ;;  %v8682_v40 = vcombine.high %v5984_v16, %v5987_v54 }
 0x199   : > { %1657 = vrot.lane.b32.xlu1 %v1610_v25, %s5478_s10 }
 0x19a   : > { %v6487_v41 = vrot.slane %v1963_v35, %v5639_v33  ;;  %v1607_v35 = vrot.slane %v8682_v40, %v5739_v63 }
 0x19b   : > { %v1164_v7 = vpop.permute.xlu1 %1163  ;;  %v6467_v25 = vpop.permute.xlu0 %402 }
 0x19c   : > { %v1179_v45 = vsel %vm453_vm9, %v1178_v0, %v1164_v7  ;;  %2091 = vrot.lane.b32.xlu0 %v2011_v51, %s5477_s9  ;;  %v1767_v51 = vcombine.high %v8677_v26, %v8676_v48  ;;  %v8678_v0 = vld [vmem:[#allocation13_spill] sm:$0xff] }
 0x19d   : > { %v1183_v24 = vrot.slane %v1179_v45, 4  ;;  %1871 = vrot.lane.b32.xlu1 %v1831_v23, %s5477_s9  ;;  %v1275_v23 = vrot.slane %v1261_v3, %v5739_v63  ;;  %v455_v7 = vsel %vm441_vm3, %v8678_v0, %v6326_v58  ;;  %v1170_v45 = vsel %vm449_vm7, %v1169_v46, %v6383_v42 }
 0x19e   : > { %v1171_v31 = vsel %vm451_vm8, %v1170_v45, %v1132_v27  ;;  %v6494_v58 = vrot.slane %v1947_v39, %v5639_v33  ;;  %v456_v42 = vsel %vm443_vm5, %v455_v7, %v6296_v18  ;;  %v6503_v27 = vrot.slane %v1767_v51, %v5639_v33  ;;  %v8679_v18 = vld [vmem:[#allocation9_spill] sm:$0xff] }
 0x19f   : > { %1187 = vst [vmem:[#allocation3 + $0x18] sm:$0xf0] %v1183_v24  ;;  %v6442_v11 = vpop.permute.xlu1 %1863  ;;  %v6498_v3 = vpop.permute.xlu0 %1835  ;;  %v457_v13 = vsel %vm445_vm4, %v456_v42, %v6368_v4  ;;  %v8681_v55 = vcombine.high %v8679_v18, %v8680_v12  ;;  %v1293_v45 = vcombine.high %v1275_v23, %v8660_v49  ;;  %v1229_v12 = vcombine.high %v6150_v38, %v6181_v43 }
 0x1a0   : > { %915 = vrot.lane.b32.xlu0 %v821_v34, %s5479_s11  ;;  %v1994_v19 = vcombine.low %v6494_v58, %v6487_v41  ;;  %v1814_v14 = vcombine.low %v6503_v27, %v6484_v36  ;;  %v458_v4 = vsel %vm447_vm6, %v457_v13, %v6324_v53  ;;  %v8683_v53 = vld [vmem:[#allocation17_spill] sm:$0xff]  ;;  %v1542_v13 = vcombine.high %v1532_v37, %v8660_v49 }
 0x1a1   : > { %2127 = vrot.lane.b32.xlu1 %v2080_v44, %s5478_s10  ;;  %v1745_v6 = vrot.slane %v8681_v55, %v5739_v63  ;;  %v459_v57 = vsel %vm449_vm7, %v458_v4, %v6400_v32  ;;  %v316_v26 = vcombine.high %v8683_v53, %v8660_v49  ;;  %v1243_v38 = vrot.slane %v1229_v12, %v5639_v33 }
 0x1a2   : > { %v2002_v16 = vrot.slane %v1994_v19, %v5739_v63  ;;  %v1822_v54 = vrot.slane %v1814_v14, %v5739_v63  ;;  %v5402_v19 = vld [vmem:[#allocation2 + $0x32] sm:$0xff]  ;;  %v1345_v4 = vcombine.high %v6450_v9, %v6438_v50  ;;  %v1995_v53 = vcombine.high %v6494_v58, %v6487_v41 }
 0x1a3   : > { %v435_v21 = vpop.permute.xlu1 %434  ;;  %v6528_v39 = vpop.permute.xlu0 %406  ;;  %v2216_v58 = vcombine.low %v6249_v29, %v6265_v61 }
 0x1a4   : > { %1369 = vrot.lane.b32.xlu0 %v1275_v23, %s5474_s6  ;;  %v460_v62 = vsel %vm451_vm8, %v459_v57, %v435_v21  ;;  %v8684_v21 = vcombine.high %v6038_v59, %v6041_v60  ;;  %v1245_v60 = vcombine.high %v6179_v30, %v6198_v52  ;;  %v1611_v23 = vcombine.high %v1607_v35, %v8660_v49 }
 0x1a5   : > { %919 = vrot.lane.b32.xlu1 %v825_v5, %s5480_s12  ;;  %v1832_v40 = vcombine.high %v1822_v54, %v8660_v49  ;;  %v2009_v41 = vrot.slane %v1995_v53, %v5739_v63 }
 0x1a6   : > { %v2077_v51 = vrot.slane %v8684_v21, %v5739_v63  ;;  %v1259_v52 = vrot.slane %v1245_v60, %v5639_v33 }
 0x1a7   : > { %v1136_v24 = vpop.permute.xlu1 %1135  ;;  %v6543_v0 = vpop.permute.xlu0 %653 }
 0x1a8   : > { %v1172_v34 = vsel %vm453_vm9, %v1171_v31, %v1136_v24  ;;  %1625 = vrot.lane.b32.xlu0 %v1532_v37, %s5475_s7  ;;  %v1362_v31 = vcombine.high %v1352_v10, %v8660_v49  ;;  %v5400_v24 = vld [vmem:[#allocation2 + $0x4a] sm:$0xff]  ;;  %v1763_v37 = vcombine.high %v1745_v6, %v8660_v49 }
 0x1a9   : > { %v1182_v44 = vrot.slane %v1172_v34, 4  ;;  %1405 = vrot.lane.b32.xlu1 %v1352_v10, %s5475_s7  ;;  %v5401_v34 = vld [vmem:[#allocation2 + $0x1a] sm:$0xff]  ;;  %v5403_v10 = vld [vmem:[#allocation2 + $0x2] sm:$0xff] }
 0x1aa   : > { %v1715_v59 = vcombine.high %v5401_v34, %v5400_v24  ;;  %v1699_v18 = vcombine.high %v5403_v10, %v5402_v19  ;;  %v2013_v24 = vcombine.high %v2009_v41, %v8660_v49  ;;  %v1815_v34 = vcombine.high %v6503_v27, %v6484_v36 }
 0x1ab   : > { %1186 = vst [vmem:[#allocation3 + $0x10] sm:$0xf0] %v1182_v44  ;;  %v6509_v5 = vpop.permute.xlu1 %1867  ;;  %v6555_v42 = vpop.permute.xlu0 %899 }
 0x1ac   : > { %1839 = vrot.lane.b32.xlu0 %v1745_v6, %s5474_s6  ;;  %v6566_v30 = vrot.slane %v1715_v59, %v5639_v33  ;;  %v1276_v6 = vcombine.low %v1243_v38, %v1259_v52  ;;  %v8685_v59 = vld [vmem:[#allocation28_spill] sm:$0xff]  ;;  %v1829_v12 = vrot.slane %v1815_v34, %v5739_v63 }
 0x1ad   : > { %1661 = vrot.lane.b32.xlu1 %v1607_v35, %s5479_s11  ;;  %v6574_v35 = vrot.slane %v1699_v18, %v5639_v33  ;;  %v2200_v60 = vcombine.low %v8685_v59, %v6251_v2 }
 0x1af   : > { %v439_v46 = vpop.permute.xlu1 %438  ;;  %v6577_v43 = vpop.permute.xlu0 %661  ;;  %v1746_v14 = vcombine.low %v6574_v35, %v6566_v30 }
 0x1b0   : > { %v461_v48 = vsel %vm453_vm9, %v460_v62, %v439_v46  ;;  %2095 = vrot.lane.b32.xlu0 %v2002_v16, %s5475_s7  ;;  %v2012_v62 = vcombine.high %v2002_v16, %v8660_v49  ;;  %v2081_v46 = vcombine.high %v2077_v51, %v8660_v49  ;;  %v1284_v16 = vrot.slane %v1276_v6, %v5739_v63  ;;  %v8687_v6 = vld [vmem:[#allocation25_spill] sm:$0xff] }
 0x1b1   : > { %463 = vst [vmem:[#allocation3 + $0x8] sm:$0xf] %v461_v48  ;;  %1875 = vrot.lane.b32.xlu1 %v1822_v54, %s5475_s7  ;;  %v1754_v54 = vrot.slane %v1746_v14, %v5739_v63  ;;  %v1525_v48 = vcombine.high %v6447_v20, %v6435_v17 }
 0x1b3   : > { %v6537_v32 = vpop.permute.xlu1 %673  ;;  %v6596_v50 = vpop.permute.xlu0 %907  ;;  %v1539_v17 = vrot.slane %v1525_v48, %v5739_v63  ;;  %v1764_v20 = vcombine.high %v1754_v54, %v8660_v49 }
 0x1b4   : > { %410 = vrot.lane.b32.xlu0 %v316_v26, %s5480_s12  ;;  %v1359_v26 = vrot.slane %v1345_v4, %v5739_v63  ;;  %v8686_v4 = vld [vmem:[#allocation27_spill] sm:$0xff] }
 0x1b5   : > { %2131 = vrot.lane.b32.xlu1 %v2077_v51, %s5479_s11  ;;  %v1543_v48 = vcombine.high %v1539_v17, %v8660_v49 }
 0x1b6   : > { %v1363_v18 = vcombine.high %v1359_v26, %v8660_v49 }
 0x1b7   : > { %v6547_v7 = vpop.permute.xlu1 %645 }
 0x1b8   : > { %1373 = vrot.lane.b32.xlu0 %v1293_v45, %s5477_s9 }
 0x1b9   : > { %1409 = vrot.lane.b32.xlu1 %v1362_v31, %s5478_s10 }
 0x1bb   : > { %v6557_v44 = vpop.permute.xlu1 %681 }
 0x1bc   : > { %1629 = vrot.lane.b32.xlu0 %v1542_v13, %s5478_s10  ;;  %v1277_v13 = vcombine.high %v1243_v38, %v1259_v52  ;;  %v1294_v52 = vcombine.high %v1284_v16, %v8660_v49  ;;  %v1833_v38 = vcombine.high %v1829_v12, %v8660_v49 }
 0x1bd   : > { %1665 = vrot.lane.b32.xlu1 %v1611_v23, %s5480_s12  ;;  %v2224_v23 = vrot.slane %v2216_v58, %v5639_v33 }
 0x1be   : > { %v1291_v14 = vrot.slane %v1277_v13, %v5739_v63 }
 0x1bf   : > { %v6569_v55 = vpop.permute.xlu1 %927 }
 0x1c0   : > { %1843 = vrot.lane.b32.xlu0 %v1763_v37, %s5477_s9  ;;  %v2208_v37 = vrot.slane %v2200_v60, %v5639_v33  ;;  %v1295_v53 = vcombine.high %v1291_v14, %v8660_v49 }
 0x1c1   : > { %1879 = vrot.lane.b32.xlu1 %v1832_v40, %s5478_s10 }
 0x1c2   : > { %v2232_v36 = vcombine.low %v2208_v37, %v2224_v23  ;;  %v2233_v34 = vcombine.high %v2208_v37, %v2224_v23 }
 0x1c3   : > { %v6585_v57 = vpop.permute.xlu1 %689 }
 0x1c4   : > { %2099 = vrot.lane.b32.xlu0 %v2012_v62, %s5478_s10  ;;  %v2284_v62 = vcombine.low %v8687_v6, %v8686_v4  ;;  %v2247_v37 = vrot.slane %v2233_v34, %v5739_v63 }
 0x1c5   : > { %2135 = vrot.lane.b32.xlu1 %v2081_v46, %s5480_s12 }
 0x1c6   : > { %v2292_v58 = vrot.slane %v2284_v62, %v5639_v33 }
 0x1c7   : > { %v6598_v9 = vpop.permute.xlu1 %935 }
 0x1c8   : > { %1377 = vrot.lane.b32.xlu0 %v1284_v16, %s5475_s7  ;;  %v6650_v16 = vrot.slane %v2232_v36, %v5739_v63  ;;  %v2201_v36 = vcombine.high %v8685_v59, %v6251_v2 }
 0x1c9   : > { %1413 = vrot.lane.b32.xlu1 %v1359_v26, %s5479_s11  ;;  %v8688_v26 = vld [vmem:[#allocation26_spill] sm:$0xff] }
 0x1ca   : > { %v6604_v21 = vpop.permute.xlu0 %2087  ;;  %v2264_v13 = vcombine.high %v6650_v16, %v8660_v49  ;;  %v2215_v62 = vrot.slane %v2201_v36, %v5639_v33 }
 0x1cb   : > { %v6606_v51 = vpop.permute.xlu1 %1645 }
 0x1cc   : > { %1633 = vrot.lane.b32.xlu0 %v1539_v17, %s5479_s11 }
 0x1cd   : > { %1851 = vrot.lane.b32.xlu1 %v1764_v20, %s5478_s10  ;;  %v8689_v20 = vld [vmem:[#allocation23_spill] sm:$0xff] }
 0x1ce   : > { %v6615_v45 = vpop.permute.xlu0 %943 }
 0x1cf   : > { %v6617_v31 = vpop.permute.xlu1 %2115 }
 0x1d0   : > { %1847 = vrot.lane.b32.xlu0 %v1754_v54, %s5475_s7 }
 0x1d1   : > { %2107 = vrot.lane.b32.xlu1 %v2013_v24, %s5480_s12  ;;  %v2217_v24 = vcombine.high %v6249_v29, %v6265_v61 }
 0x1d2   : > { %v670_v19 = vpop.permute.xlu0 %669 }
 0x1d3   : > { %v6627_v10 = vpop.permute.xlu1 %1617  ;;  %v2231_v29 = vrot.slane %v2217_v24, %v5639_v33  ;;  %v8690_v24 = vld [vmem:[#allocation22_spill] sm:$0xff] }
 0x1d4   : > { %2103 = vrot.lane.b32.xlu0 %v2009_v41, %s5479_s11  ;;  %v2268_v41 = vcombine.low %v8689_v20, %v8688_v26 }
 0x1d5   : > { %1417 = vrot.lane.b32.xlu1 %v1363_v18, %s5480_s12  ;;  %v2248_v2 = vcombine.low %v2215_v62, %v2231_v29 }
 0x1d6   : > { %v6634_v27 = vpop.permute.xlu0 %641  ;;  %v2276_v18 = vrot.slane %v2268_v41, %v5639_v33 }
 0x1d7   : > { %v6636_v40 = vpop.permute.xlu1 %1397  ;;  %v2256_v36 = vrot.slane %v2248_v2, %v5739_v63 }
 0x1d8   : > { %1381 = vrot.lane.b32.xlu0 %v1294_v52, %s5478_s10  ;;  %v2300_v52 = vcombine.low %v2276_v18, %v2292_v58 }
 0x1d9   : > { %1887 = vrot.lane.b32.xlu1 %v1833_v38, %s5480_s12  ;;  %v1747_v38 = vcombine.high %v6574_v35, %v6566_v30  ;;  %v703_v30 = vsel %vm441_vm3, %v8690_v24, %v670_v19  ;;  %v2285_v19 = vcombine.high %v8687_v6, %v8686_v4 }
 0x1da   : > { %v678_v46 = vpop.permute.xlu0 %677  ;;  %v6684_v41 = vrot.slane %v2300_v52, %v5739_v63  ;;  %v704_v35 = vsel %vm443_vm5, %v703_v30, %v6537_v32  ;;  %v2249_v32 = vcombine.high %v2215_v62, %v2231_v29 }
 0x1db   : > { %v6645_v54 = vpop.permute.xlu1 %1653  ;;  %v705_v52 = vsel %vm445_vm4, %v704_v35, %v678_v46  ;;  %v2266_v46 = vcombine.high %v2256_v36, %v8660_v49  ;;  %v2269_v35 = vcombine.high %v8689_v20, %v8688_v26  ;;  %v2299_v4 = vrot.slane %v2285_v19, %v5639_v33 }
 0x1dc   : > { %1637 = vrot.lane.b32.xlu0 %v1543_v48, %s5480_s12  ;;  %v1761_v48 = vrot.slane %v1747_v38, %v5739_v63  ;;  %v2301_v38 = vcombine.high %v2276_v18, %v2292_v58  ;;  %v2263_v29 = vrot.slane %v2249_v32, %v5739_v63 }
 0x1dd   : > { %1389 = vrot.lane.b32.xlu1 %v1295_v53, %s5480_s12  ;;  %v2265_v53 = vcombine.high %v2247_v37, %v8660_v49  ;;  %v2283_v26 = vrot.slane %v2269_v35, %v5639_v33  ;;  %v5481_v35 = vmov 1.0  }
 0x1de   : > { %v6659_v60 = vpop.permute.xlu0 %649  ;;  %v2315_v18 = vrot.slane %v2301_v38, %v5739_v63 }
 0x1df   : > { %v6661_v17 = vpop.permute.xlu1 %2123 }
 0x1e0   : > { %1883 = vrot.lane.b32.xlu0 %v1829_v12, %s5479_s11 }
 0x1e1   : > { %2337 = vrot.lane.b32.xlu1 %v2264_v13, %s5476_s8  ;;  %v2332_v13 = vcombine.high %v6684_v41, %v8660_v49 }
 0x1e2   : > { %v6671_v61 = vpop.permute.xlu0 %895 }
 0x1e3   : > { %v924_v23 = vpop.permute.xlu1 %923 }
 0x1e4   : > { %1385 = vrot.lane.b32.xlu0 %v1291_v14, %s5479_s11 }
 0x1e5   : > { %2341 = vrot.lane.b32.xlu1 %v2247_v37, %s5474_s6  ;;  %v1765_v37 = vcombine.high %v1761_v48, %v8660_v49 }
 0x1e6   : > { %v6679_v59 = vpop.permute.xlu0 %1641 }
 0x1e7   : > { %v686_v12 = vpop.permute.xlu1 %685 }
 0x1e8   : > { %1855 = vrot.lane.b32.xlu0 %v1761_v48, %s5479_s11 }
 0x1e9   : > { %2345 = vrot.lane.b32.xlu1 %v2265_v53, %s5477_s9  ;;  %v706_v53 = vsel %vm447_vm6, %v705_v52, %v6557_v44  ;;  %v8691_v52 = vld [vmem:[#allocation24_spill] sm:$0xff] }
 0x1ea   : > { %v658_v14 = vpop.permute.xlu0 %657  ;;  %v707_v2 = vsel %vm449_vm7, %v706_v53, %v686_v12  ;;  %v2316_v12 = vcombine.low %v2283_v26, %v2299_v4  ;;  %v696_v19 = vsel %vm441_vm3, %v8691_v52, %v6634_v27 }
 0x1eb   : > { %v932_v34 = vpop.permute.xlu1 %931  ;;  %v708_v58 = vsel %vm451_vm8, %v707_v2, %v6585_v57  ;;  %v2333_v57 = vcombine.high %v2315_v18, %v8660_v49  ;;  %v697_v38 = vsel %vm443_vm5, %v696_v19, %v6547_v7  ;;  %v2317_v7 = vcombine.high %v2283_v26, %v2299_v4 }
 0x1ec   : > { %2365 = vrot.lane.b32.xlu0 %v2332_v13, %s5476_s8  ;;  %v2324_v2 = vrot.slane %v2316_v12, %v5739_v63  ;;  %v698_v27 = vsel %vm445_vm4, %v697_v38, %v6659_v60  ;;  %v8693_v38 = vld [vmem:[#allocation29_spill] sm:$0xff] }
 0x1ed   : > { %2349 = vrot.lane.b32.xlu1 %v2256_v36, %s5475_s7  ;;  %v2267_v36 = vcombine.high %v2263_v29, %v8660_v49 }
 0x1ee   : > { %v6703_v24 = vpop.permute.xlu0 %903 }
 0x1ef   : > { %v6705_v30 = vpop.permute.xlu1 %2111 }
 0x1f0   : > { %1859 = vrot.lane.b32.xlu0 %v1765_v37, %s5480_s12  ;;  %v957_v37 = vsel %vm441_vm3, %v6260_v8, %v924_v23  ;;  %v8692_v23 = vlaneseq }
 0x1f1   : > { %2353 = vrot.lane.b32.xlu1 %v2266_v46, %s5478_s10  ;;  %v958_v32 = vsel %vm443_vm5, %v957_v37, %v6569_v55  ;;  %v699_v55 = vsel %vm447_vm6, %v698_v27, %v6543_v0 }
 0x1f2   : > { %v6714_v6 = vpop.permute.xlu0 %1613  ;;  %v959_v8 = vsel %vm445_vm4, %v958_v32, %v932_v34  ;;  %vm236_vm10 = vcmp.lt.s32.totalorder %v8692_v23, 256  ;;  %v700_v60 = vsel %vm449_vm7, %v699_v55, %v658_v14  ;;  %v950_v32 = vsel %vm441_vm3, %v8693_v38, %v6671_v61 }
 0x1f3   : > { %v694_v44 = vpop.permute.xlu1 %693  ;;  %239 = vst.msk [vmem:[#allocation3 + $0x44] ss:$8 sm:$0x3] %vm236_vm10, %v5481_v35 }
 0x1f4   : > { %v709_v62 = vsel %vm453_vm9, %v708_v58, %v694_v44  ;;  %2369 = vrot.lane.b32.xlu0 %v2315_v18, %s5474_s6  ;;  %v960_v44 = vsel %vm447_vm6, %v959_v8, %v6598_v9  ;;  %v2331_v9 = vrot.slane %v2317_v7, %v5739_v63  ;;  %v951_v8 = vsel %vm443_vm5, %v950_v32, %v6555_v42 }
 0x1f5   : > { %v713_v20 = vrot.slane %v709_v62, 4  ;;  %2357 = vrot.lane.b32.xlu1 %v2263_v29, %s5479_s11  ;;  %v2334_v29 = vcombine.high %v2324_v2, %v8660_v49  ;;  %v701_v62 = vsel %vm451_vm8, %v700_v60, %v6577_v43  ;;  %v952_v23 = vsel %vm445_vm4, %v951_v8, %v6703_v24 }
 0x1f6   : > { %v6724_v48 = vpop.permute.xlu0 %2083  ;;  %v2335_v43 = vcombine.high %v2331_v9, %v8660_v49  ;;  %v953_v55 = vsel %vm447_vm6, %v952_v23, %v6596_v50 }
 0x1f7   : > { %717 = vst [vmem:[#allocation3 + $0x8] sm:$0xf0] %v713_v20  ;;  %v940_v13 = vpop.permute.xlu1 %939 }
 0x1f8   : > { %2373 = vrot.lane.b32.xlu0 %v2333_v57, %s5477_s9  ;;  %v961_v34 = vsel %vm449_vm7, %v960_v44, %v940_v13 }
 0x1f9   : > { %2361 = vrot.lane.b32.xlu1 %v2267_v36, %s5480_s12  ;;  %v962_v0 = vsel %vm451_vm8, %v961_v34, %v6615_v45 }
 0x1fa   : > { %v6739_v53 = vpop.permute.xlu0 %1393 }
 0x1fb   : > { %v6741_v46 = vpop.permute.xlu1 %2119 }
 0x1fc   : > { %2377 = vrot.lane.b32.xlu0 %v2324_v2, %s5475_s7 }
 0x1fe   : > { %v1650_v58 = vpop.permute.xlu0 %1649  ;;  %v2409_v52 = vld [vmem:[#allocation3 + $0x8] sm:$0xff] }
 0x1ff   : > { %v912_v18 = vpop.permute.xlu1 %911 }
 0x200   : > { %2381 = vrot.lane.b32.xlu0 %v2334_v29, %s5478_s10  ;;  %v954_v44 = vsel %vm449_vm7, %v953_v55, %v912_v18 }
 0x202   : > { %v666_v4 = vpop.permute.xlu0 %665 }
 0x203   : > { %v948_v26 = vpop.permute.xlu1 %947  ;;  %v702_v20 = vsel %vm453_vm9, %v701_v62, %v666_v4 }
 0x204   : > { %v963_v12 = vsel %vm453_vm9, %v962_v0, %v948_v26  ;;  %v712_v57 = vrot.slane %v702_v20, 4  ;;  %2385 = vrot.lane.b32.xlu0 %v2331_v9, %s5479_s11  ;;  %v8694_v26 = vld [vmem:[#allocation14_spill] sm:$0xff] }
 0x205   : > { %965 = vst [vmem:[#allocation3 + $0x18] sm:$0xf] %v963_v12  ;;  %v442_v50 = vsel %vm441_vm3, %v8694_v26, %v6337_v15 }
 0x206   : > { %716 = vst [vmem:[#allocation3] sm:$0xf0] %v712_v57  ;;  %v6765_v14 = vpop.permute.xlu0 %1365  ;;  %v444_v18 = vsel %vm443_vm5, %v442_v50, %v6284_v22 }
 0x207   : > { %v6767_v13 = vpop.permute.xlu1 %1401  ;;  %v446_v20 = vsel %vm445_vm4, %v444_v18, %v6370_v1 }
 0x208   : > { %2389 = vrot.lane.b32.xlu0 %v2335_v43, %s5480_s12  ;;  %v448_v12 = vsel %vm447_vm6, %v446_v20, %v6398_v56  ;;  %v1675_v43 = vsel %vm441_vm3, %v6274_v47, %v6679_v59  ;;  %v8695_v47 = vld [vmem:[#allocation30_spill] sm:$0xff] }
 0x209   : > { %v450_v57 = vsel %vm449_vm7, %v448_v12, %v6467_v25  ;;  %v1676_v1 = vsel %vm443_vm5, %v1675_v43, %v6606_v51  ;;  %v8696_v43 = vld [vmem:[#allocation33_spill] sm:$0xff] }
 0x20a   : > { %v6771_v45 = vpop.permute.xlu0 %1621  ;;  %v452_v15 = vsel %vm451_vm8, %v450_v57, %v6528_v39  ;;  %v1677_v56 = vsel %vm445_vm4, %v1676_v1, %v1650_v58  ;;  %v2145_v39 = vsel %vm441_vm3, %v8695_v47, %v6705_v30 }
 0x20b   : > { %v1658_v36 = vpop.permute.xlu1 %1657  ;;  %v1678_v38 = vsel %vm447_vm6, %v1677_v56, %v6645_v54  ;;  %v2146_v55 = vsel %vm443_vm5, %v2145_v39, %v6617_v31 }
 0x20c   : > { %v2411_v19 = vld [vmem:[#allocation3 + $0x18] sm:$0xff]  ;;  %v1679_v59 = vsel %vm449_vm7, %v1678_v38, %v1658_v36  ;;  %v2147_v54 = vsel %vm445_vm4, %v2146_v55, %v6741_v46 }
 0x20d   : > { %v5285_v37 = vpack.c.bf16 %v2411_v19, %v2409_v52 }
 0x20e   : > { %v6776_v2 = vpop.permute.xlu0 %2091 }
 0x20f   : > { %v6778_v27 = vpop.permute.xlu1 %1871  ;;  %5286 = vmatprep.subr.bf16.mxu0 %v5285_v37 }
 0x212   : > { %v916_v35 = vpop.permute.xlu0 %915 }
 0x213   : > { %v2128_v7 = vpop.permute.xlu1 %2127  ;;  %v955_v61 = vsel %vm451_vm8, %v954_v44, %v916_v35 }
 0x216   : > { %v6788_v29 = vpop.permute.xlu0 %1369 }
 0x217   : > { %v920_v60 = vpop.permute.xlu1 %919 }
 0x218   : > { %v956_v34 = vsel %vm453_vm9, %v955_v61, %v920_v60  ;;  %v2148_v60 = vsel %vm447_vm6, %v2147_v54, %v6661_v17  ;;  %v8697_v17 = vld [vmem:[#allocation32_spill] sm:$0xff] }
 0x219   : > { %964 = vst [vmem:[#allocation3 + $0x10] sm:$0xf] %v956_v34  ;;  %v2149_v34 = vsel %vm449_vm7, %v2148_v60, %v2128_v7  ;;  %v2138_v7 = vsel %vm441_vm3, %v8697_v17, %v6724_v48  ;;  %v8700_v17 = vld [vmem:[#allocation16_spill] sm:$0xff] }
 0x21a   : > { %v6791_v62 = vpop.permute.xlu0 %1625  ;;  %v2139_v56 = vsel %vm443_vm5, %v2138_v7, %v6604_v21 }
 0x21b   : > { %v1406_v42 = vpop.permute.xlu1 %1405  ;;  %v2140_v38 = vsel %vm445_vm4, %v2139_v56, %v6776_v2 }
 0x21e   : > { %v6793_v4 = vpop.permute.xlu0 %1839 }
 0x21f   : > { %v1662_v24 = vpop.permute.xlu1 %1661 }
 0x220   : > { %v1680_v32 = vsel %vm451_vm8, %v1679_v59, %v1662_v24  ;;  %v2410_v58 = vld [vmem:[#allocation3 + $0x10] sm:$0xff] }
 0x222   : > { %v2096_v0 = vpop.permute.xlu0 %2095 }
 0x223   : > { %v6800_v9 = vpop.permute.xlu1 %1875  ;;  %v2141_v47 = vsel %vm447_vm6, %v2140_v38, %v2096_v0 }
 0x226   : > { %v411_v22 = vpop.permute.xlu0 %410 }
 0x227   : > { %v2132_v52 = vpop.permute.xlu1 %2131  ;;  %v454_v19 = vsel %vm453_vm9, %v452_v15, %v411_v22  ;;  %v1427_v15 = vsel %vm441_vm3, %v8696_v43, %v6739_v53 }
 0x228   : > { %462 = vst [vmem:[#allocation3] sm:$0xf] %v454_v19  ;;  %v2150_v24 = vsel %vm451_vm8, %v2149_v34, %v2132_v52  ;;  %v1428_v22 = vsel %vm443_vm5, %v1427_v15, %v6636_v40 }
 0x229   : > { %v1429_v1 = vsel %vm445_vm4, %v1428_v22, %v6767_v13  ;;  %v8698_v13 = vld [vmem:[#allocation31_spill] sm:$0xff] }
 0x22a   : > { %v6817_v37 = vpop.permute.xlu0 %1373  ;;  %v1430_v53 = vsel %vm447_vm6, %v1429_v1, %v1406_v42 }
 0x22b   : > { %v1410_v25 = vpop.permute.xlu1 %1409 }
 0x22c   : > { %v1431_v48 = vsel %vm449_vm7, %v1430_v53, %v1410_v25 }
 0x22e   : > { %v1630_v8 = vpop.permute.xlu0 %1629 }
 0x22f   : > { %v1666_v23 = vpop.permute.xlu1 %1665  ;;  %v2408_v35 = vld [vmem:[#allocation3] sm:$0xff] }
 0x230   : > { %v1681_v51 = vsel %vm453_vm9, %v1680_v32, %v1666_v23  ;;  %v5287_v61 = vpack.c.bf16 %v2410_v58, %v2408_v35  ;;  %v1668_v23 = vsel %vm441_vm3, %v8698_v13, %v6714_v6 }
 0x231   : > { %v1685_v44 = vrot.slane %v1681_v51, 4  ;;  %v1669_v25 = vsel %vm443_vm5, %v1668_v23, %v6627_v10 }
 0x232   : > { %5288 = vmatpush1.bf16.msra.mxu0 %v5287_v61  ;;  %v6831_v30 = vpop.permute.xlu0 %1843  ;;  %v1670_v58 = vsel %vm445_vm4, %v1669_v25, %v6771_v45 }
 0x233   : > { %1689 = vst [vmem:[#allocation3 + $0x28] sm:$0xf0] %v1685_v44  ;;  %v1880_v36 = vpop.permute.xlu1 %1879  ;;  %v1671_v6 = vsel %vm447_vm6, %v1670_v58, %v6791_v62  ;;  %v8699_v44 = vld [vmem:[#allocation15_spill] sm:$0xff] }
 0x234   : > { %v1672_v55 = vsel %vm449_vm7, %v1671_v6, %v1630_v8  ;;  %v1897_v61 = vsel %vm441_vm3, %v8699_v44, %v6442_v11  ;;  %v1420_v11 = vsel %vm441_vm3, %v6381_v28, %v6765_v14 }
 0x235   : > { %v1898_v10 = vsel %vm443_vm5, %v1897_v61, %v6509_v5  ;;  %v1421_v5 = vsel %vm443_vm5, %v1420_v11, %v6788_v29 }
 0x236   : > { %v2100_v26 = vpop.permute.xlu0 %2099  ;;  %v1899_v45 = vsel %vm445_vm4, %v1898_v10, %v6778_v27  ;;  %v1422_v27 = vsel %vm445_vm4, %v1421_v5, %v6817_v37  ;;  %v1890_v37 = vsel %vm441_vm3, %v8700_v17, %v6498_v3 }
 0x237   : > { %v2136_v50 = vpop.permute.xlu1 %2135  ;;  %v2142_v39 = vsel %vm449_vm7, %v2141_v47, %v2100_v26  ;;  %v1900_v62 = vsel %vm447_vm6, %v1899_v45, %v6800_v9  ;;  %v1891_v7 = vsel %vm443_vm5, %v1890_v37, %v6793_v4 }
 0x238   : > { %v2151_v31 = vsel %vm453_vm9, %v2150_v24, %v2136_v50  ;;  %v1901_v8 = vsel %vm449_vm7, %v1900_v62, %v1880_v36 }
 0x239   : > { %v2155_v18 = vrot.slane %v2151_v31, 4 }
 0x23a   : > { %v1378_v20 = vpop.permute.xlu0 %1377 }
 0x23b   : > { %2159 = vst [vmem:[#allocation3 + $0x38] sm:$0xf0] %v2155_v18  ;;  %v1414_v46 = vpop.permute.xlu1 %1413  ;;  %v1423_v9 = vsel %vm447_vm6, %v1422_v27, %v1378_v20 }
 0x23c   : > { %v1432_v40 = vsel %vm451_vm8, %v1431_v48, %v1414_v46 }
 0x23e   : > { %v1634_v12 = vpop.permute.xlu0 %1633 }
 0x23f   : > { %v6838_v57 = vpop.permute.xlu1 %1851  ;;  %v1673_v54 = vsel %vm451_vm8, %v1672_v55, %v1634_v12 }
 0x242   : > { %v1848_v52 = vpop.permute.xlu0 %1847 }
 0x243   : > { %v2108_v19 = vpop.permute.xlu1 %2107 }
 0x246   : > { %v2104_v59 = vpop.permute.xlu0 %2103 }
 0x247   : > { %v1418_v32 = vpop.permute.xlu1 %1417  ;;  %v2143_v21 = vsel %vm451_vm8, %v2142_v39, %v2104_v59 }
 0x248   : > { %v1433_v2 = vsel %vm453_vm9, %v1432_v40, %v1418_v32  ;;  %v2144_v42 = vsel %vm453_vm9, %v2143_v21, %v2108_v19  ;;  %v1892_v19 = vsel %vm445_vm4, %v1891_v7, %v6831_v30 }
 0x249   : > { %1435 = vst [vmem:[#allocation3 + $0x28] sm:$0xf] %v1433_v2  ;;  %v2154_v0 = vrot.slane %v2144_v42, 4  ;;  %v1893_v56 = vsel %vm447_vm6, %v1892_v19, %v1848_v52 }
 0x24a   : > { %v1382_v51 = vpop.permute.xlu0 %1381  ;;  %v1894_v47 = vsel %vm449_vm7, %v1893_v56, %v6838_v57 }
 0x24b   : > { %v1888_v35 = vpop.permute.xlu1 %1887  ;;  %2158 = vst [vmem:[#allocation3 + $0x30] sm:$0xf0] %v2154_v0  ;;  %v1424_v28 = vsel %vm449_vm7, %v1423_v9, %v1382_v51 }
 0x24e   : > { %v1638_v60 = vpop.permute.xlu0 %1637 }
 0x24f   : > { %v1390_v34 = vpop.permute.xlu1 %1389  ;;  %v1674_v24 = vsel %vm453_vm9, %v1673_v54, %v1638_v60 }
 0x250   : > { %v1684_v26 = vrot.slane %v1674_v24, 4  ;;  %v6902_v20 = vld [vmem:[#allocation3 + $0x28] sm:$0xff] }
 0x251   : > { %8701 = vst [vmem:[#allocation21_spill] sm:$0xff] %v6902_v20 }
 0x252   : > { %1688 = vst [vmem:[#allocation3 + $0x20] sm:$0xf0] %v1684_v26  ;;  %v1884_v50 = vpop.permute.xlu0 %1883  ;;  %v2503_v26 = vstv %s170_s20 }
 0x253   : > { %v2338_v31 = vpop.permute.xlu1 %2337  ;;  %v1902_v18 = vsel %vm451_vm8, %v1901_v8, %v1884_v50 }
 0x254   : > { %v1903_v46 = vsel %vm453_vm9, %v1902_v18, %v1888_v35  ;;  %v2392_v30 = vsel %vm441_vm3, %v6650_v16, %v2338_v31 }
 0x255   : > { %1905 = vst [vmem:[#allocation3 + $0x38] sm:$0xf] %v1903_v46 }
 0x256   : > { %v1386_v14 = vpop.permute.xlu0 %1385 }
 0x257   : > { %v2342_v36 = vpop.permute.xlu1 %2341  ;;  %v1425_v12 = vsel %vm451_vm8, %v1424_v28, %v1386_v14 }
 0x258   : > { %v1426_v43 = vsel %vm453_vm9, %v1425_v12, %v1390_v34  ;;  %v2393_v40 = vsel %vm443_vm5, %v2392_v30, %v2342_v36 }
 0x259   : > { %1434 = vst [vmem:[#allocation3 + $0x20] sm:$0xf] %v1426_v43 }
 0x25a   : > { %v1856_v29 = vpop.permute.xlu0 %1855 }
 0x25b   : > { %v2346_v15 = vpop.permute.xlu1 %2345  ;;  %v1895_v3 = vsel %vm451_vm8, %v1894_v47, %v1856_v29 }
 0x25c   : > { %v2415_v22 = vld [vmem:[#allocation3 + $0x38] sm:$0xff]  ;;  %v2394_v32 = vsel %vm445_vm4, %v2393_v40, %v2346_v15 }
 0x25d   : > { %v5289_v1 = vpack.c.bf16 %v2415_v22, %v6902_v20 }
 0x25e   : > { %v2366_v38 = vpop.permute.xlu0 %2365 }
 0x25f   : > { %v2350_v53 = vpop.permute.xlu1 %2349  ;;  %5290 = vmatprep.subr.bf16.mxu0 %v5289_v1  ;;  %v2399_v58 = vsel %vm441_vm3, %v6684_v41, %v2366_v38  ;;  %v2418_v41 = vld [vmem:[%s8573_s1] sm:$0xff] }
 0x260   : > { %v2395_v13 = vsel %vm447_vm6, %v2394_v32, %v2350_v53  ;;  %v6920_v0 = vld [vmem:[#allocation3 + $0x20] sm:$0xff] }
 0x261   : > { %8702 = vst [vmem:[#allocation19_spill] sm:$0xff] %v6920_v0 }
 0x262   : > { %v1860_v48 = vpop.permute.xlu0 %1859 }
 0x263   : > { %v2354_v4 = vpop.permute.xlu1 %2353  ;;  %v1896_v39 = vsel %vm453_vm9, %v1895_v3, %v1860_v48 }
 0x264   : > { %1904 = vst [vmem:[#allocation3 + $0x30] sm:$0xf] %v1896_v39  ;;  %v2396_v57 = vsel %vm449_vm7, %v2395_v13, %v2354_v4 }
 0x266   : > { %v2370_v59 = vpop.permute.xlu0 %2369 }
 0x267   : > { %v2358_v52 = vpop.permute.xlu1 %2357  ;;  %v2400_v6 = vsel %vm443_vm5, %v2399_v58, %v2370_v59 }
 0x268   : > { %v2397_v23 = vsel %vm451_vm8, %v2396_v57, %v2358_v52 }
 0x26a   : > { %v2374_v21 = vpop.permute.xlu0 %2373 }
 0x26b   : > { %v2362_v2 = vpop.permute.xlu1 %2361  ;;  %v2414_v25 = vld [vmem:[#allocation3 + $0x30] sm:$0xff]  ;;  %v2401_v44 = vsel %vm445_vm4, %v2400_v6, %v2374_v21 }
 0x26c   : > { %v2398_v42 = vsel %vm453_vm9, %v2397_v23, %v2362_v2  ;;  %v5291_v16 = vpack.c.bf16 %v2414_v25, %v6920_v0 }
 0x26d   : > { %2406 = vst [vmem:[#allocation3 + $0x40] sm:$0xf] %v2398_v42 }
 0x26e   : > { %5292 = vmatpush1.bf16.msra.mxu0 %v5291_v16  ;;  %v2378_v51 = vpop.permute.xlu0 %2377 }
 0x26f   : > { %v2402_v61 = vsel %vm447_vm6, %v2401_v44, %v2378_v51 }
 0x272   : > { %v2382_v35 = vpop.permute.xlu0 %2381 }
 0x273   : > { %v2403_v54 = vsel %vm449_vm7, %v2402_v61, %v2382_v35 }
 0x274   : > { %v2416_v45 = vld [vmem:[#allocation3 + $0x40] sm:$0x1f] }
 0x276   : > { %v2386_v55 = vpop.permute.xlu0 %2385 }
 0x277   : > { %v2404_v60 = vsel %vm451_vm8, %v2403_v54, %v2386_v55 }
 0x27a   : > { %v2390_v34 = vpop.permute.xlu0 %2389 }
 0x27b   : > { %v2405_v10 = vsel %vm453_vm9, %v2404_v60, %v2390_v34 }
 0x27c   : > { %2407 = vst [vmem:[#allocation3 + $0x48] sm:$0xf] %v2405_v10 }
 0x283   : > { %v2417_v24 = vld [vmem:[#allocation3 + $0x48] sm:$0x1f] }
 0x284   : > { %5272 = vmatprep.subr.msk.mxu0 %vm2423_vm11, %v2417_v24 }
 0x285   : > { %5273 = vmatpush1.msk.msra.mxu0 %vm2423_vm11, %v2416_v45 }
 0x286   : > { %5274 = vmatmul.mubr.msk.f32.vlgmr.msra.gmra.mrb[0].mxu0 %vm2419_vm12, %v2418_v41 }
 0x359   : > { %v6937_v62 = vpop.f32.mrb[0].mxu0 }
 0x35a   : > { %8703 = vst [vmem:[#allocation20_spill] sm:$0xff] %v6937_v62  ;;  %vm2501_vm13 = vcmp.gt.f32.partialorder %v6937_v62, 0.0  ;;  %v6940_v11 = vpop.f32.mrb[1].mxu0  ;;  %v2504_v8 = vmul.f32 %v2503_v26, %v6937_v62 }
 0x35b   : > { %8704 = vst [vmem:[#allocation18_spill] sm:$0xff] %v6940_v11  ;;  %v2505_v31 = vmul.f32 %v2503_v26, %v6940_v11  ;;  %vm2502_vm14 = vcmp.gt.f32.partialorder %v6940_v11, 0.0 }
 0x35c   : > { %v2506_v50 = vsel %vm2501_vm13, %v6937_v62, %v2504_v8 }
 0x35d   : > { %2511 = vrot.lane.b32.xlu1 %v2506_v50, %s5479_s11  ;;  %2509 = vrot.lane.b32.xlu0 %v2506_v50, %s5480_s12  ;;  %v2507_v5 = vsel %vm2502_vm14, %v6940_v11, %v2505_v31  ;;  %v2538_v15 = vrot.slane %v2506_v50, 4 }
 0x35e   : > { %v2546_v13 = vrot.slane %v2507_v5, 4 }
 0x361   : > { %2515 = vrot.lane.b32.xlu1 %v2506_v50, %s5475_s7  ;;  %2513 = vrot.lane.b32.xlu0 %v2506_v50, %s5478_s10 }
 0x365   : > { %2519 = vrot.lane.b32.xlu1 %v2506_v50, %s5474_s6  ;;  %2517 = vrot.lane.b32.xlu0 %v2506_v50, %s5477_s9 }
 0x369   : > { %2521 = vrot.lane.b32.xlu0 %v2506_v50, %s5476_s8  ;;  %2524 = vrot.lane.b32.xlu1 %v2507_v5, %s5480_s12 }
 0x36d   : > { %2526 = vrot.lane.b32.xlu0 %v2507_v5, %s5479_s11  ;;  %2528 = vrot.lane.b32.xlu1 %v2507_v5, %s5478_s10 }
 0x371   : > { %2530 = vrot.lane.b32.xlu0 %v2507_v5, %s5475_s7  ;;  %2532 = vrot.lane.b32.xlu1 %v2507_v5, %s5477_s9 }
 0x375   : > { %2534 = vrot.lane.b32.xlu0 %v2507_v5, %s5474_s6  ;;  %2536 = vrot.lane.b32.xlu1 %v2507_v5, %s5476_s8 }
 0x3cf   : > { %v2512_v18 = vpop.permute.xlu1 %2511  ;;  %v2510_v27 = vpop.permute.xlu0 %2509 }
 0x3d0   : > { %v2540_v14 = vrot.slane %v2512_v18, 4  ;;  %v2539_v36 = vrot.slane %v2510_v27, 4 }
 0x3d2   : > { %v2570_v7 = vcombine.low %v2538_v15, %v2540_v14 }
 0x3d3   : > { %v2516_v46 = vpop.permute.xlu1 %2515  ;;  %v2514_v9 = vpop.permute.xlu0 %2513 }
 0x3d4   : > { %v2541_v28 = vrot.slane %v2514_v9, 4  ;;  %v2542_v37 = vrot.slane %v2516_v46, 4  ;;  %v2577_v3 = vrot.slane %v2570_v7, %v5639_v33 }
 0x3d6   : > { %v2578_v17 = vcombine.low %v2539_v36, %v2541_v28 }
 0x3d7   : > { %v2520_v12 = vpop.permute.xlu1 %2519  ;;  %v2518_v43 = vpop.permute.xlu0 %2517 }
 0x3d8   : > { %v2544_v29 = vrot.slane %v2520_v12, 4  ;;  %v2543_v56 = vrot.slane %v2518_v43, 4  ;;  %v2585_v53 = vrot.slane %v2578_v17, %v5639_v33 }
 0x3da   : > { %v2586_v1 = vcombine.low %v2542_v37, %v2544_v29  ;;  %v2602_v52 = vcombine.low %v2577_v3, %v2585_v53  ;;  %v2603_v10 = vcombine.high %v2577_v3, %v2585_v53 }
 0x3db   : > { %v2522_v22 = vpop.permute.xlu0 %2521  ;;  %v2525_v19 = vpop.permute.xlu1 %2524 }
 0x3dc   : > { %v2545_v38 = vrot.slane %v2522_v22, 4  ;;  %v2593_v39 = vrot.slane %v2586_v1, %v5639_v33  ;;  %v2547_v32 = vrot.slane %v2525_v19, 4  ;;  %v2610_v25 = vrot.slane %v2602_v52, %v5739_v63 }
 0x3dd   : > { %v2617_v5 = vrot.slane %v2603_v10, %v5739_v63 }
 0x3de   : > { %v2594_v47 = vcombine.low %v2543_v56, %v2545_v38 }
 0x3df   : > { %v2527_v48 = vpop.permute.xlu0 %2526  ;;  %v2529_v4 = vpop.permute.xlu1 %2528 }
 0x3e0   : > { %v2601_v30 = vrot.slane %v2594_v47, %v5639_v33  ;;  %v2548_v40 = vrot.slane %v2527_v48, 4  ;;  %v2549_v59 = vrot.slane %v2529_v4, 4 }
 0x3e2   : > { %v2618_v57 = vcombine.low %v2593_v39, %v2601_v30  ;;  %v2638_v23 = vcombine.low %v2546_v13, %v2548_v40  ;;  %v2646_v21 = vcombine.low %v2547_v32, %v2549_v59  ;;  %v2619_v51 = vcombine.high %v2593_v39, %v2601_v30 }
 0x3e3   : > { %v2531_v2 = vpop.permute.xlu0 %2530  ;;  %v2533_v42 = vpop.permute.xlu1 %2532 }
 0x3e4   : > { %v2626_v16 = vrot.slane %v2618_v57, %v5739_v63  ;;  %v2645_v35 = vrot.slane %v2638_v23, %v5639_v33  ;;  %v2653_v58 = vrot.slane %v2646_v21, %v5639_v33  ;;  %v2550_v61 = vrot.slane %v2531_v2, 4 }
 0x3e5   : > { %v2551_v54 = vrot.slane %v2533_v42, 4  ;;  %v2633_v26 = vrot.slane %v2619_v51, %v5739_v63 }
 0x3e6   : > { %v2634_v44 = vcombine.low %v2610_v25, %v2626_v16  ;;  %v2635_v45 = vcombine.high %v2610_v25, %v2626_v16  ;;  %v2670_v8 = vcombine.low %v2645_v35, %v2653_v58  ;;  %v2671_v12 = vcombine.high %v2645_v35, %v2653_v58 }
 0x3e7   : > { %v2535_v6 = vpop.permute.xlu0 %2534  ;;  %v2537_v55 = vpop.permute.xlu1 %2536  ;;  %v2636_v27 = vcombine.low %v2617_v5, %v2633_v26  ;;  %v2637_v36 = vcombine.high %v2617_v5, %v2633_v26 }
 0x3e8   : > { %v2552_v60 = vrot.slane %v2535_v6, 4  ;;  %v2553_v34 = vrot.slane %v2537_v55, 4  ;;  %2714 = vrot.lane.b32.xlu0 %v2634_v44, %s5469_s30  ;;  %v2678_v46 = vrot.slane %v2670_v8, %v5739_v63  ;;  %v2685_v15 = vrot.slane %v2671_v12, %v5739_v63 }
 0x3ea   : > { %v2654_v24 = vcombine.low %v2550_v61, %v2552_v60  ;;  %v2662_v41 = vcombine.low %v2551_v54, %v2553_v34 }
 0x3ec   : > { %v2661_v50 = vrot.slane %v2654_v24, %v5639_v33  ;;  %v2669_v31 = vrot.slane %v2662_v41, %v5639_v33  ;;  %2718 = vrot.lane.b32.xlu0 %v2635_v45, %s5469_s30 }
 0x3ee   : > { %v2686_v18 = vcombine.low %v2661_v50, %v2669_v31  ;;  %v2687_v28 = vcombine.high %v2661_v50, %v2669_v31 }
 0x3f0   : > { %v2694_v9 = vrot.slane %v2686_v18, %v5739_v63  ;;  %2722 = vrot.lane.b32.xlu0 %v2636_v27, %s5469_s30  ;;  %v2701_v29 = vrot.slane %v2687_v28, %v5739_v63 }
 0x3f2   : > { %v2702_v14 = vcombine.low %v2678_v46, %v2694_v9  ;;  %v2703_v43 = vcombine.high %v2678_v46, %v2694_v9  ;;  %v2704_v17 = vcombine.low %v2685_v15, %v2701_v29  ;;  %v2705_v37 = vcombine.high %v2685_v15, %v2701_v29 }
 0x3f4   : > { %2716 = vrot.lane.b32.xlu1 %v2702_v14, %s5469_s30  ;;  %2726 = vrot.lane.b32.xlu0 %v2637_v36, %s5469_s30 }
 0x3f8   : > { %2720 = vrot.lane.b32.xlu1 %v2703_v43, %s5469_s30 }
 0x3fc   : > { %2724 = vrot.lane.b32.xlu1 %v2704_v17, %s5469_s30 }
 0x400   : > { %2728 = vrot.lane.b32.xlu1 %v2705_v37, %s5469_s30  ;;  %s5203_s30 = sshll.u32 %s8494_s28, 4  ;;  %s8519_s30 = int_to_ptr.vmem [resolvable:$true] %s5203_s30 }
 0x45a   : > { %v2715_v7 = vpop.permute.xlu0 %2714 }
 0x45b   : > { %2738 = vst.msk [vmem:[#allocation2 + $0x1] sm:$0xff] %vm225_vm2, %v2715_v7 }
 0x45e   : > { %v2719_v22 = vpop.permute.xlu0 %2718 }
 0x45f   : > { %2740 = vst.msk [vmem:[#allocation2 + $0x19] sm:$0xff] %vm225_vm2, %v2719_v22 }
 0x462   : > { %v2723_v19 = vpop.permute.xlu0 %2722  ;;  %v2962_v1 = vld [vmem:[#allocation2] sm:$0xff] }
 0x463   : > { %2742 = vst.msk [vmem:[#allocation2 + $0x31] sm:$0xff] %vm225_vm2, %v2723_v19  ;;  %2978 = vrot.lane.b32.xlu0 %v2962_v1, %s5470_s4  ;;  %v3934_v48 = vld [vmem:[#allocation2 + $0x1] sm:$0xff] }
 0x466   : > { %v2717_v56 = vpop.permute.xlu1 %2716  ;;  %v2727_v38 = vpop.permute.xlu0 %2726  ;;  %v2964_v53 = vld [vmem:[#allocation2 + $0x18] sm:$0xff] }
 0x467   : > { %2739 = vst.msk [vmem:[#allocation2 + $0x9] sm:$0xff] %vm225_vm2, %v2717_v56  ;;  %2744 = vst.msk [vmem:[#allocation2 + $0x49] sm:$0xff] %vm225_vm2, %v2727_v38  ;;  %2982 = vrot.lane.b32.xlu1 %v2964_v53, %s5470_s4  ;;  %v3936_v13 = vld [vmem:[#allocation2 + $0x19] sm:$0xff] }
 0x46a   : > { %v2721_v47 = vpop.permute.xlu1 %2720  ;;  %v2966_v3 = vld [vmem:[#allocation2 + $0x30] sm:$0xff] }
 0x46b   : > { %2741 = vst.msk [vmem:[#allocation2 + $0x21] sm:$0xff] %vm225_vm2, %v2721_v47  ;;  %v3938_v4 = vld [vmem:[#allocation2 + $0x31] sm:$0xff]  ;;  %2986 = vrot.lane.b32.xlu0 %v2966_v3, %s5470_s4  ;;  %v2754_v30 = vcombine.low %v2962_v1, %v2966_v3  ;;  %v2755_v59 = vcombine.high %v2962_v1, %v2966_v3 }
 0x46c   : > { %v3472_v39 = vcombine.low %v3934_v48, %v3938_v4  ;;  %v3473_v40 = vcombine.high %v3934_v48, %v3938_v4 }
 0x46d   : > { %v7001_v25 = vrot.slane %v2754_v30, %v5639_v33  ;;  %v7017_v44 = vrot.slane %v2755_v59, %v5639_v33 }
 0x46e   : > { %v2725_v52 = vpop.permute.xlu1 %2724  ;;  %v2968_v32 = vld [vmem:[#allocation2 + $0x48] sm:$0xff]  ;;  %v6998_v42 = vrot.slane %v3472_v39, %v5639_v33  ;;  %v7010_v6 = vrot.slane %v3473_v40, %v5639_v33 }
 0x46f   : > { %2743 = vst.msk [vmem:[#allocation2 + $0x39] sm:$0xff] %vm225_vm2, %v2725_v52  ;;  %v3940_v57 = vld [vmem:[#allocation2 + $0x49] sm:$0xff]  ;;  %3232 = vrot.lane.b32.xlu0 %v2962_v1, %s5472_s5  ;;  %2990 = vrot.lane.b32.xlu1 %v2968_v32, %s5470_s4  ;;  %v2770_v21 = vcombine.low %v2964_v53, %v2968_v32  ;;  %v2771_v16 = vcombine.high %v2964_v53, %v2968_v32 }
 0x470   : > { %v3488_v23 = vcombine.low %v3936_v13, %v3940_v57  ;;  %v3489_v2 = vcombine.high %v3936_v13, %v3940_v57  ;;  %v7042_v50 = vld [vmem:[#allocation2 + $0x8] sm:$0xff] }
 0x471   : > { %v7007_v58 = vrot.slane %v2770_v21, %v5639_v33  ;;  %v7020_v61 = vrot.slane %v2771_v16, %v5639_v33  ;;  %v3935_v36 = vld [vmem:[#allocation2 + $0x9] sm:$0xff] }
 0x472   : > { %v2729_v51 = vpop.permute.xlu1 %2728  ;;  %v7004_v35 = vrot.slane %v3488_v23, %v5639_v33  ;;  %v7013_v55 = vrot.slane %v3489_v2, %v5639_v33  ;;  %v7048_v5 = vld [vmem:[#allocation2 + $0x20] sm:$0xff]  ;;  %v7090_v29 = vld [vmem:[#allocation2 + $0xa] sm:$0xff] }
 0x473   : > { %2745 = vst.msk [vmem:[#allocation2 + $0x51] sm:$0xff] %vm225_vm2, %v2729_v51  ;;  %3240 = vrot.lane.b32.xlu0 %v2966_v3, %s5472_s5  ;;  %3236 = vrot.lane.b32.xlu1 %v2964_v53, %s5472_s5  ;;  %v2787_v60 = vcombine.high %v7001_v25, %v7007_v58  ;;  %v2802_v10 = vcombine.low %v7017_v44, %v7020_v61  ;;  %v3937_v43 = vld [vmem:[#allocation2 + $0x21] sm:$0xff] }
 0x474   : > { %v3505_v54 = vcombine.high %v6998_v42, %v7004_v35  ;;  %v3520_v34 = vcombine.low %v7010_v6, %v7013_v55  ;;  %v3521_v24 = vcombine.high %v7010_v6, %v7013_v55  ;;  %v2803_v41 = vcombine.high %v7017_v44, %v7020_v61  ;;  %v7097_v37 = vld [vmem:[#allocation2 + $0x22] sm:$0xff]  ;;  %v7113_v1 = vld [vmem:[#allocation2 + $0x1a] sm:$0xff] }
 0x475   : > { %v3504_v45 = vcombine.low %v6998_v42, %v7004_v35  ;;  %v2786_v8 = vcombine.low %v7001_v25, %v7007_v58  ;;  %v7103_v7 = vld [vmem:[#allocation2 + $0x2] sm:$0xff] }
 0x476   : > { %v7038_v26 = vld [vmem:[#allocation2 + $0x38] sm:$0xff]  ;;  %v7152_v39 = vrot.slane %v3505_v54, %v5739_v63  ;;  %v7186_v16 = vrot.slane %v3520_v34, %v5739_v63 }
 0x477   : > { %3950 = vrot.lane.b32.xlu0 %v3934_v48, %s5472_s5  ;;  %3244 = vrot.lane.b32.xlu1 %v2968_v32, %s5472_s5  ;;  %v2823_v31 = vcombine.high %v7042_v50, %v7038_v26  ;;  %v3939_v12 = vld [vmem:[#allocation2 + $0x39] sm:$0xff] }
 0x478   : > { %v7095_v17 = vld [vmem:[#allocation2 + $0x3a] sm:$0xff]  ;;  %v7111_v19 = vld [vmem:[#allocation2 + $0x32] sm:$0xff]  ;;  %v3540_v53 = vcombine.low %v3935_v36, %v3939_v12  ;;  %v3541_v32 = vcombine.high %v3935_v36, %v3939_v12 }
 0x479   : > { %v7057_v46 = vrot.slane %v2823_v31, %v5639_v33  ;;  %v3535_v31 = vrot.slane %v3521_v24, %v5739_v63  ;;  %v4197_v6 = vcombine.high %v7103_v7, %v7111_v19  ;;  %v4264_v55 = vcombine.low %v7090_v29, %v7095_v17 }
 0x47a   : > { %v7050_v18 = vld [vmem:[#allocation2 + $0x50] sm:$0xff]  ;;  %v3555_v2 = vrot.slane %v3541_v32, %v5639_v33  ;;  %v7241_v24 = vrot.slane %v2803_v41, %v5739_v63  ;;  %v4265_v41 = vcombine.high %v7090_v29, %v7095_v17 }
 0x47b   : > { %v2839_v27 = vcombine.high %v7048_v5, %v7050_v18  ;;  %3958 = vrot.lane.b32.xlu0 %v3938_v4, %s5472_s5  ;;  %3954 = vrot.lane.b32.xlu1 %v3936_v13, %s5472_s5  ;;  %v3941_v15 = vld [vmem:[#allocation2 + $0x51] sm:$0xff]  ;;  %v2838_v3 = vcombine.low %v7048_v5, %v7050_v18  ;;  %v4211_v44 = vrot.slane %v4197_v6, %v5639_v33 }
 0x47c   : > { %v7105_v22 = vld [vmem:[#allocation2 + $0x52] sm:$0xff]  ;;  %v4410_v56 = vld [vmem:[#allocation2 + $0x4a] sm:$0xff]  ;;  %v3556_v38 = vcombine.low %v3937_v43, %v3941_v15  ;;  %v3557_v59 = vcombine.high %v3937_v43, %v3941_v15  ;;  %v7262_v61 = vrot.slane %v4264_v55, %v5639_v33  ;;  %v3539_v6 = vcombine.high %v3535_v31, %v8660_v49 }
 0x47d   : > { %v7060_v9 = vrot.slane %v2839_v27, %v5639_v33  ;;  %v7157_v40 = vrot.slane %v2838_v3, %v5639_v33  ;;  %v4213_v27 = vcombine.high %v7113_v1, %v4410_v56 }
 0x47e   : > { %v7135_v47 = vrot.slane %v3556_v38, %v5639_v33  ;;  %v3571_v21 = vrot.slane %v3557_v59, %v5639_v33 }
 0x47f   : > { %v2870_v28 = vcombine.low %v7057_v46, %v7060_v9  ;;  %3702 = vrot.lane.b32.xlu0 %v3934_v48, %s5470_s4  ;;  %3962 = vrot.lane.b32.xlu1 %v3940_v57, %s5472_s5  ;;  %v2871_v14 = vcombine.high %v7057_v46, %v7060_v9  ;;  %v7144_v48 = vrot.slane %v3540_v53, %v5639_v33 }
 0x480   : > { %v3588_v54 = vcombine.low %v3555_v2, %v3571_v21 }
 0x481   : > { %v3573_v30 = vcombine.high %v7144_v48, %v7135_v47 }
 0x482   : > { %v7203_v34 = vrot.slane %v3588_v54, %v5739_v63 }
 0x483   : > { %3710 = vrot.lane.b32.xlu0 %v3938_v4, %s5470_s4  ;;  %3706 = vrot.lane.b32.xlu1 %v3936_v13, %s5470_s4  ;;  %v2822_v4 = vcombine.low %v7042_v50, %v7038_v26  ;;  %v7169_v13 = vrot.slane %v2787_v60, %v5739_v63  ;;  %v4212_v60 = vcombine.low %v7113_v1, %v4410_v56 }
 0x485   : > { %v7163_v52 = vrot.slane %v2822_v4, %v5639_v33 }
 0x487   : > { %3714 = vrot.lane.b32.xlu1 %v3940_v57, %s5470_s4  ;;  %2980 = vrot.lane.b32.xlu0 %v7042_v50, %s5470_s4  ;;  %v7172_v57 = vrot.slane %v3573_v30, %v5739_v63  ;;  %v2855_v23 = vcombine.high %v7163_v52, %v7157_v40 }
 0x489   : > { %v7189_v51 = vrot.slane %v2855_v23, %v5739_v63  ;;  %v3605_v25 = vcombine.high %v7172_v57, %v8660_v49 }
 0x48b   : > { %2984 = vrot.lane.b32.xlu1 %v7048_v5, %s5470_s4  ;;  %2988 = vrot.lane.b32.xlu0 %v7038_v26, %s5470_s4 }
 0x48f   : > { %3234 = vrot.lane.b32.xlu0 %v7042_v50, %s5472_s5  ;;  %2992 = vrot.lane.b32.xlu1 %v7050_v18, %s5470_s4  ;;  %v4196_v50 = vcombine.low %v7103_v7, %v7111_v19 }
 0x493   : > { %3242 = vrot.lane.b32.xlu0 %v7038_v26, %s5472_s5  ;;  %3238 = vrot.lane.b32.xlu1 %v7048_v5, %s5472_s5  ;;  %v7200_v26 = vrot.slane %v2802_v10, %v5739_v63  ;;  %v7216_v10 = vrot.slane %v4212_v60, %v5639_v33  ;;  %v7222_v5 = vrot.slane %v2870_v28, %v5739_v63 }
 0x494   : > { %v3572_v60 = vcombine.low %v7144_v48, %v7135_v47  ;;  %v7331_v47 = vrot.slane %v3504_v45, %v5739_v63 }
 0x496   : > { %v7334_v48 = vrot.slane %v3572_v60, %v5739_v63  ;;  %v3536_v45 = vcombine.high %v7331_v47, %v8660_v49 }
 0x497   : > { %3952 = vrot.lane.b32.xlu0 %v3935_v36, %s5472_s5  ;;  %3246 = vrot.lane.b32.xlu1 %v7050_v18, %s5472_s5  ;;  %v3589_v18 = vcombine.high %v3555_v2, %v3571_v21 }
 0x49b   : > { %3960 = vrot.lane.b32.xlu0 %v3939_v12, %s5472_s5  ;;  %3956 = vrot.lane.b32.xlu1 %v3937_v43, %s5472_s5 }
 0x49f   : > { %4422 = vrot.lane.b32.xlu0 %v7090_v29, %s5470_s4  ;;  %3964 = vrot.lane.b32.xlu1 %v3941_v15, %s5472_s5 }
 0x4a3   : > { %4430 = vrot.lane.b32.xlu0 %v7095_v17, %s5470_s4  ;;  %4426 = vrot.lane.b32.xlu1 %v7097_v37, %s5470_s4 }
 0x4a7   : > { %4420 = vrot.lane.b32.xlu0 %v7103_v7, %s5470_s4  ;;  %4434 = vrot.lane.b32.xlu1 %v7105_v22, %s5470_s4 }
 0x4ab   : > { %4428 = vrot.lane.b32.xlu0 %v7111_v19, %s5470_s4  ;;  %4424 = vrot.lane.b32.xlu1 %v7113_v1, %s5470_s4 }
 0x4af   : > { %3704 = vrot.lane.b32.xlu0 %v3935_v36, %s5470_s4  ;;  %4432 = vrot.lane.b32.xlu1 %v4410_v56, %s5470_s4  ;;  %v4280_v36 = vcombine.low %v7097_v37, %v7105_v22 }
 0x4b3   : > { %3712 = vrot.lane.b32.xlu0 %v3939_v12, %s5470_s4  ;;  %3708 = vrot.lane.b32.xlu1 %v3937_v43, %s5470_s4  ;;  %v7228_v12 = vrot.slane %v4196_v50, %v5639_v33 }
 0x4b5   : > { %v4229_v28 = vcombine.high %v7228_v12, %v7216_v10 }
 0x4b7   : > { %4676 = vrot.lane.b32.xlu0 %v7090_v29, %s5472_s5  ;;  %3716 = vrot.lane.b32.xlu1 %v3941_v15, %s5470_s4  ;;  %v7248_v15 = vrot.slane %v3589_v18, %v5739_v63  ;;  %v4279_v29 = vrot.slane %v4265_v41, %v5639_v33 }
 0x4bb   : > { %4684 = vrot.lane.b32.xlu0 %v7095_v17, %s5472_s5  ;;  %4680 = vrot.lane.b32.xlu1 %v7097_v37, %s5472_s5 }
 0x4bf   : > { %4674 = vrot.lane.b32.xlu0 %v7103_v7, %s5472_s5  ;;  %4688 = vrot.lane.b32.xlu1 %v7105_v22, %s5472_s5  ;;  %v7252_v7 = vrot.slane %v4280_v36, %v5639_v33 }
 0x4c1   : > { %v4297_v3 = vcombine.high %v7262_v61, %v7252_v7 }
 0x4c3   : > { %4682 = vrot.lane.b32.xlu0 %v7111_v19, %s5472_s5  ;;  %4678 = vrot.lane.b32.xlu1 %v7113_v1, %s5472_s5  ;;  %v4227_v1 = vrot.slane %v4213_v27, %v5639_v33  ;;  %v4281_v19 = vcombine.high %v7097_v37, %v7105_v22  ;;  %v7277_v22 = vrot.slane %v2871_v14, %v5739_v63 }
 0x4c4   : > { %v7295_v9 = vrot.slane %v4297_v3, %v5739_v63 }
 0x4c5   : > { %v4244_v53 = vcombine.low %v4211_v44, %v4227_v1  ;;  %v4295_v4 = vrot.slane %v4281_v19, %v5639_v33  ;;  %v4245_v54 = vcombine.high %v4211_v44, %v4227_v1  ;;  %v3604_v1 = vcombine.high %v7334_v48, %v8660_v49 }
 0x4c6   : > { %v7359_v19 = vrot.slane %v2786_v8, %v5739_v63 }
 0x4c7   : > { %3613 = vrot.lane.b32.xlu0 %v7152_v39, %s5474_s6  ;;  %4686 = vrot.lane.b32.xlu1 %v4410_v56, %s5472_s5  ;;  %v7267_v56 = vrot.slane %v4229_v28, %v5739_v63  ;;  %v7292_v46 = vrot.slane %v4244_v53, %v5739_v63  ;;  %v4313_v14 = vcombine.high %v4279_v29, %v4295_v4 }
 0x4c8   : > { %v4312_v59 = vcombine.low %v4279_v29, %v4295_v4  ;;  %v7324_v36 = vrot.slane %v4245_v54, %v5739_v63  ;;  %8705 = vst [vmem:[#allocation12_spill] sm:$0xff] %v7359_v19  ;;  %v2818_v4 = vcombine.high %v7359_v19, %v8660_v49  ;;  %v2887_v54 = vcombine.high %v7189_v51, %v8660_v49 }
 0x4c9   : > { %v7306_v21 = vrot.slane %v4313_v14, %v5739_v63 }
 0x4ca   : > { %v7309_v2 = vrot.slane %v4312_v59, %v5739_v63 }
 0x4cb   : > { %2895 = vrot.lane.b32.xlu0 %v7169_v13, %s5474_s6  ;;  %3641 = vrot.lane.b32.xlu1 %v7172_v57, %s5474_s6  ;;  %v3537_v57 = vcombine.high %v7152_v39, %v8660_v49  ;;  %v2819_v39 = vcombine.high %v7169_v13, %v8660_v49  ;;  %v3538_v13 = vcombine.high %v7186_v16, %v8660_v49 }
 0x4cf   : > { %3621 = vrot.lane.b32.xlu0 %v7186_v16, %s5475_s7  ;;  %2923 = vrot.lane.b32.xlu1 %v7189_v51, %s5474_s6  ;;  %v3606_v51 = vcombine.high %v7203_v34, %v8660_v49  ;;  %v2820_v16 = vcombine.high %v7200_v26, %v8660_v49 }
 0x4d3   : > { %2903 = vrot.lane.b32.xlu0 %v7200_v26, %s5475_s7  ;;  %3649 = vrot.lane.b32.xlu1 %v7203_v34, %s5475_s7  ;;  %v2888_v34 = vcombine.high %v7222_v5, %v8660_v49 }
 0x4d5   : > { %v7245_v43 = vpop.permute.xlu0 %2978 }
 0x4d7   : > { %3629 = vrot.lane.b32.xlu0 %v3535_v31, %s5479_s11  ;;  %2931 = vrot.lane.b32.xlu1 %v7222_v5, %s5475_s7  ;;  %v3607_v5 = vcombine.high %v7248_v15, %v8660_v49 }
 0x4d9   : > { %v7269_v38 = vpop.permute.xlu1 %2982 }
 0x4db   : > { %2911 = vrot.lane.b32.xlu0 %v7241_v24, %s5479_s11  ;;  %3657 = vrot.lane.b32.xlu1 %v7248_v15, %s5479_s11 }
 0x4dd   : > { %v7271_v37 = vpop.permute.xlu0 %2986 }
 0x4df   : > { %4337 = vrot.lane.b32.xlu0 %v7267_v56, %s5474_s6  ;;  %2939 = vrot.lane.b32.xlu1 %v7277_v22, %s5479_s11 }
 0x4e1   : > { %v7287_v17 = vpop.permute.xlu0 %3232  ;;  %v7289_v30 = vpop.permute.xlu1 %2990 }
 0x4e3   : > { %4345 = vrot.lane.b32.xlu0 %v7292_v46, %s5475_s7  ;;  %4365 = vrot.lane.b32.xlu1 %v7295_v9, %s5474_s6 }
 0x4e5   : > { %v7301_v32 = vpop.permute.xlu0 %3240  ;;  %v7303_v23 = vpop.permute.xlu1 %3236 }
 0x4e6   : > { %v3256_v50 = vcombine.low %v7287_v17, %v7301_v32  ;;  %v3257_v0 = vcombine.high %v7287_v17, %v7301_v32 }
 0x4e7   : > { %4381 = vrot.lane.b32.xlu0 %v7306_v21, %s5479_s11  ;;  %4373 = vrot.lane.b32.xlu1 %v7309_v2, %s5475_s7 }
 0x4e8   : > { %v7342_v28 = vrot.slane %v3256_v50, %v5639_v33 }
 0x4e9   : > { %v7319_v18 = vpop.permute.xlu0 %3950  ;;  %v7321_v27 = vpop.permute.xlu1 %3244 }
 0x4ea   : > { %v3272_v55 = vcombine.low %v7303_v23, %v7321_v27 }
 0x4eb   : > { %4353 = vrot.lane.b32.xlu0 %v7324_v36, %s5479_s11  ;;  %3633 = vrot.lane.b32.xlu1 %v3539_v6, %s5480_s12 }
 0x4ec   : > { %v7345_v31 = vrot.slane %v3272_v55, %v5639_v33 }
 0x4ed   : > { %v7347_v42 = vpop.permute.xlu0 %3958  ;;  %v7349_v35 = vpop.permute.xlu1 %3954 }
 0x4ee   : > { %v3974_v41 = vcombine.low %v7319_v18, %v7347_v42 }
 0x4ef   : > { %3609 = vrot.lane.b32.xlu0 %v3536_v45, %s5476_s8  ;;  %3637 = vrot.lane.b32.xlu1 %v3604_v1, %s5476_s8 }
 0x4f0   : > { %v7380_v8 = vrot.slane %v3974_v41, %v5639_v33 }
 0x4f1   : > { %v7367_v53 = vpop.permute.xlu0 %3702  ;;  %v7369_v3 = vpop.permute.xlu1 %3962 }
 0x4f2   : > { %v3990_v58 = vcombine.low %v7349_v35, %v7369_v3 }
 0x4f3   : > { %2891 = vrot.lane.b32.xlu0 %v2818_v4, %s5476_s8  ;;  %3645 = vrot.lane.b32.xlu1 %v3605_v25, %s5477_s9 }
 0x4f4   : > { %v7383_v29 = vrot.slane %v3990_v58, %v5639_v33  ;;  %v4296_v58 = vcombine.low %v7262_v61, %v7252_v7  ;;  %v2854_v61 = vcombine.low %v7163_v52, %v7157_v40  ;;  %v2821_v40 = vcombine.high %v7241_v24, %v8660_v49 }
 0x4f5   : > { %v7385_v14 = vpop.permute.xlu0 %3710  ;;  %v7387_v59 = vpop.permute.xlu1 %3706 }
 0x4f6   : > { %v3726_v50 = vcombine.low %v7367_v53, %v7385_v14  ;;  %v7442_v7 = vrot.slane %v4296_v58, %v5739_v63  ;;  %v4228_v58 = vcombine.low %v7228_v12, %v7216_v10  ;;  %v4007_v17 = vcombine.high %v7380_v8, %v7383_v29 }
 0x4f7   : > { %3617 = vrot.lane.b32.xlu0 %v3537_v57, %s5477_s9  ;;  %2927 = vrot.lane.b32.xlu1 %v2887_v54, %s5477_s9  ;;  %v4329_v57 = vcombine.high %v7295_v9, %v8660_v49 }
 0x4f8   : > { %v7412_v1 = vrot.slane %v3726_v50, %v5639_v33  ;;  %8708 = vst [vmem:[#allocation9_spill] sm:$0xff] %v7442_v7  ;;  %v4328_v52 = vcombine.high %v7442_v7, %v8660_v49  ;;  %v7484_v12 = vrot.slane %v4228_v58, %v5739_v63 }
 0x4f9   : > { %v7399_v6 = vpop.permute.xlu0 %2980  ;;  %v7401_v55 = vpop.permute.xlu1 %3714 }
 0x4fa   : > { %v3742_v45 = vcombine.low %v7387_v59, %v7401_v55  ;;  %8706 = vst [vmem:[#allocation11_spill] sm:$0xff] %v7412_v1  ;;  %8712 = vst [vmem:[#allocation27_spill] sm:$0xff] %v7484_v12 }
 0x4fb   : > { %2899 = vrot.lane.b32.xlu0 %v2819_v39, %s5477_s9  ;;  %3653 = vrot.lane.b32.xlu1 %v3606_v51, %s5478_s10 }
 0x4fc   : > { %v7415_v41 = vrot.slane %v3742_v45, %v5639_v33 }
 0x4fd   : > { %v7417_v4 = vpop.permute.xlu0 %2988  ;;  %v7419_v25 = vpop.permute.xlu1 %2984 }
 0x4fe   : > { %8707 = vst [vmem:[#allocation13_spill] sm:$0xff] %v7415_v41  ;;  %v3070_v54 = vcombine.low %v7399_v6, %v7417_v4 }
 0x4ff   : > { %3625 = vrot.lane.b32.xlu0 %v3538_v13, %s5478_s10  ;;  %2935 = vrot.lane.b32.xlu1 %v2888_v34, %s5478_s10  ;;  %v7465_v34 = vrot.slane %v2854_v61, %v5739_v63  ;;  %v2889_v61 = vcombine.high %v7277_v22, %v8660_v49  ;;  %v3019_v22 = vcombine.high %v7269_v38, %v7289_v30 }
 0x500   : > { %v7451_v45 = vrot.slane %v3070_v54, %v5639_v33 }
 0x501   : > { %v7433_v50 = vpop.permute.xlu0 %3234  ;;  %v7435_v39 = vpop.permute.xlu1 %2992  ;;  %8711 = vst [vmem:[#allocation28_spill] sm:$0xff] %v7465_v34  ;;  %v2886_v10 = vcombine.high %v7465_v34, %v8660_v49  ;;  %v3033_v9 = vrot.slane %v3019_v22, %v5639_v33 }
 0x502   : > { %v3086_v51 = vcombine.low %v7419_v25, %v7435_v39  ;;  %8709 = vst [vmem:[#allocation10_spill] sm:$0xff] %v7451_v45  ;;  %v3087_v32 = vcombine.high %v7419_v25, %v7435_v39 }
 0x503   : > { %2907 = vrot.lane.b32.xlu0 %v2820_v16, %s5478_s10  ;;  %3661 = vrot.lane.b32.xlu1 %v3607_v5, %s5480_s12 }
 0x504   : > { %v7454_v26 = vrot.slane %v3086_v51, %v5639_v33 }
 0x505   : > { %v7456_v15 = vpop.permute.xlu0 %3242  ;;  %v7458_v13 = vpop.permute.xlu1 %3238 }
 0x506   : > { %8710 = vst [vmem:[#allocation17_spill] sm:$0xff] %v7454_v26  ;;  %v3324_v16 = vcombine.low %v7433_v50, %v7456_v15 }
 0x507   : > { %2915 = vrot.lane.b32.xlu0 %v2821_v40, %s5480_s12  ;;  %4361 = vrot.lane.b32.xlu1 %v4328_v52, %s5476_s8 }
 0x508   : > { %v7491_v40 = vrot.slane %v3324_v16, %v5639_v33  ;;  %v4330_v16 = vcombine.high %v7309_v2, %v8660_v49 }
 0x509   : > { %v7475_v24 = vpop.permute.xlu0 %3952  ;;  %v7477_v5 = vpop.permute.xlu1 %3246 }
 0x50a   : > { %v3340_v51 = vcombine.low %v7458_v13, %v7477_v5  ;;  %8713 = vst [vmem:[#allocation25_spill] sm:$0xff] %v7491_v40 }
 0x50b   : > { %2943 = vrot.lane.b32.xlu1 %v2889_v61, %s5480_s12  ;;  %2919 = vrot.lane.b32.xlu0 %v2886_v10, %s5476_s8  ;;  %v4260_v61 = vcombine.high %v7484_v12, %v8660_v49  ;;  %v3003_v10 = vcombine.high %v7245_v43, %v7271_v37 }
 0x50c   : > { %v7494_v52 = vrot.slane %v3340_v51, %v5639_v33  ;;  %v3018_v51 = vcombine.low %v7269_v38, %v7289_v30 }
 0x50d   : > { %v7498_v54 = vpop.permute.xlu0 %3960  ;;  %v7500_v58 = vpop.permute.xlu1 %3956  ;;  %v3017_v30 = vrot.slane %v3003_v10, %v5639_v33  ;;  %v4262_v10 = vcombine.high %v7292_v46, %v8660_v49  ;;  %v3273_v46 = vcombine.high %v7303_v23, %v7321_v27 }
 0x50e   : > { %8714 = vst [vmem:[#allocation26_spill] sm:$0xff] %v7494_v52  ;;  %v4042_v60 = vcombine.low %v7475_v24, %v7498_v54  ;;  %v7533_v22 = vrot.slane %v3018_v51, %v5639_v33 }
 0x50f   : > { %4369 = vrot.lane.b32.xlu1 %v4329_v57, %s5477_s9  ;;  %4333 = vrot.lane.b32.xlu0 %v4260_v61, %s5476_s8  ;;  %v4261_v57 = vcombine.high %v7267_v56, %v8660_v49  ;;  %v3002_v61 = vcombine.low %v7245_v43, %v7271_v37  ;;  %v3050_v20 = vcombine.low %v3017_v30, %v3033_v9 }
 0x510   : > { %v7536_v2 = vrot.slane %v4042_v60, %v5639_v33  ;;  %v3051_v23 = vcombine.high %v3017_v30, %v3033_v9  ;;  %v3287_v12 = vrot.slane %v3273_v46, %v5639_v33 }
 0x511   : > { %v7517_v44 = vpop.permute.xlu0 %4422  ;;  %v7519_v11 = vpop.permute.xlu1 %3964  ;;  %v7550_v51 = vrot.slane %v3002_v61, %v5639_v33 }
 0x512   : > { %v4058_v38 = vcombine.low %v7500_v58, %v7519_v11  ;;  %8715 = vst [vmem:[#allocation23_spill] sm:$0xff] %v7536_v2  ;;  %v7613_v39 = vrot.slane %v3051_v23, %v5739_v63 }
 0x513   : > { %4377 = vrot.lane.b32.xlu1 %v4330_v16, %s5478_s10  ;;  %4341 = vrot.lane.b32.xlu0 %v4261_v57, %s5477_s9  ;;  %v4263_v16 = vcombine.high %v7324_v36, %v8660_v49  ;;  %v3035_v57 = vcombine.high %v7550_v51, %v7533_v22  ;;  %v3289_v36 = vcombine.high %v7342_v28, %v7345_v31 }
 0x514   : > { %v7539_v56 = vrot.slane %v4058_v38, %v5639_v33  ;;  %8717 = vst [vmem:[#allocation24_spill] sm:$0xff] %v7613_v39 }
 0x515   : > { %v7541_v43 = vpop.permute.xlu0 %4430  ;;  %v7543_v37 = vpop.permute.xlu1 %4426  ;;  %v7599_v30 = vrot.slane %v3289_v36, %v5739_v63  ;;  %v3101_v36 = vrot.slane %v3087_v32, %v5639_v33  ;;  %v3991_v32 = vcombine.high %v7349_v35, %v7369_v3  ;;  %v3975_v35 = vcombine.high %v7319_v18, %v7347_v42 }
 0x516   : > { %8716 = vst [vmem:[#allocation22_spill] sm:$0xff] %v7539_v56  ;;  %v4512_v38 = vcombine.low %v7517_v44, %v7541_v43  ;;  %v3759_v18 = vcombine.high %v7412_v1, %v7415_v41  ;;  %v3341_v42 = vcombine.high %v7458_v13, %v7477_v5  ;;  %v3727_v3 = vcombine.high %v7367_v53, %v7385_v14 }
 0x517   : > { %4349 = vrot.lane.b32.xlu1 %v4262_v10, %s5478_s10  ;;  %4357 = vrot.lane.b32.xlu0 %v4263_v16, %s5480_s12  ;;  %v4331_v10 = vcombine.high %v7306_v21, %v8660_v49  ;;  %v7571_v16 = vrot.slane %v3050_v20, %v5739_v63  ;;  %v7587_v20 = vrot.slane %v3035_v57, %v5739_v63 }
 0x518   : > { %v7581_v27 = vrot.slane %v4512_v38, %v5639_v33  ;;  %v3271_v57 = vrot.slane %v3257_v0, %v5639_v33  ;;  %v3071_v38 = vcombine.high %v7399_v6, %v7417_v4  ;;  %v3103_v0 = vcombine.high %v7451_v45, %v7454_v26 }
 0x519   : > { %v7564_v61 = vpop.permute.xlu0 %4420  ;;  %v7566_v62 = vpop.permute.xlu1 %4434  ;;  %v7623_v4 = vrot.slane %v4007_v17, %v5739_v63  ;;  %v3325_v13 = vcombine.high %v7433_v50, %v7456_v15  ;;  %v7698_v53 = vrot.slane %v3341_v42, %v5639_v33  ;;  %v7705_v15 = vrot.slane %v3759_v18, %v5739_v63 }
 0x51a   : > { %v4528_v60 = vcombine.low %v7543_v37, %v7566_v62  ;;  %v3304_v46 = vcombine.low %v3271_v57, %v3287_v12  ;;  %v3085_v34 = vrot.slane %v3071_v38, %v5639_v33  ;;  %v3305_v23 = vcombine.high %v3271_v57, %v3287_v12 }
 0x51b   : > { %4385 = vrot.lane.b32.xlu1 %v4331_v10, %s5480_s12  ;;  %3151 = vrot.lane.b32.xlu0 %v7571_v16, %s5475_s7  ;;  %8718 = vst [vmem:[#allocation29_spill] sm:$0xff] %v7623_v4  ;;  %v3743_v12 = vcombine.high %v7387_v59, %v7401_v55  ;;  %v3989_v55 = vrot.slane %v3975_v35, %v5639_v33  ;;  %8724 = vst [vmem:[#allocation15_spill] sm:$0xff] %v7705_v15 }
 0x51c   : > { %v7584_v21 = vrot.slane %v4528_v60, %v5639_v33  ;;  %v3118_v45 = vcombine.low %v3085_v34, %v3101_v36  ;;  %v3119_v41 = vcombine.high %v3085_v34, %v3101_v36  ;;  %v7714_v34 = vrot.slane %v3325_v13, %v5639_v33 }
 0x51d   : > { %v7594_v10 = vpop.permute.xlu0 %4428  ;;  %v7596_v9 = vpop.permute.xlu1 %4424 }
 0x51e   : > { %v4444_v25 = vcombine.low %v7564_v61, %v7594_v10  ;;  %v7677_v59 = vrot.slane %v3118_v45, %v5739_v63  ;;  %v3757_v45 = vrot.slane %v3743_v12, %v5639_v33  ;;  %v3372_v42 = vcombine.low %v7714_v34, %v7698_v53 }
 0x51f   : > { %3143 = vrot.lane.b32.xlu1 %v7587_v20, %s5474_s6  ;;  %3397 = vrot.lane.b32.xlu0 %v7599_v30, %s5474_s6  ;;  %v7732_v13 = vrot.slane %v3119_v41, %v5739_v63  ;;  %v4075_v41 = vcombine.high %v7536_v2, %v7539_v56 }
 0x520   : > { %v7635_v26 = vrot.slane %v4444_v25, %v5639_v33  ;;  %v7664_v25 = vrot.slane %v3305_v23, %v5739_v63  ;;  %8721 = vst [vmem:[#allocation33_spill] sm:$0xff] %v7677_v59 }
 0x521   : > { %v7618_v60 = vpop.permute.xlu0 %3704  ;;  %v7620_v6 = vpop.permute.xlu1 %4432  ;;  %8727 = vst [vmem:[#allocation35_spill] sm:$0xff] %v7732_v13 }
 0x522   : > { %v4460_v7 = vcombine.low %v7596_v9, %v7620_v6  ;;  %v4461_v56 = vcombine.high %v7596_v9, %v7620_v6  ;;  %v4445_v6 = vcombine.high %v7564_v61, %v7594_v10 }
 0x523   : > { %3159 = vrot.lane.b32.xlu0 %v7613_v39, %s5479_s11  ;;  %4115 = vrot.lane.b32.xlu1 %v7623_v4, %s5474_s6  ;;  %v7645_v39 = vrot.slane %v3304_v46, %v5739_v63  ;;  %v7648_v4 = vrot.slane %v3103_v0, %v5739_v63  ;;  %v3357_v46 = vcombine.high %v7491_v40, %v7494_v52 }
 0x524   : > { %v7638_v17 = vrot.slane %v4460_v7, %v5639_v33  ;;  %v4005_v7 = vrot.slane %v3991_v32, %v5639_v33 }
 0x525   : > { %v7640_v19 = vpop.permute.xlu0 %3712  ;;  %v7642_v38 = vpop.permute.xlu1 %3708  ;;  %8720 = vst [vmem:[#allocation30_spill] sm:$0xff] %v7648_v4 }
 0x526   : > { %8719 = vst [vmem:[#allocation14_spill] sm:$0xff] %v7638_v17  ;;  %v3794_v57 = vcombine.low %v7618_v60, %v7640_v19  ;;  %v4022_v5 = vcombine.low %v3989_v55, %v4005_v7 }
 0x527   : > { %3405 = vrot.lane.b32.xlu0 %v7645_v39, %s5475_s7  ;;  %3171 = vrot.lane.b32.xlu1 %v7648_v4, %s5474_s6 }
 0x528   : > { %v7692_v35 = vrot.slane %v3794_v57, %v5639_v33  ;;  %v3741_v57 = vrot.slane %v3727_v3, %v5639_v33  ;;  %v7729_v3 = vrot.slane %v4022_v5, %v5739_v63  ;;  %v4023_v5 = vcombine.high %v3989_v55, %v4005_v7 }
 0x529   : > { %v7672_v0 = vpop.permute.xlu0 %4676  ;;  %v7674_v32 = vpop.permute.xlu1 %3716  ;;  %v4059_v7 = vcombine.high %v7500_v58, %v7519_v11 }
 0x52a   : > { %v3810_v23 = vcombine.low %v7642_v38, %v7674_v32  ;;  %8722 = vst [vmem:[#allocation32_spill] sm:$0xff] %v7692_v35  ;;  %v3774_v18 = vcombine.low %v3741_v57, %v3757_v45  ;;  %8726 = vst [vmem:[#allocation34_spill] sm:$0xff] %v7729_v3 }
 0x52b   : > { %3413 = vrot.lane.b32.xlu0 %v7664_v25, %s5479_s11  ;;  %3179 = vrot.lane.b32.xlu1 %v7677_v59, %s5475_s7  ;;  %v7708_v59 = vrot.slane %v3357_v46, %v5739_v63 }
 0x52c   : > { %v7695_v4 = vrot.slane %v3810_v23, %v5639_v33  ;;  %v7753_v40 = vrot.slane %v3774_v18, %v5739_v63 }
 0x52d   : > { %v7700_v14 = vpop.permute.xlu0 %4684  ;;  %v7702_v50 = vpop.permute.xlu1 %4680  ;;  %8725 = vst [vmem:[#allocation16_spill] sm:$0xff] %v7708_v59 }
 0x52e   : > { %8723 = vst [vmem:[#allocation31_spill] sm:$0xff] %v7695_v4  ;;  %v4766_v36 = vcombine.low %v7672_v0, %v7700_v14 }
 0x52f   : > { %3867 = vrot.lane.b32.xlu0 %v7705_v15, %s5474_s6  ;;  %3425 = vrot.lane.b32.xlu1 %v7708_v59, %s5474_s6 }
 0x530   : > { %v7741_v15 = vrot.slane %v4766_v36, %v5639_v33  ;;  %v4043_v36 = vcombine.high %v7475_v24, %v7498_v54 }
 0x531   : > { %v7724_v46 = vpop.permute.xlu0 %4674  ;;  %v7726_v23 = vpop.permute.xlu1 %4688 }
 0x532   : > { %v4782_v12 = vcombine.low %v7702_v50, %v7726_v23  ;;  %8728 = vst [vmem:[#allocation36_spill] sm:$0xff] %v7741_v15 }
 0x533   : > { %4123 = vrot.lane.b32.xlu0 %v7729_v3, %s5475_s7  ;;  %3187 = vrot.lane.b32.xlu1 %v7732_v13, %s5479_s11  ;;  %v7756_v3 = vrot.slane %v3372_v42, %v5739_v63  ;;  %v3775_v13 = vcombine.high %v3741_v57, %v3757_v45  ;;  %v7775_v45 = vrot.slane %v4023_v5, %v5739_v63 }
 0x534   : > { %v7744_v59 = vrot.slane %v4782_v12, %v5639_v33  ;;  %v4545_v12 = vcombine.high %v7581_v27, %v7584_v21  ;;  %v7778_v57 = vrot.slane %v4075_v41, %v5739_v63  ;;  %v7792_v5 = vrot.slane %v4059_v7, %v5639_v33 }
 0x535   : > { %v7748_v1 = vpop.permute.xlu0 %4682  ;;  %v7750_v52 = vpop.permute.xlu1 %4678  ;;  %v7789_v58 = vrot.slane %v3775_v13, %v5739_v63  ;;  %v4529_v41 = vcombine.high %v7543_v37, %v7566_v62  ;;  %v3827_v13 = vcombine.high %v7692_v35, %v7695_v4  ;;  %v4057_v37 = vrot.slane %v4043_v36, %v5639_v33 }
 0x536   : > { %8729 = vst [vmem:[#allocation37_spill] sm:$0xff] %v7744_v59  ;;  %v4698_v55 = vcombine.low %v7724_v46, %v7748_v1  ;;  %8730 = vst [vmem:[#allocation38_spill] sm:$0xff] %v7778_v57  ;;  %v7813_v62 = vrot.slane %v4545_v12, %v5739_v63  ;;  %v3373_v12 = vcombine.high %v7714_v34, %v7698_v53 }
 0x537   : > { %3875 = vrot.lane.b32.xlu0 %v7753_v40, %s5475_s7  ;;  %3433 = vrot.lane.b32.xlu1 %v7756_v3, %s5475_s7  ;;  %v4090_v36 = vcombine.low %v4057_v37, %v7792_v5  ;;  %v7841_v4 = vrot.slane %v3827_v13, %v5739_v63  ;;  %v4459_v34 = vrot.slane %v4445_v6, %v5639_v33 }
 0x538   : > { %v7797_v54 = vrot.slane %v4698_v55, %v5639_v33  ;;  %v4513_v55 = vcombine.high %v7517_v44, %v7541_v43  ;;  %v4475_v44 = vrot.slane %v4461_v56, %v5639_v33  ;;  %v3811_v43 = vcombine.high %v7642_v38, %v7674_v32 }
 0x539   : > { %v7770_v18 = vpop.permute.xlu0 %3613  ;;  %v7772_v42 = vpop.permute.xlu1 %4686  ;;  %v3795_v56 = vcombine.high %v7618_v60, %v7640_v19  ;;  %v7860_v6 = vrot.slane %v4090_v36, %v5739_v63 }
 0x53a   : > { %v4714_v11 = vcombine.low %v7750_v52, %v7772_v42  ;;  %v4527_v53 = vrot.slane %v4513_v55, %v5639_v33  ;;  %v4492_v32 = vcombine.low %v4459_v34, %v4475_v44  ;;  %v7857_v55 = vrot.slane %v3373_v12, %v5739_v63 }
 0x53b   : > { %4131 = vrot.lane.b32.xlu0 %v7775_v45, %s5479_s11  ;;  %4143 = vrot.lane.b32.xlu1 %v7778_v57, %s5474_s6  ;;  %v4477_v57 = vcombine.high %v7635_v26, %v7638_v17  ;;  %v3809_v19 = vrot.slane %v3795_v56, %v5639_v33  ;;  %v4783_v12 = vcombine.high %v7702_v50, %v7726_v23 }
 0x53c   : > { %v7800_v24 = vrot.slane %v4714_v11, %v5639_v33  ;;  %v4543_v11 = vrot.slane %v4529_v41, %v5639_v33  ;;  %v7877_v56 = vrot.slane %v4492_v32, %v5739_v63  ;;  %v4767_v17 = vcombine.high %v7672_v0, %v7700_v14 }
 0x53d   : > { %v7808_v7 = vpop.permute.xlu0 %2895  ;;  %v7810_v2 = vpop.permute.xlu1 %3641  ;;  %v7838_v10 = vrot.slane %v4477_v57, %v5739_v63  ;;  %v3825_v57 = vrot.slane %v3811_v43, %v5639_v33  ;;  %v4493_v43 = vcombine.high %v4459_v34, %v4475_v44  ;;  %v4091_v44 = vcombine.high %v4057_v37, %v7792_v5 }
 0x53e   : > { %v4560_v38 = vcombine.low %v4527_v53, %v4543_v11  ;;  %8732 = vst [vmem:[#allocation40_spill] sm:$0xff] %v7877_v56  ;;  %v4797_v50 = vrot.slane %v4783_v12, %v5639_v33  ;;  %v4799_v23 = vcombine.high %v7741_v15, %v7744_v59  ;;  %v4781_v14 = vrot.slane %v4767_v17, %v5639_v33 }
 0x53f   : > { %3883 = vrot.lane.b32.xlu0 %v7789_v58, %s5479_s11  ;;  %4613 = vrot.lane.b32.xlu1 %v7813_v62, %s5474_s6  ;;  %8731 = vst [vmem:[#allocation39_spill] sm:$0xff] %v7838_v10  ;;  %v7894_v32 = vrot.slane %v4493_v43, %v5739_v63  ;;  %v4561_v5 = vcombine.high %v4527_v53, %v4543_v11 }
 0x540   : > { %v7868_v60 = vrot.slane %v4560_v38, %v5739_v63  ;;  %v4814_v37 = vcombine.low %v4781_v14, %v4797_v50  ;;  %v7909_v43 = vrot.slane %v4091_v44, %v5739_v63  ;;  %v3034_v17 = vcombine.low %v7550_v51, %v7533_v22 }
 0x541   : > { %v7833_v9 = vpop.permute.xlu0 %3621  ;;  %v7835_v61 = vpop.permute.xlu1 %2923  ;;  %8733 = vst [vmem:[#allocation41_spill] sm:$0xff] %v7894_v32  ;;  %v7921_v11 = vrot.slane %v4561_v5, %v5739_v63  ;;  %v3843_v53 = vcombine.high %v3809_v19, %v3825_v57  ;;  %v4815_v15 = vcombine.high %v4781_v14, %v4797_v50  ;;  %v4715_v44 = vcombine.high %v7750_v52, %v7772_v42 }
 0x542   : > { %v7939_v22 = vrot.slane %v3034_v17, %v5739_v63  ;;  %v4731_v51 = vcombine.high %v7797_v54, %v7800_v24 }
 0x543   : > { %4585 = vrot.lane.b32.xlu0 %v7838_v10, %s5474_s6  ;;  %3895 = vrot.lane.b32.xlu1 %v7841_v4, %s5474_s6  ;;  %v3842_v10 = vcombine.low %v3809_v19, %v3825_v57  ;;  %v4729_v52 = vrot.slane %v4715_v44, %v5639_v33  ;;  %v3067_v44 = vcombine.high %v7587_v20, %v8660_v49 }
 0x544   : > { %8735 = vst [vmem:[#allocation43_spill] sm:$0xff] %v7939_v22  ;;  %v7964_v17 = vrot.slane %v4731_v51, %v5739_v63 }
 0x545   : > { %v7852_v41 = vpop.permute.xlu0 %2903  ;;  %v7854_v13 = vpop.permute.xlu1 %3649  ;;  %v7897_v0 = vrot.slane %v3842_v10, %v5739_v63  ;;  %v7912_v10 = vrot.slane %v4799_v23, %v5739_v63 }
 0x547   : > { %3441 = vrot.lane.b32.xlu0 %v7857_v55, %s5479_s11  ;;  %4151 = vrot.lane.b32.xlu1 %v7860_v6, %s5475_s7  ;;  %8734 = vst [vmem:[#allocation42_spill] sm:$0xff] %v7912_v10 }
 0x549   : > { %v7872_v35 = vpop.permute.xlu0 %3629  ;;  %v7874_v36 = vpop.permute.xlu1 %2931 }
 0x54b   : > { %4593 = vrot.lane.b32.xlu0 %v7877_v56, %s5475_s7  ;;  %4621 = vrot.lane.b32.xlu1 %v7868_v60, %s5475_s7  ;;  %v7930_v56 = vrot.slane %v4814_v37, %v5739_v63  ;;  %v3066_v37 = vcombine.high %v7939_v22, %v8660_v49  ;;  %v8736_v22 = vcombine.low %v7342_v28, %v7345_v31 }
 0x54d   : > { %v7889_v34 = vpop.permute.xlu0 %2911  ;;  %v7891_v38 = vpop.permute.xlu1 %3657  ;;  %v7978_v51 = vrot.slane %v8736_v22, %v5739_v63  ;;  %v3068_v22 = vcombine.high %v7571_v16, %v8660_v49 }
 0x54f   : > { %4601 = vrot.lane.b32.xlu0 %v7894_v32, %s5479_s11  ;;  %3903 = vrot.lane.b32.xlu1 %v7897_v0, %s5475_s7  ;;  %8737 = vst [vmem:[#allocation44_spill] sm:$0xff] %v7978_v51 }
 0x551   : > { %v7904_v12 = vpop.permute.xlu0 %4337  ;;  %v7906_v59 = vpop.permute.xlu1 %2939 }
 0x553   : > { %4159 = vrot.lane.b32.xlu1 %v7909_v43, %s5479_s11  ;;  %4867 = vrot.lane.b32.xlu0 %v7912_v10, %s5474_s6  ;;  %v4699_v10 = vcombine.high %v7724_v46, %v7748_v1  ;;  %v7949_v1 = vrot.slane %v3843_v53, %v5739_v63  ;;  %v7952_v46 = vrot.slane %v4815_v15, %v5739_v63 }
 0x555   : > { %v7925_v32 = vpop.permute.xlu0 %4345  ;;  %v7927_v23 = vpop.permute.xlu1 %4365  ;;  %v4713_v19 = vrot.slane %v4699_v10, %v5639_v33 }
 0x557   : > { %4629 = vrot.lane.b32.xlu1 %v7921_v11, %s5479_s11  ;;  %4875 = vrot.lane.b32.xlu0 %v7930_v56, %s5475_s7  ;;  %v4746_v50 = vcombine.low %v4713_v19, %v4729_v52  ;;  %v4747_v15 = vcombine.high %v4713_v19, %v4729_v52 }
 0x559   : > { %v7944_v42 = vpop.permute.xlu0 %4381  ;;  %v7946_v57 = vpop.permute.xlu1 %4373  ;;  %v7972_v33 = vrot.slane %v4746_v50, %v5739_v63  ;;  %v7986_v20 = vrot.slane %v4747_v15, %v5739_v63  ;;  %v3322_v50 = vcombine.high %v7645_v39, %v8660_v49 }
 0x55b   : > { %3911 = vrot.lane.b32.xlu1 %v7949_v1, %s5479_s11  ;;  %4883 = vrot.lane.b32.xlu0 %v7952_v46, %s5479_s11 }
 0x55d   : > { %v7959_v14 = vpop.permute.xlu0 %4353  ;;  %v3634_v5 = vpop.permute.xlu1 %3633 }
 0x55f   : > { %3139 = vrot.lane.b32.xlu0 %v3066_v37, %s5476_s8  ;;  %4839 = vrot.lane.b32.xlu1 %v7964_v17, %s5474_s6  ;;  %v3320_v37 = vcombine.high %v7978_v51, %v8660_v49 }
 0x561   : > { %v3610_v10 = vpop.permute.xlu0 %3609  ;;  %v3638_v53 = vpop.permute.xlu1 %3637 }
 0x562   : > { %v3671_v15 = vsel %vm441_vm3, %v7334_v48, %v3638_v53  ;;  %v3321_v48 = vcombine.high %v7599_v30, %v8660_v49  ;;  %v3323_v53 = vcombine.high %v7664_v25, %v8660_v49  ;;  %v3793_v30 = vcombine.high %v7789_v58, %v8660_v49 }
 0x563   : > { %3147 = vrot.lane.b32.xlu0 %v3067_v44, %s5477_s9  ;;  %4847 = vrot.lane.b32.xlu1 %v7972_v33, %s5475_s7  ;;  %v3664_v44 = vsel %vm441_vm3, %v7331_v47, %v3610_v10  ;;  %v3672_v16 = vsel %vm443_vm5, %v3671_v15, %v7810_v2  ;;  %v8741_v15 = vld [vmem:[#allocation26_spill] sm:$0xff] }
 0x564   : > { %v3665_v39 = vsel %vm443_vm5, %v3664_v44, %v7770_v18  ;;  %v8740_v44 = vld [vmem:[#allocation25_spill] sm:$0xff] }
 0x565   : > { %v2892_v52 = vpop.permute.xlu0 %2891  ;;  %v3646_v19 = vpop.permute.xlu1 %3645 }
 0x567   : > { %3393 = vrot.lane.b32.xlu0 %v3320_v37, %s5476_s8  ;;  %4855 = vrot.lane.b32.xlu1 %v7986_v20, %s5479_s11  ;;  %v8738_v37 = vcombine.low %v7380_v8, %v7383_v29  ;;  %v3673_v8 = vsel %vm445_vm4, %v3672_v16, %v3646_v19 }
 0x568   : > { %v3674_v18 = vsel %vm447_vm6, %v3673_v8, %v7854_v13 }
 0x569   : > { %v3618_v28 = vpop.permute.xlu0 %3617  ;;  %v7991_v31 = vpop.permute.xlu1 %2927  ;;  %v8007_v51 = vrot.slane %v8738_v37, %v5739_v63  ;;  %v8742_v37 = vcombine.low %v8740_v44, %v8741_v15  ;;  %v8747_v15 = vld [vmem:[#allocation33_spill] sm:$0xff] }
 0x56a   : > { %v3666_v29 = vsel %vm445_vm4, %v3665_v39, %v3618_v28 }
 0x56b   : > { %3155 = vrot.lane.b32.xlu0 %v3068_v22, %s5478_s10  ;;  %3409 = vrot.lane.b32.xlu1 %v3322_v50, %s5478_s10  ;;  %v8739_v22 = vld [vmem:[#allocation12_spill] sm:$0xff]  ;;  %v4038_v2 = vcombine.high %v8007_v51, %v8660_v49  ;;  %v8037_v16 = vrot.slane %v8742_v37, %v5739_v63  ;;  %v3136_v37 = vcombine.high %v8747_v15, %v8660_v49  ;;  %v8755_v15 = vld [vmem:[#allocation34_spill] sm:$0xff] }
 0x56c   : > { %v2946_v50 = vsel %vm441_vm3, %v8739_v22, %v2892_v52  ;;  %v3667_v52 = vsel %vm447_vm6, %v3666_v29, %v7833_v9  ;;  %v8744_v22 = vld [vmem:[#allocation11_spill] sm:$0xff] }
 0x56d   : > { %v2900_v47 = vpop.permute.xlu0 %2899  ;;  %v3654_v10 = vpop.permute.xlu1 %3653  ;;  %v2947_v25 = vsel %vm443_vm5, %v2946_v50, %v7808_v7  ;;  %v8745_v50 = vld [vmem:[#allocation13_spill] sm:$0xff] }
 0x56e   : > { %v2948_v39 = vsel %vm445_vm4, %v2947_v25, %v2900_v47  ;;  %v3675_v58 = vsel %vm449_vm7, %v3674_v18, %v3654_v10  ;;  %v8746_v47 = vcombine.low %v8744_v22, %v8745_v50  ;;  %v8751_v50 = vld [vmem:[#allocation28_spill] sm:$0xff] }
 0x56f   : > { %3401 = vrot.lane.b32.xlu0 %v3321_v48, %s5477_s9  ;;  %3417 = vrot.lane.b32.xlu1 %v3323_v53, %s5480_s12  ;;  %v8743_v48 = vld [vmem:[#allocation24_spill] sm:$0xff]  ;;  %v2949_v29 = vsel %vm447_vm6, %v2948_v39, %v7852_v41 }
 0x570   : > { %v3069_v53 = vcombine.high %v8743_v48, %v8660_v49  ;;  %v8053_v8 = vrot.slane %v8746_v47, %v5739_v63 }
 0x571   : > { %v3626_v19 = vpop.permute.xlu0 %3625  ;;  %v2936_v28 = vpop.permute.xlu1 %2935 }
 0x572   : > { %v3668_v7 = vsel %vm449_vm7, %v3667_v52, %v3626_v19  ;;  %v3790_v44 = vcombine.high %v8053_v8, %v8660_v49 }
 0x573   : > { %v3669_v13 = vsel %vm451_vm8, %v3668_v7, %v7872_v35  ;;  %4111 = vrot.lane.b32.xlu0 %v4038_v2, %s5476_s8  ;;  %3887 = vrot.lane.b32.xlu1 %v3793_v30, %s5480_s12  ;;  %v3676_v2 = vsel %vm451_vm8, %v3675_v58, %v7891_v38 }
 0x574   : > { %v3670_v9 = vsel %vm453_vm9, %v3669_v13, %v3634_v5  ;;  %v3388_v5 = vcombine.high %v8037_v16, %v8660_v49  ;;  %v8748_v13 = vld [vmem:[#allocation29_spill] sm:$0xff] }
 0x575   : > { %v3680_v10 = vrot.slane %v3670_v9, 4  ;;  %v2908_v35 = vpop.permute.xlu0 %2907  ;;  %v3662_v30 = vpop.permute.xlu1 %3661  ;;  %v8749_v9 = vld [vmem:[#allocation16_spill] sm:$0xff] }
 0x576   : > { %v2950_v25 = vsel %vm449_vm7, %v2949_v29, %v2908_v35  ;;  %v3677_v18 = vsel %vm453_vm9, %v3676_v2, %v3662_v30  ;;  %v3389_v48 = vcombine.high %v8749_v9, %v8660_v49  ;;  %v3792_v9 = vcombine.high %v7753_v40, %v8660_v49 }
 0x577   : > { %3684 = vst [vmem:[#allocation3 + $0x10] sm:$0xf0] %v3680_v10  ;;  %v3681_v52 = vrot.slane %v3677_v18, 4  ;;  %3163 = vrot.lane.b32.xlu0 %v3069_v53, %s5480_s12  ;;  %3421 = vrot.lane.b32.xlu1 %v3388_v5, %s5476_s8  ;;  %v2951_v41 = vsel %vm451_vm8, %v2950_v25, %v7889_v34  ;;  %v4039_v34 = vcombine.high %v8748_v13, %v8660_v49  ;;  %v8753_v25 = vld [vmem:[#allocation9_spill] sm:$0xff] }
 0x578   : > { %v8750_v53 = vcombine.low %v7581_v27, %v7584_v21  ;;  %v8752_v21 = vld [vmem:[#allocation15_spill] sm:$0xff] }
 0x579   : > { %3685 = vst [vmem:[#allocation3 + $0x18] sm:$0xf0] %v3681_v52  ;;  %v2916_v19 = vpop.permute.xlu0 %2915  ;;  %v4362_v38 = vpop.permute.xlu1 %4361  ;;  %v3791_v30 = vcombine.high %v8752_v21, %v8660_v49  ;;  %v8754_v52 = vld [vmem:[#allocation27_spill] sm:$0xff] }
 0x57a   : > { %v2952_v39 = vsel %vm453_vm9, %v2951_v41, %v2916_v19  ;;  %v8082_v22 = vrot.slane %v8750_v53, %v5739_v63 }
 0x57b   : > { %2960 = vst [vmem:[#allocation3] sm:$0xf] %v2952_v39  ;;  %3863 = vrot.lane.b32.xlu0 %v3790_v44, %s5476_s8  ;;  %3183 = vrot.lane.b32.xlu1 %v3136_v37, %s5478_s10  ;;  %v4040_v37 = vcombine.high %v8755_v15, %v8660_v49 }
 0x57c   : > { %v4576_v5 = vcombine.high %v8082_v22, %v8660_v49 }
 0x57d   : > { %v2920_v58 = vpop.permute.xlu0 %2919  ;;  %v2944_v7 = vpop.permute.xlu1 %2943 }
 0x57e   : > { %v2953_v47 = vsel %vm441_vm3, %v8751_v50, %v2920_v58 }
 0x57f   : > { %v2954_v10 = vsel %vm443_vm5, %v2953_v47, %v7835_v61  ;;  %4119 = vrot.lane.b32.xlu0 %v4039_v34, %s5477_s9  ;;  %3429 = vrot.lane.b32.xlu1 %v3389_v48, %s5477_s9  ;;  %v4395_v61 = vsel %vm441_vm3, %v8753_v25, %v4362_v38  ;;  %v3390_v48 = vcombine.high %v7756_v3, %v8660_v49 }
 0x580   : > { %v2955_v29 = vsel %vm445_vm4, %v2954_v10, %v7991_v31  ;;  %v4396_v19 = vsel %vm443_vm5, %v4395_v61, %v7927_v23  ;;  %v4041_v10 = vcombine.high %v7775_v45, %v8660_v49  ;;  %v8760_v61 = vld [vmem:[#allocation30_spill] sm:$0xff] }
 0x581   : > { %v2956_v35 = vsel %vm447_vm6, %v2955_v29, %v7874_v36  ;;  %v4334_v2 = vpop.permute.xlu0 %4333  ;;  %v4370_v27 = vpop.permute.xlu1 %4369  ;;  %v4577_v29 = vcombine.high %v7813_v62, %v8660_v49  ;;  %v3391_v62 = vcombine.high %v7857_v55, %v8660_v49 }
 0x582   : > { %v2957_v18 = vsel %vm449_vm7, %v2956_v35, %v2936_v28  ;;  %v4388_v41 = vsel %vm441_vm3, %v8754_v52, %v4334_v2  ;;  %v4397_v58 = vsel %vm445_vm4, %v4396_v19, %v4370_v27  ;;  %v8758_v35 = vld [vmem:[#allocation17_spill] sm:$0xff]  ;;  %v3859_v52 = vcombine.high %v7841_v4, %v8660_v49 }
 0x583   : > { %v2958_v31 = vsel %vm451_vm8, %v2957_v18, %v7906_v59  ;;  %3871 = vrot.lane.b32.xlu0 %v3791_v30, %s5477_s9  ;;  %4609 = vrot.lane.b32.xlu1 %v4576_v5, %s5476_s8  ;;  %v4389_v38 = vsel %vm443_vm5, %v4388_v41, %v7904_v12  ;;  %v8756_v59 = vld [vmem:[#allocation35_spill] sm:$0xff]  ;;  %v4398_v23 = vsel %vm447_vm6, %v4397_v58, %v7946_v57 }
 0x584   : > { %v2959_v36 = vsel %vm453_vm9, %v2958_v31, %v2944_v7  ;;  %v3137_v39 = vcombine.high %v8756_v59, %v8660_v49  ;;  %v3135_v18 = vcombine.high %v8760_v61, %v8660_v49  ;;  %v8761_v41 = vld [vmem:[#allocation23_spill] sm:$0xff]  ;;  %v8762_v31 = vld [vmem:[#allocation22_spill] sm:$0xff]  ;;  %v4108_v4 = vcombine.high %v7860_v6, %v8660_v49  ;;  %v8774_v61 = vld [vmem:[#allocation37_spill] sm:$0xff] }
 0x585   : > { %2961 = vst [vmem:[#allocation3 + $0x8] sm:$0xf] %v2959_v36  ;;  %v4342_v28 = vpop.permute.xlu0 %4341  ;;  %v4378_v44 = vpop.permute.xlu1 %4377  ;;  %v8763_v36 = vcombine.low %v8761_v41, %v8762_v31  ;;  %v4578_v6 = vcombine.high %v7868_v60, %v8660_v49  ;;  %v3860_v60 = vcombine.high %v7897_v0, %v8660_v49 }
 0x586   : > { %v4390_v13 = vsel %vm445_vm4, %v4389_v38, %v4342_v28  ;;  %v4399_v53 = vsel %vm449_vm7, %v4398_v23, %v4378_v44  ;;  %v8764_v44 = vld [vmem:[#allocation14_spill] sm:$0xff]  ;;  %v8767_v23 = vld [vmem:[#allocation31_spill] sm:$0xff] }
 0x587   : > { %4127 = vrot.lane.b32.xlu0 %v4040_v37, %s5478_s10  ;;  %3191 = vrot.lane.b32.xlu1 %v3137_v39, %s5480_s12  ;;  %v4391_v7 = vsel %vm447_vm6, %v4390_v13, %v7925_v32  ;;  %v4400_v40 = vsel %vm451_vm8, %v4399_v53, %v7944_v42  ;;  %v8174_v19 = vrot.slane %v8763_v36, %v5739_v63  ;;  %v8766_v13 = vld [vmem:[#allocation32_spill] sm:$0xff] }
 0x588   : > { %v8765_v15 = vcombine.low %v7635_v26, %v8764_v44  ;;  %v8768_v26 = vcombine.low %v8766_v13, %v8767_v23  ;;  %v3861_v36 = vcombine.high %v7949_v1, %v8660_v49  ;;  %v4832_v13 = vcombine.high %v7930_v56, %v8660_v49 }
 0x589   : > { %v4358_v12 = vpop.permute.xlu0 %4357  ;;  %v4350_v34 = vpop.permute.xlu1 %4349  ;;  %v4106_v28 = vcombine.high %v8174_v19, %v8660_v49  ;;  %v4763_v23 = vcombine.high %v7964_v17, %v8660_v49 }
 0x58a   : > { %v4392_v50 = vsel %vm449_vm7, %v4391_v7, %v4350_v34  ;;  %v8190_v37 = vrot.slane %v8765_v15, %v5739_v63 }
 0x58b   : > { %v4393_v47 = vsel %vm451_vm8, %v4392_v50, %v7959_v14  ;;  %3879 = vrot.lane.b32.xlu0 %v3792_v9, %s5478_s10  ;;  %3437 = vrot.lane.b32.xlu1 %v3390_v48, %s5478_s10  ;;  %v8757_v14 = vld [vmem:[#allocation10_spill] sm:$0xff] }
 0x58c   : > { %v4394_v32 = vsel %vm453_vm9, %v4393_v47, %v4358_v12  ;;  %v8759_v2 = vcombine.low %v8757_v14, %v8758_v35  ;;  %v4508_v58 = vcombine.high %v8190_v37, %v8660_v49  ;;  %v8206_v12 = vrot.slane %v8768_v26, %v5739_v63  ;;  %v8769_v50 = vld [vmem:[#allocation38_spill] sm:$0xff]  ;;  %v8771_v35 = vld [vmem:[#allocation40_spill] sm:$0xff] }
 0x58d   : > { %4402 = vst [vmem:[#allocation3 + $0x30] sm:$0xf] %v4394_v32  ;;  %v8135_v57 = vpop.permute.xlu0 %3151  ;;  %v4386_v3 = vpop.permute.xlu1 %4385  ;;  %v4107_v47 = vcombine.high %v8769_v50, %v8660_v49  ;;  %v4109_v32 = vcombine.high %v7909_v43, %v8660_v49  ;;  %v4764_v50 = vcombine.high %v7972_v33, %v8660_v49 }
 0x58e   : > { %v8147_v27 = vrot.slane %v8759_v2, %v5739_v63  ;;  %v4401_v21 = vsel %vm453_vm9, %v4400_v40, %v4386_v3  ;;  %v3858_v9 = vcombine.high %v8206_v12, %v8660_v49  ;;  %v8770_v3 = vld [vmem:[#allocation39_spill] sm:$0xff]  ;;  %v4510_v2 = vcombine.high %v8771_v35, %v8660_v49 }
 0x58f   : > { %4403 = vst [vmem:[#allocation3 + $0x38] sm:$0xf] %v4401_v21  ;;  %4135 = vrot.lane.b32.xlu0 %v4041_v10, %s5480_s12  ;;  %4617 = vrot.lane.b32.xlu1 %v4577_v29, %s5477_s9  ;;  %v4509_v10 = vcombine.high %v8770_v3, %v8660_v49  ;;  %v4579_v29 = vcombine.high %v7921_v11, %v8660_v49  ;;  %v8772_v21 = vld [vmem:[#allocation41_spill] sm:$0xff] }
 0x590   : > { %v3134_v45 = vcombine.high %v8147_v27, %v8660_v49 }
 0x591   : > { %v8152_v42 = vpop.permute.xlu0 %3397  ;;  %v8154_v30 = vpop.permute.xlu1 %3143 }
 0x593   : > { %3167 = vrot.lane.b32.xlu0 %v3134_v45, %s5476_s8  ;;  %3445 = vrot.lane.b32.xlu1 %v3391_v62, %s5480_s12  ;;  %v4511_v45 = vcombine.high %v8772_v21, %v8660_v49  ;;  %v8773_v62 = vld [vmem:[#allocation36_spill] sm:$0xff] }
 0x595   : > { %v8162_v5 = vpop.permute.xlu0 %3159  ;;  %v8164_v25 = vpop.permute.xlu1 %4115 }
 0x597   : > { %3175 = vrot.lane.b32.xlu0 %v3135_v18, %s5477_s9  ;;  %3899 = vrot.lane.b32.xlu1 %v3859_v52, %s5477_s9  ;;  %v8775_v18 = vcombine.low %v8773_v62, %v8774_v61 }
 0x599   : > { %v8178_v55 = vpop.permute.xlu0 %3405  ;;  %v8180_v38 = vpop.permute.xlu1 %3171  ;;  %v8252_v52 = vrot.slane %v8775_v18, %v5739_v63  ;;  %v8778_v18 = vld [vmem:[#allocation43_spill] sm:$0xff] }
 0x59b   : > { %4139 = vrot.lane.b32.xlu0 %v4106_v28, %s5476_s8  ;;  %4155 = vrot.lane.b32.xlu1 %v4108_v4, %s5478_s10  ;;  %v4830_v31 = vcombine.high %v8252_v52, %v8660_v49  ;;  %v8776_v28 = vcombine.low %v7797_v54, %v7800_v24 }
 0x59d   : > { %v8194_v59 = vpop.permute.xlu0 %3413  ;;  %v8196_v39 = vpop.permute.xlu1 %3179  ;;  %v8268_v4 = vrot.slane %v8776_v28, %v5739_v63 }
 0x59f   : > { %4581 = vrot.lane.b32.xlu0 %v4508_v58, %s5476_s8  ;;  %4625 = vrot.lane.b32.xlu1 %v4578_v6, %s5478_s10  ;;  %v8777_v58 = vld [vmem:[#allocation42_spill] sm:$0xff]  ;;  %v4762_v1 = vcombine.high %v8268_v4, %v8660_v49 }
 0x5a0   : > { %v4831_v6 = vcombine.high %v8777_v58, %v8660_v49 }
 0x5a1   : > { %v8210_v7 = vpop.permute.xlu0 %3867  ;;  %v8212_v34 = vpop.permute.xlu1 %3425 }
 0x5a3   : > { %3891 = vrot.lane.b32.xlu0 %v3858_v9, %s5476_s8  ;;  %3907 = vrot.lane.b32.xlu1 %v3860_v60, %s5478_s10  ;;  %v4833_v60 = vcombine.high %v7952_v46, %v8660_v49 }
 0x5a5   : > { %v8220_v48 = vpop.permute.xlu0 %4123  ;;  %v8222_v53 = vpop.permute.xlu1 %3187 }
 0x5a7   : > { %4147 = vrot.lane.b32.xlu0 %v4107_v47, %s5477_s9  ;;  %4163 = vrot.lane.b32.xlu1 %v4109_v32, %s5480_s12  ;;  %v4765_v47 = vcombine.high %v7986_v20, %v8660_v49 }
 0x5a9   : > { %v8230_v40 = vpop.permute.xlu0 %3875  ;;  %v8232_v0 = vpop.permute.xlu1 %3433 }
 0x5ab   : > { %4589 = vrot.lane.b32.xlu0 %v4509_v10, %s5477_s9  ;;  %4633 = vrot.lane.b32.xlu1 %v4579_v29, %s5480_s12 }
 0x5ad   : > { %v8240_v14 = vpop.permute.xlu0 %4131  ;;  %v8242_v43 = vpop.permute.xlu1 %4143 }
 0x5af   : > { %4597 = vrot.lane.b32.xlu0 %v4510_v2, %s5478_s10  ;;  %4605 = vrot.lane.b32.xlu1 %v4511_v45, %s5480_s12 }
 0x5b1   : > { %v8256_v11 = vpop.permute.xlu0 %3883  ;;  %v8258_v41 = vpop.permute.xlu1 %4613 }
 0x5b3   : > { %4863 = vrot.lane.b32.xlu0 %v4830_v31, %s5476_s8  ;;  %3915 = vrot.lane.b32.xlu1 %v3861_v36, %s5480_s12  ;;  %v8779_v36 = vld [vmem:[#allocation44_spill] sm:$0xff] }
 0x5b5   : > { %v8272_v44 = vpop.permute.xlu0 %4585  ;;  %v8274_v15 = vpop.permute.xlu1 %3895 }
 0x5b7   : > { %4871 = vrot.lane.b32.xlu0 %v4831_v6, %s5477_s9  ;;  %4835 = vrot.lane.b32.xlu1 %v4762_v1, %s5476_s8 }
 0x5b9   : > { %v8282_v54 = vpop.permute.xlu0 %3441  ;;  %v8284_v24 = vpop.permute.xlu1 %4151 }
 0x5bb   : > { %4879 = vrot.lane.b32.xlu0 %v4832_v13, %s5478_s10  ;;  %4843 = vrot.lane.b32.xlu1 %v4763_v23, %s5477_s9 }
 0x5bd   : > { %v8292_v26 = vpop.permute.xlu0 %4593  ;;  %v8294_v9 = vpop.permute.xlu1 %4621 }
 0x5bf   : > { %4887 = vrot.lane.b32.xlu0 %v4833_v60, %s5480_s12  ;;  %4851 = vrot.lane.b32.xlu1 %v4764_v50, %s5478_s10 }
 0x5c1   : > { %v8302_v56 = vpop.permute.xlu0 %4601  ;;  %v8304_v17 = vpop.permute.xlu1 %3903 }
 0x5c3   : > { %4859 = vrot.lane.b32.xlu1 %v4765_v47, %s5480_s12 }
 0x5c5   : > { %v8309_v32 = vpop.permute.xlu0 %4867  ;;  %v8311_v3 = vpop.permute.xlu1 %4159 }
 0x5c9   : > { %v8313_v46 = vpop.permute.xlu0 %4875  ;;  %v8315_v33 = vpop.permute.xlu1 %4629 }
 0x5cd   : > { %v8317_v10 = vpop.permute.xlu0 %4883  ;;  %v8319_v29 = vpop.permute.xlu1 %3911 }
 0x5d1   : > { %v3140_v35 = vpop.permute.xlu0 %3139  ;;  %v8321_v2 = vpop.permute.xlu1 %4839 }
 0x5d2   : > { %v3194_v31 = vsel %vm441_vm3, %v8778_v18, %v3140_v35 }
 0x5d3   : > { %v3195_v58 = vsel %vm443_vm5, %v3194_v31, %v8154_v30 }
 0x5d5   : > { %v3148_v21 = vpop.permute.xlu0 %3147  ;;  %v8323_v45 = vpop.permute.xlu1 %4847 }
 0x5d6   : > { %v3196_v23 = vsel %vm445_vm4, %v3195_v58, %v3148_v21 }
 0x5d7   : > { %v3197_v35 = vsel %vm447_vm6, %v3196_v23, %v8135_v57 }
 0x5d9   : > { %v3394_v49 = vpop.permute.xlu0 %3393  ;;  %v8325_v20 = vpop.permute.xlu1 %4855 }
 0x5da   : > { %v3448_v28 = vsel %vm441_vm3, %v8779_v36, %v3394_v49 }
 0x5db   : > { %v3449_v6 = vsel %vm443_vm5, %v3448_v28, %v8152_v42 }
 0x5dd   : > { %v3156_v62 = vpop.permute.xlu0 %3155  ;;  %v3410_v61 = vpop.permute.xlu1 %3409 }
 0x5de   : > { %v3198_v42 = vsel %vm449_vm7, %v3197_v35, %v3156_v62 }
 0x5df   : > { %v3199_v36 = vsel %vm451_vm8, %v3198_v42, %v8162_v5 }
 0x5e1   : > { %v3402_v1 = vpop.permute.xlu0 %3401  ;;  %v3418_v13 = vpop.permute.xlu1 %3417 }
 0x5e2   : > { %v3450_v60 = vsel %vm445_vm4, %v3449_v6, %v3402_v1 }
 0x5e3   : > { %v3451_v50 = vsel %vm447_vm6, %v3450_v60, %v8178_v55 }
 0x5e4   : > { %v3452_v47 = vsel %vm449_vm7, %v3451_v50, %v3410_v61 }
 0x5e5   : > { %v3453_v30 = vsel %vm451_vm8, %v3452_v47, %v8194_v59  ;;  %v4112_v49 = vpop.permute.xlu0 %4111  ;;  %v3888_v18 = vpop.permute.xlu1 %3887 }
 0x5e6   : > { %v3454_v31 = vsel %vm453_vm9, %v3453_v30, %v3418_v13  ;;  %v4166_v62 = vsel %vm441_vm3, %v8007_v51, %v4112_v49 }
 0x5e7   : > { %3462 = vst [vmem:[#allocation3 + $0x10] sm:$0xf] %v3454_v31  ;;  %v4167_v5 = vsel %vm443_vm5, %v4166_v62, %v8164_v25 }
 0x5e9   : > { %v3164_v21 = vpop.permute.xlu0 %3163  ;;  %v3422_v55 = vpop.permute.xlu1 %3421 }
 0x5ea   : > { %v3200_v61 = vsel %vm453_vm9, %v3199_v36, %v3164_v21  ;;  %v3455_v35 = vsel %vm441_vm3, %v8037_v16, %v3422_v55 }
 0x5eb   : > { %v3210_v28 = vrot.slane %v3200_v61, 4  ;;  %v3456_v51 = vsel %vm443_vm5, %v3455_v35, %v8212_v34 }
 0x5ed   : > { %3214 = vst [vmem:[#allocation3] sm:$0xf0] %v3210_v28  ;;  %v3864_v57 = vpop.permute.xlu0 %3863  ;;  %v3184_v58 = vpop.permute.xlu1 %3183 }
 0x5ee   : > { %v3918_v13 = vsel %vm441_vm3, %v8053_v8, %v3864_v57 }
 0x5ef   : > { %v3919_v60 = vsel %vm443_vm5, %v3918_v13, %v8210_v7 }
 0x5f1   : > { %v4120_v6 = vpop.permute.xlu0 %4119  ;;  %v3430_v59 = vpop.permute.xlu1 %3429 }
 0x5f2   : > { %v4168_v30 = vsel %vm445_vm4, %v4167_v5, %v4120_v6  ;;  %v3457_v31 = vsel %vm445_vm4, %v3456_v51, %v3430_v59 }
 0x5f3   : > { %v4169_v8 = vsel %vm447_vm6, %v4168_v30, %v8220_v48  ;;  %v3458_v34 = vsel %vm447_vm6, %v3457_v31, %v8232_v0 }
 0x5f5   : > { %v3872_v1 = vpop.permute.xlu0 %3871  ;;  %v4610_v23 = vpop.permute.xlu1 %4609 }
 0x5f6   : > { %v3920_v42 = vsel %vm445_vm4, %v3919_v60, %v3872_v1 }
 0x5f7   : > { %v3921_v25 = vsel %vm447_vm6, %v3920_v42, %v8230_v40 }
 0x5f9   : > { %v4128_v50 = vpop.permute.xlu0 %4127  ;;  %v3192_v47 = vpop.permute.xlu1 %3191 }
 0x5fa   : > { %v4170_v21 = vsel %vm449_vm7, %v4169_v8, %v4128_v50 }
 0x5fb   : > { %v4171_v40 = vsel %vm451_vm8, %v4170_v21, %v8240_v14 }
 0x5fd   : > { %v3880_v49 = vpop.permute.xlu0 %3879  ;;  %v3438_v7 = vpop.permute.xlu1 %3437 }
 0x5fe   : > { %v3922_v16 = vsel %vm449_vm7, %v3921_v25, %v3880_v49  ;;  %v3459_v28 = vsel %vm449_vm7, %v3458_v34, %v3438_v7  ;;  %v4907_v7 = vld [vmem:[#allocation3] sm:$0xff]  ;;  %v4909_v34 = vld [vmem:[#allocation3 + $0x10] sm:$0xff] }
 0x5ff   : > { %v3923_v36 = vsel %vm451_vm8, %v3922_v16, %v8256_v11  ;;  %v3460_v11 = vsel %vm451_vm8, %v3459_v28, %v8282_v54 }
 0x600   : > { %v3924_v55 = vsel %vm453_vm9, %v3923_v36, %v3888_v18 }
 0x601   : > { %3932 = vst [vmem:[#allocation3 + $0x20] sm:$0xf] %v3924_v55  ;;  %v4136_v48 = vpop.permute.xlu0 %4135  ;;  %v4618_v61 = vpop.permute.xlu1 %4617 }
 0x602   : > { %v4172_v57 = vsel %vm453_vm9, %v4171_v40, %v4136_v48  ;;  %v5295_v40 = vpack.c.bf16 %v4909_v34, %v4907_v7  ;;  %v8781_v34 = vld [vmem:[#allocation20_spill] sm:$0xff] }
 0x603   : > { %v4182_v6 = vrot.slane %v4172_v57, 4 }
 0x605   : > { %4186 = vst [vmem:[#allocation3 + $0x20] sm:$0xf0] %v4182_v6  ;;  %v3168_v59 = vpop.permute.xlu0 %3167  ;;  %v3446_v18 = vpop.permute.xlu1 %3445 }
 0x606   : > { %v3201_v1 = vsel %vm441_vm3, %v8147_v27, %v3168_v59  ;;  %v3461_v0 = vsel %vm453_vm9, %v3460_v11, %v3446_v18 }
 0x607   : > { %3463 = vst [vmem:[#allocation3 + $0x18] sm:$0xf] %v3461_v0  ;;  %v3202_v14 = vsel %vm443_vm5, %v3201_v1, %v8180_v38  ;;  %v4643_v38 = vsel %vm441_vm3, %v8082_v22, %v4610_v23 }
 0x608   : > { %v4644_v25 = vsel %vm443_vm5, %v4643_v38, %v8258_v41 }
 0x609   : > { %v3176_v62 = vpop.permute.xlu0 %3175  ;;  %v3900_v13 = vpop.permute.xlu1 %3899 }
 0x60a   : > { %v3203_v5 = vsel %vm445_vm4, %v3202_v14, %v3176_v62 }
 0x60b   : > { %v3204_v60 = vsel %vm447_vm6, %v3203_v5, %v8196_v39 }
 0x60c   : > { %v3205_v50 = vsel %vm449_vm7, %v3204_v60, %v3184_v58  ;;  %v4645_v58 = vsel %vm445_vm4, %v4644_v25, %v4618_v61  ;;  %v4911_v25 = vld [vmem:[#allocation3 + $0x20] sm:$0xff] }
 0x60d   : > { %v3206_v54 = vsel %vm451_vm8, %v3205_v50, %v8222_v53  ;;  %v4140_v35 = vpop.permute.xlu0 %4139  ;;  %v4156_v27 = vpop.permute.xlu1 %4155  ;;  %v4646_v16 = vsel %vm447_vm6, %v4645_v58, %v8294_v9 }
 0x60e   : > { %v3207_v30 = vsel %vm453_vm9, %v3206_v54, %v3192_v47  ;;  %v4173_v53 = vsel %vm441_vm3, %v8174_v19, %v4140_v35  ;;  %v4910_v21 = vld [vmem:[#allocation3 + $0x18] sm:$0xff] }
 0x60f   : > { %v3211_v42 = vrot.slane %v3207_v30, 4  ;;  %v4174_v23 = vsel %vm443_vm5, %v4173_v53, %v8242_v43 }
 0x611   : > { %3215 = vst [vmem:[#allocation3 + $0x8] sm:$0xf0] %v3211_v42  ;;  %v4582_v51 = vpop.permute.xlu0 %4581  ;;  %v4626_v8 = vpop.permute.xlu1 %4625 }
 0x612   : > { %v4636_v19 = vsel %vm441_vm3, %v8190_v37, %v4582_v51 }
 0x613   : > { %v4637_v37 = vsel %vm443_vm5, %v4636_v19, %v8272_v44 }
 0x615   : > { %v3892_v39 = vpop.permute.xlu0 %3891  ;;  %v3908_v49 = vpop.permute.xlu1 %3907 }
 0x616   : > { %v3925_v47 = vsel %vm441_vm3, %v8206_v12, %v3892_v39  ;;  %v4647_v12 = vsel %vm449_vm7, %v4646_v16, %v4626_v8 }
 0x617   : > { %v3926_v22 = vsel %vm443_vm5, %v3925_v47, %v8274_v15  ;;  %v4648_v57 = vsel %vm451_vm8, %v4647_v12, %v8315_v33  ;;  %v8782_v12 = vld [vmem:[#allocation21_spill] sm:$0xff] }
 0x618   : > { %v4908_v31 = vld [vmem:[#allocation3 + $0x8] sm:$0xff]  ;;  %v3927_v15 = vsel %vm445_vm4, %v3926_v22, %v3900_v13 }
 0x619   : > { %v4148_v41 = vpop.permute.xlu0 %4147  ;;  %v4164_v36 = vpop.permute.xlu1 %4163  ;;  %v5293_v55 = vpack.c.bf16 %v4910_v21, %v4908_v31  ;;  %v3928_v18 = vsel %vm447_vm6, %v3927_v15, %v8304_v17 }
 0x61a   : > { %v4175_v48 = vsel %vm445_vm4, %v4174_v23, %v4148_v41  ;;  %v3929_v33 = vsel %vm449_vm7, %v3928_v18, %v3908_v49  ;;  %v8784_v18 = vld [vmem:[#allocation8_spill] sm:$0xff] }
 0x61b   : > { %v4176_v9 = vsel %vm447_vm6, %v4175_v48, %v8284_v24  ;;  %5294 = vmatprep.subr.bf16.mxu1 %v5293_v55  ;;  %v3930_v50 = vsel %vm451_vm8, %v3929_v33, %v8319_v29  ;;  %v8780_v55 = vld [vmem:[#allocation19_spill] sm:$0xff]  ;;  %v8783_v48 = vld [vmem:[#allocation18_spill] sm:$0xff] }
 0x61c   : > { %v4177_v61 = vsel %vm449_vm7, %v4176_v9, %v4156_v27  ;;  %5296 = vmatpush1.bf16.msra.mxu1 %v5295_v40  ;;  %v4997_v19 = vadd.f32 %v8781_v34, %v8780_v55  ;;  %v4998_v40 = vadd.f32 %v8783_v48, %v8782_v12 }
 0x61d   : > { %v4178_v43 = vsel %vm451_vm8, %v4177_v61, %v8311_v3  ;;  %v4590_v28 = vpop.permute.xlu0 %4589  ;;  %v4634_v6 = vpop.permute.xlu1 %4633 }
 0x61e   : > { %v4179_v59 = vsel %vm453_vm9, %v4178_v43, %v4164_v36  ;;  %v4638_v24 = vsel %vm445_vm4, %v4637_v37, %v4590_v28  ;;  %v4649_v11 = vsel %vm453_vm9, %v4648_v57, %v4634_v6 }
 0x61f   : > { %v4183_v1 = vrot.slane %v4179_v59, 4  ;;  %v4653_v0 = vrot.slane %v4649_v11, 4  ;;  %v4639_v44 = vsel %vm447_vm6, %v4638_v24, %v8292_v26 }
 0x621   : > { %4187 = vst [vmem:[#allocation3 + $0x28] sm:$0xf0] %v4183_v1  ;;  %4657 = vst [vmem:[#allocation3 + $0x38] sm:$0xf0] %v4653_v0  ;;  %v4598_v3 = vpop.permute.xlu0 %4597  ;;  %v4606_v62 = vpop.permute.xlu1 %4605 }
 0x622   : > { %v4640_v14 = vsel %vm449_vm7, %v4639_v44, %v4598_v3 }
 0x623   : > { %v4641_v13 = vsel %vm451_vm8, %v4640_v14, %v8302_v56 }
 0x624   : > { %v4642_v5 = vsel %vm453_vm9, %v4641_v13, %v4606_v62 }
 0x625   : > { %v4652_v60 = vrot.slane %v4642_v5, 4  ;;  %v4864_v17 = vpop.permute.xlu0 %4863  ;;  %v3916_v54 = vpop.permute.xlu1 %3915 }
 0x626   : > { %v4897_v26 = vsel %vm441_vm3, %v8252_v52, %v4864_v17  ;;  %v3931_v35 = vsel %vm453_vm9, %v3930_v50, %v3916_v54 }
 0x627   : > { %4656 = vst [vmem:[#allocation3 + $0x30] sm:$0xf0] %v4652_v60  ;;  %3933 = vst [vmem:[#allocation3 + $0x28] sm:$0xf] %v3931_v35  ;;  %v4898_v27 = vsel %vm443_vm5, %v4897_v26, %v8309_v32 }
 0x628   : > { %v4914_v58 = vld [vmem:[#allocation3 + $0x38] sm:$0xff] }
 0x629   : > { %v4872_v30 = vpop.permute.xlu0 %4871  ;;  %v4836_v56 = vpop.permute.xlu1 %4835 }
 0x62a   : > { %v4899_v42 = vsel %vm445_vm4, %v4898_v27, %v4872_v30  ;;  %v4890_v51 = vsel %vm441_vm3, %v8268_v4, %v4836_v56 }
 0x62b   : > { %v4900_v29 = vsel %vm447_vm6, %v4899_v42, %v8313_v46  ;;  %v4891_v52 = vsel %vm443_vm5, %v4890_v51, %v8321_v2 }
 0x62d   : > { %v4880_v8 = vpop.permute.xlu0 %4879  ;;  %v4844_v38 = vpop.permute.xlu1 %4843 }
 0x62e   : > { %v4901_v39 = vsel %vm449_vm7, %v4900_v29, %v4880_v8  ;;  %v4892_v32 = vsel %vm445_vm4, %v4891_v52, %v4844_v38  ;;  %v4912_v49 = vld [vmem:[#allocation3 + $0x28] sm:$0xff]  ;;  %v4913_v53 = vld [vmem:[#allocation3 + $0x30] sm:$0xff] }
 0x62f   : > { %v5297_v47 = vpack.c.bf16 %v4914_v58, %v4912_v49  ;;  %v5299_v7 = vpack.c.bf16 %v4913_v53, %v4911_v25  ;;  %v4902_v4 = vsel %vm451_vm8, %v4901_v39, %v8317_v10  ;;  %v4893_v46 = vsel %vm447_vm6, %v4892_v32, %v8323_v45  ;;  %v4906_v45 = vld [vmem:[%s8573_s1 + $0x8] sm:$0xf] }
 0x631   : > { %v4888_v31 = vpop.permute.xlu0 %4887  ;;  %5298 = vmatprep.subr.bf16.mxu1 %v5297_v47  ;;  %v4852_v2 = vpop.permute.xlu1 %4851 }
 0x632   : > { %v4903_v21 = vsel %vm453_vm9, %v4902_v4, %v4888_v31  ;;  %v4894_v16 = vsel %vm449_vm7, %v4893_v46, %v4852_v2  ;;  %5300 = vmatpush1.bf16.msra.mxu1 %v5299_v7 }
 0x633   : > { %4905 = vst [vmem:[#allocation3 + $0x48] sm:$0xf] %v4903_v21  ;;  %v4895_v22 = vsel %vm451_vm8, %v4894_v16, %v8325_v20 }
 0x635   : > { %v4860_v41 = vpop.permute.xlu1 %4859 }
 0x636   : > { %v4896_v23 = vsel %vm453_vm9, %v4895_v22, %v4860_v41 }
 0x637   : > { %4904 = vst [vmem:[#allocation3 + $0x40] sm:$0xf] %v4896_v23 }
 0x63a   : > { %v4916_v10 = vld [vmem:[#allocation3 + $0x48] sm:$0x1f] }
 0x63b   : > { %5275 = vmatprep.subr.msk.mxu1 %vm2423_vm11, %v4916_v10 }
 0x63e   : > { %v4915_v36 = vld [vmem:[#allocation3 + $0x40] sm:$0x1f] }
 0x63f   : > { %5276 = vmatpush1.msk.msra.mxu1 %vm2423_vm11, %v4915_v36 }
 0x640   : > { %5277 = vmatmul.mubr.msk.f32.vlgmr.msra.gmra.mrb[0].mxu1 %vm2419_vm12, %v4906_v45 }
 0x713   : > { %v4992_v20 = vpop.f32.mrb[0].mxu1 }
 0x714   : > { %v4999_v9 = vadd.f32 %v4997_v19, %v4992_v20  ;;  %v4994_v15 = vpop.f32.mrb[1].mxu1 }
 0x715   : > { %v5000_v61 = vadd.f32 %v4998_v40, %v4994_v15 }
 0x716   : > { %5005 = vrot.lane.b32.xlu1 %v4999_v9, %s5479_s11  ;;  %5002 = vrot.lane.b32.xlu0 %v4999_v9, %s5480_s12 }
 0x71a   : > { %5011 = vrot.lane.b32.xlu1 %v4999_v9, %s5475_s7  ;;  %5008 = vrot.lane.b32.xlu0 %v4999_v9, %s5478_s10 }
 0x71e   : > { %5017 = vrot.lane.b32.xlu1 %v4999_v9, %s5474_s6  ;;  %5014 = vrot.lane.b32.xlu0 %v4999_v9, %s5477_s9 }
 0x722   : > { %5020 = vrot.lane.b32.xlu0 %v4999_v9, %s5476_s8  ;;  %5024 = vrot.lane.b32.xlu1 %v5000_v61, %s5480_s12 }
 0x726   : > { %5027 = vrot.lane.b32.xlu0 %v5000_v61, %s5479_s11  ;;  %5030 = vrot.lane.b32.xlu1 %v5000_v61, %s5478_s10 }
 0x72a   : > { %5033 = vrot.lane.b32.xlu0 %v5000_v61, %s5475_s7  ;;  %5036 = vrot.lane.b32.xlu1 %v5000_v61, %s5477_s9  ;;  %s5404_s7 = scalar_lea.vmem %s8519_s30, 1024 }
 0x72b   : > { %p5405_p11 = scmp.ne.s32.totalorder %s8519_s30, %s5404_s7 }
 0x72d   : > { %p5406_p12 = pnand %p5405_p11, %p5546_p5 }
 0x72e   : > { %5039 = vrot.lane.b32.xlu0 %v5000_v61, %s5474_s6  ;;  %5042 = vrot.lane.b32.xlu1 %v5000_v61, %s5476_s8  ;;  %s8517_s6 = scalar_lea.hbm %s8575_s3, %s5284_s29  ;;  %s5482_s8 = smov [#allocation5]  }
 0x72f   : > { %p5407_p13 = pneg %p5406_p12  ;;  %s5408_s9 = sshll.u32 %s5482_s8, 4  ;;  %s5409_s9 = int_to_ptr.vmem [resolvable:$false] %s5408_s9 }
 0x730   : > { %s5410_s10 = scalar_lea.vmem %s5409_s9, 2048  ;;  %p5411_p0 = scmp.lt.s32.totalorder %s8519_s30, %s5409_s9 }
 0x731   : > { %p5412_p1 = scmp.lt.s32.totalorder %s5410_s10, %s5404_s7 }
 0x733   : > { %p5413_p2 = por %p5412_p1, %p5411_p0 }
 0x735   : > { %p5414_p3 = pnand %p5413_p2, %p5407_p13 }
 0x788   : > { %v5006_v43 = vpop.permute.xlu1 %5005  ;;  %v5003_v37 = vpop.permute.xlu0 %5002 }
 0x789   : > { %v5045_v59 = vcombine.low %v4999_v9, %v5006_v43 }
 0x78b   : > { %v5052_v44 = vrot.slane %v5045_v59, %v8784_v18 }
 0x78c   : > { %v5012_v28 = vpop.permute.xlu1 %5011  ;;  %v5009_v57 = vpop.permute.xlu0 %5008 }
 0x78d   : > { %v5053_v6 = vcombine.low %v5003_v37, %v5009_v57 }
 0x78f   : > { %v5060_v1 = vrot.slane %v5053_v6, %v8784_v18 }
 0x790   : > { %v5018_v24 = vpop.permute.xlu1 %5017  ;;  %v5015_v11 = vpop.permute.xlu0 %5014 }
 0x791   : > { %v5061_v0 = vcombine.low %v5012_v28, %v5018_v24  ;;  %v5077_v14 = vcombine.low %v5052_v44, %v5060_v1  ;;  %v5078_v13 = vcombine.high %v5052_v44, %v5060_v1 }
 0x793   : > { %v5068_v5 = vrot.slane %v5061_v0, %v8784_v18  ;;  %v5085_v35 = vrot.slane %v5077_v14, %v5739_v63  ;;  %v5092_v27 = vrot.slane %v5078_v13, %v5739_v63 }
 0x794   : > { %v5021_v3 = vpop.permute.xlu0 %5020  ;;  %v5025_v62 = vpop.permute.xlu1 %5024 }
 0x795   : > { %v5069_v33 = vcombine.low %v5015_v11, %v5021_v3 }
 0x797   : > { %v5076_v60 = vrot.slane %v5069_v33, %v8784_v18 }
 0x798   : > { %v5028_v17 = vpop.permute.xlu0 %5027  ;;  %v5031_v50 = vpop.permute.xlu1 %5030 }
 0x799   : > { %v5093_v54 = vcombine.low %v5068_v5, %v5076_v60  ;;  %v5094_v26 = vcombine.high %v5068_v5, %v5076_v60  ;;  %v5113_v42 = vcombine.low %v5000_v61, %v5028_v17  ;;  %v5121_v51 = vcombine.low %v5025_v62, %v5031_v50 }
 0x79b   : > { %v5101_v30 = vrot.slane %v5093_v54, %v5739_v63  ;;  %v5108_v56 = vrot.slane %v5094_v26, %v5739_v63  ;;  %v5120_v32 = vrot.slane %v5113_v42, %v8784_v18  ;;  %v5128_v49 = vrot.slane %v5121_v51, %v8784_v18 }
 0x79c   : > { %v5034_v29 = vpop.permute.xlu0 %5033  ;;  %v5037_v8 = vpop.permute.xlu1 %5036 }
 0x79d   : > { %v5109_v52 = vcombine.low %v5085_v35, %v5101_v30  ;;  %v5110_v38 = vcombine.high %v5085_v35, %v5101_v30  ;;  %v5111_v25 = vcombine.low %v5092_v27, %v5108_v56  ;;  %v5112_v39 = vcombine.high %v5092_v27, %v5108_v56 }
 0x79e   : > { %v5145_v4 = vcombine.low %v5120_v32, %v5128_v49  ;;  %v5146_v31 = vcombine.high %v5120_v32, %v5128_v49 }
 0x79f   : > { %5181 = vst.msk [vmem:[%s8494_s28] sm:$0xff] %vm441_vm3, %v5109_v52  ;;  %5183 = vst.msk [vmem:[%s8494_s28 + $0x10] sm:$0xff] %vm441_vm3, %v5110_v38 }
 0x7a0   : > { %5185 = vst.msk [vmem:[%s8494_s28 + $0x20] sm:$0xff] %vm441_vm3, %v5111_v25  ;;  %5187 = vst.msk [vmem:[%s8494_s28 + $0x30] sm:$0xff] %vm441_vm3, %v5112_v39  ;;  %v5040_v58 = vpop.permute.xlu0 %5039  ;;  %v5043_v53 = vpop.permute.xlu1 %5042  ;;  %v5153_v22 = vrot.slane %v5145_v4, %v5739_v63  ;;  %v5160_v41 = vrot.slane %v5146_v31, %v5739_v63 }
 0x7a1   : > { %v5129_v47 = vcombine.low %v5034_v29, %v5040_v58  ;;  %v5137_v7 = vcombine.low %v5037_v8, %v5043_v53 }
 0x7a3   : > { %v5136_v46 = vrot.slane %v5129_v47, %v8784_v18  ;;  %v5144_v2 = vrot.slane %v5137_v7, %v8784_v18 }
 0x7a5   : > { %v5161_v21 = vcombine.low %v5136_v46, %v5144_v2  ;;  %v5162_v16 = vcombine.high %v5136_v46, %v5144_v2 }
 0x7a7   : > { %v5169_v23 = vrot.slane %v5161_v21, %v5739_v63  ;;  %v5176_v10 = vrot.slane %v5162_v16, %v5739_v63 }
 0x7a9   : > { %v5177_v45 = vcombine.low %v5153_v22, %v5169_v23  ;;  %v5178_v36 = vcombine.high %v5153_v22, %v5169_v23  ;;  %v5179_v55 = vcombine.low %v5160_v41, %v5176_v10  ;;  %v5180_v34 = vcombine.high %v5160_v41, %v5176_v10 }
 0x7ab   : > { %5182 = vst.msk [vmem:[%s8494_s28 + $0x8] sm:$0xff] %vm441_vm3, %v5177_v45  ;;  %5184 = vst.msk [vmem:[%s8494_s28 + $0x18] sm:$0xff] %vm441_vm3, %v5178_v36 }
 0x7ac   : > { %5186 = vst.msk [vmem:[%s8494_s28 + $0x28] sm:$0xff] %vm441_vm3, %v5179_v55  ;;  %5188 = vst.msk [vmem:[%s8494_s28 + $0x38] sm:$0xff] %vm441_vm3, %v5180_v34 }
 0x7ad   : > { %5417 = shalt.err (!%p5414_p3)
}
 0x7ae   : > { %s5418_s11 = scalar_lea.hbm %s8517_s6, 1024  ;;  %s5422_s18 = scalar_lea.hbm %s8575_s3, 2048 }
 0x7af   : > { %p5419_p4 = scmp.ne.s32.totalorder %s8517_s6, %s5418_s11  ;;  %p5423_p9 = scmp.lt.u32.totalorder %s8517_s6, %s8575_s3 }
 0x7b0   : > { %p5424_p10 = scmp.lt.u32.totalorder %s5422_s18, %s5418_s11  ;;  %p5426_p12 = scmp.lt.u32.totalorder %s5418_s11, %s8517_s6 }
 0x7b1   : > { %p5420_p7 = pnand %p5419_p4, %p5546_p5 }
 0x7b2   : > { %p5425_p11 = por %p5424_p10, %p5423_p9 }
 0x7b3   : > { %p5421_p8 = pneg %p5420_p7 }
 0x7b4   : > { %p5427_p13 = por %p5426_p12, %p5425_p11 }
 0x7b6   : > { %p5428_p0 = pnand %p5427_p13, %p5421_p8 }
 0x7b8   : > { %5431 = shalt.err (!%p5428_p0)
}
 0x7b9   : > { %s5483_s25 = smov 128   ;;  %s5484_s26 = smov 8  }
 0x7ba   : > { %5301 = dma.vmem_to_hbm [thread:$0]  (%p5546_p5), %s8519_s30, 1024, %s8517_s6, %s8531_s2, %s5483_s25, %s5483_s25, %s5484_s26  }
 0x7bb PF: > { %p5307_p1 = scmp.ge.s32.totalorder %s5466_s17, 2  ;;  %s5218_s27 = sand.u32 1, %s5454_s14  }
 0x7bc   : > { %s5219_s28 = scalar_lea.sflag [#allocation6], %s5218_s27 }
 0x7bd   : > { %p5304_p2 = pnand %p5307_p1, %p5550_p6 }
 0x7bf   : > { %5449 = dma.done.wait (!%p5304_p2), %s5219_s28, 1024  }
 0x7c0   : > { %5451 = vsyncadd (!%p5304_p2), %s5219_s28, 4294966272  ;;  %p14_p3 = scmp.ge.s32.totalorder %s5533_s19, 4   ;;  %s8785_s14 = smov %s5458_s15 }
 0x7c1   : > { %s8786_s15 = smov %s5462_s16  ;;  %s8787_s16 = smov %s5544_s22 }
 0x7c2   : > { %s8788_s17 = smov %s5533_s19  ;;  %16 = sbr.rel (!%p14_p3) target bundleno = 5 (0x5), region = 68 }
 0x7c9   :  { %5224 = vsyncpa [#allocation6], 1 }
 0x7ca   :  { %5226 = vsyncpa [#allocation6 + $0x1], 1 }

</bundles_post_ra>
